<compile_context>
chip_gen: v7x
topology: tpu7x:2x2x1
jax: 0.10.0
libtpu: 0.0.40
codegen_flags: <defaults>
</compile_context>

<pallas_src>
import math

import numpy as np
import jax
import jax.numpy as jnp
from jax.experimental import pallas as pl
from jax.experimental.pallas import tpu as pltpu

# ----------------------------- configuration --------------------------------
VOCAB = 64            # synthetic SaProt/ESM vocabulary
D = 32                # ESM trunk hidden size
H = 4                 # ESM attention heads
DH = D // H           # head dim
FF = 2 * D            # ESM intermediate (FFN) size
N_LAYERS = 2          # ESM encoder layers
B = 2                 # batch
S = 8                 # (padded) sequence length
ESM_EPS = 1e-12

NUM_LATENTS = 4       # resampler latent queries
R_DEPTH = 2           # resampler depth
R_HEADS = 4
R_DH = 8
RQK = R_HEADS * R_DH  # 32
R_FF_MULT = 2
OUT_DIM = 32          # resampler output dim
R_EPS = 1e-5


# --------------------------- parameter slab packing -------------------------
class _SlabPacker:
    """Packs 2-D f32 params into one lane-dense [rows, 128] slab.

    Every parameter starts at an 8-sublane-aligned row so in-kernel static
    slices are tile-aligned loads (no relayout), and the whole model arrives
    in a single DMA.
    """
    LANES = 128

    def __init__(self):
        self._blocks = []
        self._row = 0
        self.index = {}          # name -> (row0, rows, cols)

    def add(self, name, arr):
        arr = np.asarray(arr, np.float32)
        assert arr.ndim == 2 and arr.shape[1] <= self.LANES, (name, arr.shape)
        r, c = arr.shape
        r_pad = ((r + 7) // 8) * 8
        block = np.zeros((r_pad, self.LANES), np.float32)
        block[:r, :c] = arr
        self.index[name] = (self._row, r, c)
        self._blocks.append(block)
        self._row += r_pad

    def finalize(self):
        slab = jnp.asarray(np.concatenate(self._blocks, axis=0))
        return slab, dict(self.index)


def build_param_slab(key):
    keys = iter(jax.random.split(key, 128))

    def dense(shape, std=0.02):
        return std * jax.random.normal(next(keys), shape, dtype=jnp.float32)

    ones = lambda s: np.ones(s, np.float32)
    zeros = lambda s: np.zeros(s, np.float32)

    pk = _SlabPacker()
    add = pk.add

    add("embed", dense((VOCAB, D)))

    q_scale = 1.0 / math.sqrt(DH)
    for l in range(N_LAYERS):
        pre = f"e{l}_"
        add(pre + "ln1_g", ones((1, D)));  add(pre + "ln1_b", zeros((1, D)))
        wq = np.asarray(dense((D, D))) * q_scale       # 1/sqrt(DH) folded into Wq
        wk = np.asarray(dense((D, D)))
        wv = np.asarray(dense((D, D)))
        add(pre + "wqkv", np.concatenate([wq, wk, wv], axis=1))   # (D, 3D)
        add(pre + "bqkv", zeros((1, 3 * D)))
        add(pre + "wo", dense((D, D)));    add(pre + "bo", zeros((1, D)))
        add(pre + "ln2_g", ones((1, D)));  add(pre + "ln2_b", zeros((1, D)))
        add(pre + "w1", dense((D, FF)));   add(pre + "b1", zeros((1, FF)))
        add(pre + "w2", dense((FF, D)));   add(pre + "b2", zeros((1, D)))

    add("final_ln_g", ones((1, D)));       add("final_ln_b", zeros((1, D)))
    add("latents", dense((NUM_LATENTS, D), std=1.0))

    rq_scale = 1.0 / math.sqrt(R_DH)
    for l in range(R_DEPTH):
        pre = f"r{l}_"
        add(pre + "seq_ln_g", ones((1, D)));  add(pre + "seq_ln_b", zeros((1, D)))
        add(pre + "lat_ln_g", ones((1, D)));  add(pre + "lat_ln_b", zeros((1, D)))
        wq = np.asarray(dense((D, RQK))) * rq_scale    # scale folded into Wq
        wk = np.asarray(dense((D, RQK)))
        wv = np.asarray(dense((D, RQK)))
        add(pre + "wqkv", np.concatenate([wq, wk, wv], axis=1))   # (D, 3*RQK)
        add(pre + "wo", dense((RQK, D)))                           # bias-free
        add(pre + "ff_ln_g", ones((1, D)));   add(pre + "ff_ln_b", zeros((1, D)))
        add(pre + "ffw1", dense((D, R_FF_MULT * D)))
        add(pre + "ffb1", zeros((1, R_FF_MULT * D)))
        add(pre + "ffw2", dense((R_FF_MULT * D, D)))
        add(pre + "ffb2", zeros((1, D)))

    add("proj_w", dense((D, OUT_DIM)));    add("proj_b", zeros((1, OUT_DIM)))
    add("out_ln_g", ones((1, OUT_DIM)));   add("out_ln_b", zeros((1, OUT_DIM)))
    return pk.finalize()


# ------------------------- in-kernel building blocks -------------------------
def _layernorm(x, g, b, eps):
    mu = jnp.mean(x, axis=-1, keepdims=True)
    var = jnp.mean(jnp.square(x - mu), axis=-1, keepdims=True)
    return (x - mu) * jax.lax.rsqrt(var + eps) * g + b


def _dot(a, b):
    return jnp.dot(a, b, preferred_element_type=jnp.float32)


def _dot_t(a, b):
    """[M,K] x [N,K] -> [M,N]: contract last dims (no explicit transpose)."""
    return jax.lax.dot_general(a, b, (((1,), (1,)), ((), ())),
                               preferred_element_type=jnp.float32)


def _softmax_ctx(score_parts, value_parts):
    """Joint masked softmax over concatenated key parts; returns ctx."""
    m = score_parts[0].max(axis=-1, keepdims=True)
    for s in score_parts[1:]:
        m = jnp.maximum(m, s.max(axis=-1, keepdims=True))
    probs = [jnp.exp(s - m) for s in score_parts]
    denom = probs[0].sum(axis=-1, keepdims=True)
    for p_ in probs[1:]:
        denom = denom + p_.sum(axis=-1, keepdims=True)
    ctx = _dot(probs[0], value_parts[0])
    for p_, v_ in zip(probs[1:], value_parts[1:]):
        ctx = ctx + _dot(p_, v_)
    # max-subtraction guarantees denom >= 1, so the EUP approx recip is safe.
    return ctx * pl.reciprocal(denom, approx=True)


def _rows_to_lanes(x):
    """[R, C] -> [1, R*C] lane-dense row (lane-concat of row slices)."""
    return jnp.concatenate([x[i:i + 1, :] for i in range(x.shape[0])], axis=1)


# ------------------------------ fused kernel ---------------------------------
def _make_kernel(idx):
    f32 = jnp.float32

    def kernel(ids_ref, maskcol_ref, maskrow_ref, slab_ref,
               o_embeds_ref, o_repr_ref):
        def P(name):
            r0, r, c = idx[name]
            return slab_ref[r0:r0 + r, 0:c]        # static slice of the slab

        # Additive attention-mask bias over sequence keys (computed once).
        bias = jnp.where(maskrow_ref[0] > 0.5, 0.0, -1e30).astype(f32)   # [1,S]

        # ---- ESM embedding (one-hot matmul; fine at VOCAB=64) ----
        ids = ids_ref[...]                                                # [S,1]
        onehot = (ids == jax.lax.broadcasted_iota(jnp.int32, (S, VOCAB), 1)
                  ).astype(f32)                                           # [S,V]
        x = _dot(onehot, P("embed"))                                      # [S,D]
        x = x * maskcol_ref[...]            # HF ESM zeroes pad-token embeddings

        # ---- ESM encoder layers (pre-LN attention + GELU FFN) ----
        for l in range(N_LAYERS):
            pre = f"e{l}_"
            h = _layernorm(x, P(pre + "ln1_g"), P(pre + "ln1_b"), ESM_EPS)
            qkv = _dot(h, P(pre + "wqkv")) + P(pre + "bqkv")              # [S,3D]
            ctx_heads = []
            for hh in range(H):
                q = qkv[:, hh * DH:(hh + 1) * DH]                         # scaled
                k = qkv[:, D + hh * DH:D + (hh + 1) * DH]
                v = qkv[:, 2 * D + hh * DH:2 * D + (hh + 1) * DH]
                s = _dot_t(q, k) + bias                                   # [S,S]
                ctx_heads.append(_softmax_ctx([s], [v]))                  # [S,DH]
            ctx = jnp.concatenate(ctx_heads, axis=-1)                     # [S,D]
            x = x + _dot(ctx, P(pre + "wo")) + P(pre + "bo")

            h = _layernorm(x, P(pre + "ln2_g"), P(pre + "ln2_b"), ESM_EPS)
            # TODO(synk): HF ESM uses exact erf GELU; tanh approximation here.
            mid = jax.nn.gelu(_dot(h, P(pre + "w1")) + P(pre + "b1"),
                              approximate=True)
            x = x + _dot(mid, P(pre + "w2")) + P(pre + "b2")

        embeds = _layernorm(x, P("final_ln_g"), P("final_ln_b"), ESM_EPS)  # [S,D]
        o_embeds_ref[...] = _rows_to_lanes(embeds).reshape(1, 1, S * D)

        # ---- SequenceCompressorResampler (latent cross-attention) ----
        lat = P("latents")                                                # [L,D]
        for l in range(R_DEPTH):
            pre = f"r{l}_"
            xs = _layernorm(embeds, P(pre + "seq_ln_g"), P(pre + "seq_ln_b"), R_EPS)
            ll = _layernorm(lat, P(pre + "lat_ln_g"), P(pre + "lat_ln_b"), R_EPS)

            wqkv = P(pre + "wqkv")                                        # [D,3*RQK]
            qkv_l = _dot(ll, wqkv)                                        # [L,3*RQK]
            kv_s = _dot(xs, wqkv[:, RQK:])                                # [S,2*RQK]

            ctx_heads = []
            for hh in range(R_HEADS):
                q = qkv_l[:, hh * R_DH:(hh + 1) * R_DH]                   # [L,DH]
                k_l = qkv_l[:, RQK + hh * R_DH:RQK + (hh + 1) * R_DH]
                v_l = qkv_l[:, 2 * RQK + hh * R_DH:2 * RQK + (hh + 1) * R_DH]
                k_s = kv_s[:, hh * R_DH:(hh + 1) * R_DH]
                v_s = kv_s[:, RQK + hh * R_DH:RQK + (hh + 1) * R_DH]
                s_seq = _dot_t(q, k_s) + bias                             # [L,S]
                s_lat = _dot_t(q, k_l)                                    # [L,L] unmasked
                ctx_heads.append(_softmax_ctx([s_seq, s_lat], [v_s, v_l]))
            ctx = jnp.concatenate(ctx_heads, axis=-1)                     # [L,RQK]
            lat = lat + _dot(ctx, P(pre + "wo"))

            lf = _layernorm(lat, P(pre + "ff_ln_g"), P(pre + "ff_ln_b"), R_EPS)
            mid = jax.nn.gelu(_dot(lf, P(pre + "ffw1")) + P(pre + "ffb1"),
                              approximate=True)
            lat = lat + _dot(mid, P(pre + "ffw2")) + P(pre + "ffb2")

        out = _dot(lat, P("proj_w")) + P("proj_b")
        out = _layernorm(out, P("out_ln_g"), P("out_ln_b"), R_EPS)        # [L,OUT]
        o_repr_ref[...] = _rows_to_lanes(out).reshape(1, 1, NUM_LATENTS * OUT_DIM)

    return kernel


# ------------------------------ model glue -----------------------------------
def make_forward(idx):
    kernel = _make_kernel(idx)

    def forward(slab, input_ids, attention_mask, seqs_batch_mask):
        """Mirrors SaProtSequenceEncoder.forward:
        returns (sequence_repr, sequence_embeds, mask, seqs_batch_mask)."""
        ids_col = input_ids.reshape(B * S, 1).astype(jnp.int32)
        mask_col = attention_mask.reshape(B * S, 1).astype(jnp.float32)
        mask_row = attention_mask.reshape(B, 1, S).astype(jnp.float32)

        embeds_flat, repr_flat = pl.pallas_call(
            kernel,
            grid=(B,),
            in_specs=[
                pl.BlockSpec((S, 1), lambda b: (b, 0)),
                pl.BlockSpec((S, 1), lambda b: (b, 0)),
                pl.BlockSpec((1, 1, S), lambda b: (b, 0, 0)),
                # constant index map -> weight slab DMA'd once, stays resident
                pl.BlockSpec(slab.shape, lambda b: (0, 0)),
            ],
            out_specs=(
                pl.BlockSpec((1, 1, S * D), lambda b: (b, 0, 0)),
                pl.BlockSpec((1, 1, NUM_LATENTS * OUT_DIM), lambda b: (b, 0, 0)),
            ),
            out_shape=(
                jax.ShapeDtypeStruct((B, 1, S * D), jnp.float32),
                jax.ShapeDtypeStruct((B, 1, NUM_LATENTS * OUT_DIM), jnp.float32),
            ),
            compiler_params=pltpu.CompilerParams(
                dimension_semantics=("parallel",)),
        )(ids_col, mask_col, mask_row, slab)

        seq_embeds = embeds_flat.reshape(B, S, D)
        seq_repr = repr_flat.reshape(B, NUM_LATENTS, OUT_DIM)
        return seq_repr, seq_embeds, attention_mask, seqs_batch_mask

    return forward


# --------------------------------- main ---------------------------------------
if __name__ == "__main__":
    key = jax.random.PRNGKey(0)
    pkey, ikey = jax.random.split(key)
    slab, idx = build_param_slab(pkey)

    # "tokenized" protein sequences (the tokenizer itself is not a kernel op)
    input_ids = jax.random.randint(ikey, (B, S), 0, VOCAB, dtype=jnp.int32)
    attention_mask = jnp.array([[1.0] * S,
                                [1.0] * 6 + [0.0] * 2], dtype=jnp.float32)
    seqs_batch_mask = jnp.array([True, True])

    fwd = jax.jit(make_forward(idx))
    seq_repr, seq_embeds, mask_out, batch_mask = fwd(
        slab, input_ids, attention_mask, seqs_batch_mask)
    jax.block_until_ready((seq_repr, seq_embeds, mask_out, batch_mask))

    assert seq_repr.shape == (B, NUM_LATENTS, OUT_DIM)
    assert seq_embeds.shape == (B, S, D)
    assert mask_out.shape == (B, S)
    assert batch_mask.shape == (B,)
    assert bool(jnp.all(jnp.isfinite(seq_repr)))
    assert bool(jnp.all(jnp.isfinite(seq_embeds)))
    print("KERNEL_OK")
</pallas_src>

<mosaic_0001>
module attributes {stable_mosaic.version = 11 : i64} {
  func.func @kernel(%arg0: i32, %arg1: memref<8x1xi32, #tpu.memory_space<vmem>>, %arg2: memref<8x1xf32, #tpu.memory_space<vmem>>, %arg3: memref<1x1x8xf32, #tpu.memory_space<vmem>>, %arg4: memref<1040x128xf32, #tpu.memory_space<vmem>>, %arg5: memref<1x1x256xf32, #tpu.memory_space<vmem>>, %arg6: memref<1x1x128xf32, #tpu.memory_space<vmem>>) attributes {dimension_semantics = [#tpu.dimension_semantics<parallel>], iteration_bounds = array<i64: 2>, scalar_prefetch = 0 : i64, scratch_operands = 0 : i64, tpu.core_type = #tpu.core_type<tc>, window_params = [{transform_indices = @transform_0, window_bounds = array<i64: 8, 1>}, {transform_indices = @transform_1, window_bounds = array<i64: 8, 1>}, {transform_indices = @transform_2, window_bounds = array<i64: 1, 1, 8>}, {pipeline_mode = #tpu.pipeline_mode<synchronous>, transform_indices = @transform_3, window_bounds = array<i64: 1040, 128>}, {transform_indices = @transform_4, window_bounds = array<i64: 1, 1, 256>}, {transform_indices = @transform_5, window_bounds = array<i64: 1, 1, 128>}]} {
    %c0 = arith.constant 0 : index
    %c0_0 = arith.constant 0 : index
    %c0_1 = arith.constant 0 : index
    %0 = vector.load %arg3[%c0, %c0_0, %c0_1] : memref<1x1x8xf32, #tpu.memory_space<vmem>>, vector<1x1x8xf32>
    %1 = vector.shape_cast %0 : vector<1x1x8xf32> to vector<1x8xf32>
    %cst = arith.constant 5.000000e-01 : f32
    %2 = vector.broadcast %cst : f32 to vector<1x8xf32>
    %3 = arith.cmpf ogt, %1, %2 : vector<1x8xf32>
    %cst_2 = arith.constant 0.000000e+00 : f32
    %cst_3 = arith.constant -1.000000e+30 : f32
    %4 = vector.broadcast %cst_2 : f32 to vector<1x8xf32>
    %5 = vector.broadcast %cst_3 : f32 to vector<1x8xf32>
    %6 = arith.select %3, %4, %5 : vector<1x8xi1>, vector<1x8xf32>
    %c0_4 = arith.constant 0 : index
    %c0_5 = arith.constant 0 : index
    %7 = vector.load %arg1[%c0_4, %c0_5] : memref<8x1xi32, #tpu.memory_space<vmem>>, vector<8x1xi32>
    %8 = tpu.iota {dimensions = array<i32: 1>} : vector<8x64xi32>
    %9 = vector.broadcast %7 : vector<8x1xi32> to vector<8x64xi32>
    %10 = arith.cmpi eq, %9, %8 : vector<8x64xi32>
    %11 = arith.extui %10 : vector<8x64xi1> to vector<8x64xi32>
    %12 = arith.sitofp %11 : vector<8x64xi32> to vector<8x64xf32>
    %c0_6 = arith.constant 0 : index
    %c0_7 = arith.constant 0 : index
    %13 = vector.load %arg4[%c0_6, %c0_7] : memref<1040x128xf32, #tpu.memory_space<vmem>>, vector<64x32xf32>
    %cst_8 = arith.constant dense<0.000000e+00> : vector<8x32xf32>
    %14 = tpu.matmul %12, %13, %cst_8 {dimension_numbers = #tpu.dot_dimension_numbers<[1], [0], [0], [1], [0, 0, 1, 1], [], []>} : vector<8x64xf32>, vector<64x32xf32>, vector<8x32xf32> -> vector<8x32xf32>
    %c0_9 = arith.constant 0 : index
    %c0_10 = arith.constant 0 : index
    %15 = vector.load %arg2[%c0_9, %c0_10] : memref<8x1xf32, #tpu.memory_space<vmem>>, vector<8x1xf32>
    %16 = vector.broadcast %15 : vector<8x1xf32> to vector<8x32xf32>
    %17 = arith.mulf %14, %16 : vector<8x32xf32>
    %c64 = arith.constant 64 : index
    %c0_11 = arith.constant 0 : index
    %18 = vector.load %arg4[%c64, %c0_11] : memref<1040x128xf32, #tpu.memory_space<vmem>>, vector<1x32xf32>
    %c72 = arith.constant 72 : index
    %c0_12 = arith.constant 0 : index
    %19 = vector.load %arg4[%c72, %c0_12] : memref<1040x128xf32, #tpu.memory_space<vmem>>, vector<1x32xf32>
    %cst_13 = arith.constant dense<0.000000e+00> : vector<8xf32>
    %20 = vector.multi_reduction <add>, %17, %cst_13 [1] : vector<8x32xf32> to vector<8xf32>
    %21 = vector.shape_cast %20 : vector<8xf32> to vector<8x1xf32>
    %cst_14 = arith.constant 3.200000e+01 : f32
    %22 = vector.broadcast %cst_14 : f32 to vector<8x1xf32>
    %23 = arith.divf %21, %22 : vector<8x1xf32>
    %24 = vector.broadcast %23 : vector<8x1xf32> to vector<8x32xf32>
    %25 = arith.subf %17, %24 : vector<8x32xf32>
    %26 = arith.mulf %25, %25 : vector<8x32xf32>
    %cst_15 = arith.constant dense<0.000000e+00> : vector<8xf32>
    %27 = vector.multi_reduction <add>, %26, %cst_15 [1] : vector<8x32xf32> to vector<8xf32>
    %28 = vector.shape_cast %27 : vector<8xf32> to vector<8x1xf32>
    %cst_16 = arith.constant 3.200000e+01 : f32
    %29 = vector.broadcast %cst_16 : f32 to vector<8x1xf32>
    %30 = arith.divf %28, %29 : vector<8x1xf32>
    %31 = vector.broadcast %23 : vector<8x1xf32> to vector<8x32xf32>
    %32 = arith.subf %17, %31 : vector<8x32xf32>
    %cst_17 = arith.constant 9.99999996E-13 : f32
    %33 = vector.broadcast %cst_17 : f32 to vector<8x1xf32>
    %34 = arith.addf %30, %33 : vector<8x1xf32>
    %35 = math.rsqrt %34 : vector<8x1xf32>
    %36 = vector.broadcast %35 : vector<8x1xf32> to vector<8x32xf32>
    %37 = arith.mulf %32, %36 : vector<8x32xf32>
    %38 = vector.broadcast %18 : vector<1x32xf32> to vector<8x32xf32>
    %39 = arith.mulf %37, %38 : vector<8x32xf32>
    %40 = vector.broadcast %19 : vector<1x32xf32> to vector<8x32xf32>
    %41 = arith.addf %39, %40 : vector<8x32xf32>
    %c80 = arith.constant 80 : index
    %c0_18 = arith.constant 0 : index
    %42 = vector.load %arg4[%c80, %c0_18] : memref<1040x128xf32, #tpu.memory_space<vmem>>, vector<32x96xf32>
    %cst_19 = arith.constant dense<0.000000e+00> : vector<8x96xf32>
    %43 = tpu.matmul %41, %42, %cst_19 {dimension_numbers = #tpu.dot_dimension_numbers<[1], [0], [0], [1], [0, 0, 1, 1], [], []>} : vector<8x32xf32>, vector<32x96xf32>, vector<8x96xf32> -> vector<8x96xf32>
    %c112 = arith.constant 112 : index
    %c0_20 = arith.constant 0 : index
    %44 = vector.load %arg4[%c112, %c0_20] : memref<1040x128xf32, #tpu.memory_space<vmem>>, vector<1x96xf32>
    %45 = vector.broadcast %44 : vector<1x96xf32> to vector<8x96xf32>
    %46 = arith.addf %43, %45 : vector<8x96xf32>
    %47 = vector.extract_strided_slice %46 {offsets = [0, 0], sizes = [8, 8], strides = [1, 1]} : vector<8x96xf32> to vector<8x8xf32>
    %48 = vector.extract_strided_slice %46 {offsets = [0, 32], sizes = [8, 8], strides = [1, 1]} : vector<8x96xf32> to vector<8x8xf32>
    %49 = vector.extract_strided_slice %46 {offsets = [0, 64], sizes = [8, 8], strides = [1, 1]} : vector<8x96xf32> to vector<8x8xf32>
    %cst_21 = arith.constant dense<0.000000e+00> : vector<8x8xf32>
    %50 = tpu.matmul %47, %48, %cst_21 {dimension_numbers = #tpu.dot_dimension_numbers<[1], [1], [0], [0], [0, 0, 1, 0], [], []>} : vector<8x8xf32>, vector<8x8xf32>, vector<8x8xf32> -> vector<8x8xf32>
    %51 = vector.broadcast %6 : vector<1x8xf32> to vector<8x8xf32>
    %52 = arith.addf %50, %51 : vector<8x8xf32>
    %cst_22 = arith.constant dense<0xFF800000> : vector<8xf32>
    %53 = vector.multi_reduction <maximumf>, %52, %cst_22 [1] : vector<8x8xf32> to vector<8xf32>
    %54 = vector.shape_cast %53 : vector<8xf32> to vector<8x1xf32>
    %55 = vector.broadcast %54 : vector<8x1xf32> to vector<8x8xf32>
    %56 = arith.subf %52, %55 : vector<8x8xf32>
    %57 = math.exp %56 : vector<8x8xf32>
    %cst_23 = arith.constant dense<0.000000e+00> : vector<8xf32>
    %58 = vector.multi_reduction <add>, %57, %cst_23 [1] : vector<8x8xf32> to vector<8xf32>
    %59 = vector.shape_cast %58 : vector<8xf32> to vector<8x1xf32>
    %cst_24 = arith.constant dense<0.000000e+00> : vector<8x8xf32>
    %60 = tpu.matmul %57, %49, %cst_24 {dimension_numbers = #tpu.dot_dimension_numbers<[1], [0], [0], [1], [0, 0, 1, 1], [], []>} : vector<8x8xf32>, vector<8x8xf32>, vector<8x8xf32> -> vector<8x8xf32>
    %61 = tpu.reciprocal %59 {approx = true} : vector<8x1xf32> -> vector<8x1xf32>
    %62 = vector.broadcast %61 : vector<8x1xf32> to vector<8x8xf32>
    %63 = arith.mulf %60, %62 : vector<8x8xf32>
    %64 = vector.extract_strided_slice %46 {offsets = [0, 8], sizes = [8, 8], strides = [1, 1]} : vector<8x96xf32> to vector<8x8xf32>
    %65 = vector.extract_strided_slice %46 {offsets = [0, 40], sizes = [8, 8], strides = [1, 1]} : vector<8x96xf32> to vector<8x8xf32>
    %66 = vector.extract_strided_slice %46 {offsets = [0, 72], sizes = [8, 8], strides = [1, 1]} : vector<8x96xf32> to vector<8x8xf32>
    %cst_25 = arith.constant dense<0.000000e+00> : vector<8x8xf32>
    %67 = tpu.matmul %64, %65, %cst_25 {dimension_numbers = #tpu.dot_dimension_numbers<[1], [1], [0], [0], [0, 0, 1, 0], [], []>} : vector<8x8xf32>, vector<8x8xf32>, vector<8x8xf32> -> vector<8x8xf32>
    %68 = vector.broadcast %6 : vector<1x8xf32> to vector<8x8xf32>
    %69 = arith.addf %67, %68 : vector<8x8xf32>
    %cst_26 = arith.constant dense<0xFF800000> : vector<8xf32>
    %70 = vector.multi_reduction <maximumf>, %69, %cst_26 [1] : vector<8x8xf32> to vector<8xf32>
    %71 = vector.shape_cast %70 : vector<8xf32> to vector<8x1xf32>
    %72 = vector.broadcast %71 : vector<8x1xf32> to vector<8x8xf32>
    %73 = arith.subf %69, %72 : vector<8x8xf32>
    %74 = math.exp %73 : vector<8x8xf32>
    %cst_27 = arith.constant dense<0.000000e+00> : vector<8xf32>
    %75 = vector.multi_reduction <add>, %74, %cst_27 [1] : vector<8x8xf32> to vector<8xf32>
    %76 = vector.shape_cast %75 : vector<8xf32> to vector<8x1xf32>
    %cst_28 = arith.constant dense<0.000000e+00> : vector<8x8xf32>
    %77 = tpu.matmul %74, %66, %cst_28 {dimension_numbers = #tpu.dot_dimension_numbers<[1], [0], [0], [1], [0, 0, 1, 1], [], []>} : vector<8x8xf32>, vector<8x8xf32>, vector<8x8xf32> -> vector<8x8xf32>
    %78 = tpu.reciprocal %76 {approx = true} : vector<8x1xf32> -> vector<8x1xf32>
    %79 = vector.broadcast %78 : vector<8x1xf32> to vector<8x8xf32>
    %80 = arith.mulf %77, %79 : vector<8x8xf32>
    %81 = vector.extract_strided_slice %46 {offsets = [0, 16], sizes = [8, 8], strides = [1, 1]} : vector<8x96xf32> to vector<8x8xf32>
    %82 = vector.extract_strided_slice %46 {offsets = [0, 48], sizes = [8, 8], strides = [1, 1]} : vector<8x96xf32> to vector<8x8xf32>
    %83 = vector.extract_strided_slice %46 {offsets = [0, 80], sizes = [8, 8], strides = [1, 1]} : vector<8x96xf32> to vector<8x8xf32>
    %cst_29 = arith.constant dense<0.000000e+00> : vector<8x8xf32>
    %84 = tpu.matmul %81, %82, %cst_29 {dimension_numbers = #tpu.dot_dimension_numbers<[1], [1], [0], [0], [0, 0, 1, 0], [], []>} : vector<8x8xf32>, vector<8x8xf32>, vector<8x8xf32> -> vector<8x8xf32>
    %85 = vector.broadcast %6 : vector<1x8xf32> to vector<8x8xf32>
    %86 = arith.addf %84, %85 : vector<8x8xf32>
    %cst_30 = arith.constant dense<0xFF800000> : vector<8xf32>
    %87 = vector.multi_reduction <maximumf>, %86, %cst_30 [1] : vector<8x8xf32> to vector<8xf32>
    %88 = vector.shape_cast %87 : vector<8xf32> to vector<8x1xf32>
    %89 = vector.broadcast %88 : vector<8x1xf32> to vector<8x8xf32>
    %90 = arith.subf %86, %89 : vector<8x8xf32>
    %91 = math.exp %90 : vector<8x8xf32>
    %cst_31 = arith.constant dense<0.000000e+00> : vector<8xf32>
    %92 = vector.multi_reduction <add>, %91, %cst_31 [1] : vector<8x8xf32> to vector<8xf32>
    %93 = vector.shape_cast %92 : vector<8xf32> to vector<8x1xf32>
    %cst_32 = arith.constant dense<0.000000e+00> : vector<8x8xf32>
    %94 = tpu.matmul %91, %83, %cst_32 {dimension_numbers = #tpu.dot_dimension_numbers<[1], [0], [0], [1], [0, 0, 1, 1], [], []>} : vector<8x8xf32>, vector<8x8xf32>, vector<8x8xf32> -> vector<8x8xf32>
    %95 = tpu.reciprocal %93 {approx = true} : vector<8x1xf32> -> vector<8x1xf32>
    %96 = vector.broadcast %95 : vector<8x1xf32> to vector<8x8xf32>
    %97 = arith.mulf %94, %96 : vector<8x8xf32>
    %98 = vector.extract_strided_slice %46 {offsets = [0, 24], sizes = [8, 8], strides = [1, 1]} : vector<8x96xf32> to vector<8x8xf32>
    %99 = vector.extract_strided_slice %46 {offsets = [0, 56], sizes = [8, 8], strides = [1, 1]} : vector<8x96xf32> to vector<8x8xf32>
    %100 = vector.extract_strided_slice %46 {offsets = [0, 88], sizes = [8, 8], strides = [1, 1]} : vector<8x96xf32> to vector<8x8xf32>
    %cst_33 = arith.constant dense<0.000000e+00> : vector<8x8xf32>
    %101 = tpu.matmul %98, %99, %cst_33 {dimension_numbers = #tpu.dot_dimension_numbers<[1], [1], [0], [0], [0, 0, 1, 0], [], []>} : vector<8x8xf32>, vector<8x8xf32>, vector<8x8xf32> -> vector<8x8xf32>
    %102 = vector.broadcast %6 : vector<1x8xf32> to vector<8x8xf32>
    %103 = arith.addf %101, %102 : vector<8x8xf32>
    %cst_34 = arith.constant dense<0xFF800000> : vector<8xf32>
    %104 = vector.multi_reduction <maximumf>, %103, %cst_34 [1] : vector<8x8xf32> to vector<8xf32>
    %105 = vector.shape_cast %104 : vector<8xf32> to vector<8x1xf32>
    %106 = vector.broadcast %105 : vector<8x1xf32> to vector<8x8xf32>
    %107 = arith.subf %103, %106 : vector<8x8xf32>
    %108 = math.exp %107 : vector<8x8xf32>
    %cst_35 = arith.constant dense<0.000000e+00> : vector<8xf32>
    %109 = vector.multi_reduction <add>, %108, %cst_35 [1] : vector<8x8xf32> to vector<8xf32>
    %110 = vector.shape_cast %109 : vector<8xf32> to vector<8x1xf32>
    %cst_36 = arith.constant dense<0.000000e+00> : vector<8x8xf32>
    %111 = tpu.matmul %108, %100, %cst_36 {dimension_numbers = #tpu.dot_dimension_numbers<[1], [0], [0], [1], [0, 0, 1, 1], [], []>} : vector<8x8xf32>, vector<8x8xf32>, vector<8x8xf32> -> vector<8x8xf32>
    %112 = tpu.reciprocal %110 {approx = true} : vector<8x1xf32> -> vector<8x1xf32>
    %113 = vector.broadcast %112 : vector<8x1xf32> to vector<8x8xf32>
    %114 = arith.mulf %111, %113 : vector<8x8xf32>
    %115 = tpu.concatenate %63, %80, %97, %114 in 1 : vector<8x8xf32>, vector<8x8xf32>, vector<8x8xf32>, vector<8x8xf32> -> vector<8x32xf32>
    %c120 = arith.constant 120 : index
    %c0_37 = arith.constant 0 : index
    %116 = vector.load %arg4[%c120, %c0_37] : memref<1040x128xf32, #tpu.memory_space<vmem>>, vector<32x32xf32>
    %cst_38 = arith.constant dense<0.000000e+00> : vector<8x32xf32>
    %117 = tpu.matmul %115, %116, %cst_38 {dimension_numbers = #tpu.dot_dimension_numbers<[1], [0], [0], [1], [0, 0, 1, 1], [], []>} : vector<8x32xf32>, vector<32x32xf32>, vector<8x32xf32> -> vector<8x32xf32>
    %118 = arith.addf %17, %117 : vector<8x32xf32>
    %c152 = arith.constant 152 : index
    %c0_39 = arith.constant 0 : index
    %119 = vector.load %arg4[%c152, %c0_39] : memref<1040x128xf32, #tpu.memory_space<vmem>>, vector<1x32xf32>
    %120 = vector.broadcast %119 : vector<1x32xf32> to vector<8x32xf32>
    %121 = arith.addf %118, %120 : vector<8x32xf32>
    %c160 = arith.constant 160 : index
    %c0_40 = arith.constant 0 : index
    %122 = vector.load %arg4[%c160, %c0_40] : memref<1040x128xf32, #tpu.memory_space<vmem>>, vector<1x32xf32>
    %c168 = arith.constant 168 : index
    %c0_41 = arith.constant 0 : index
    %123 = vector.load %arg4[%c168, %c0_41] : memref<1040x128xf32, #tpu.memory_space<vmem>>, vector<1x32xf32>
    %cst_42 = arith.constant dense<0.000000e+00> : vector<8xf32>
    %124 = vector.multi_reduction <add>, %121, %cst_42 [1] : vector<8x32xf32> to vector<8xf32>
    %125 = vector.shape_cast %124 : vector<8xf32> to vector<8x1xf32>
    %cst_43 = arith.constant 3.200000e+01 : f32
    %126 = vector.broadcast %cst_43 : f32 to vector<8x1xf32>
    %127 = arith.divf %125, %126 : vector<8x1xf32>
    %128 = vector.broadcast %127 : vector<8x1xf32> to vector<8x32xf32>
    %129 = arith.subf %121, %128 : vector<8x32xf32>
    %130 = arith.mulf %129, %129 : vector<8x32xf32>
    %cst_44 = arith.constant dense<0.000000e+00> : vector<8xf32>
    %131 = vector.multi_reduction <add>, %130, %cst_44 [1] : vector<8x32xf32> to vector<8xf32>
    %132 = vector.shape_cast %131 : vector<8xf32> to vector<8x1xf32>
    %cst_45 = arith.constant 3.200000e+01 : f32
    %133 = vector.broadcast %cst_45 : f32 to vector<8x1xf32>
    %134 = arith.divf %132, %133 : vector<8x1xf32>
    %135 = vector.broadcast %127 : vector<8x1xf32> to vector<8x32xf32>
    %136 = arith.subf %121, %135 : vector<8x32xf32>
    %cst_46 = arith.constant 9.99999996E-13 : f32
    %137 = vector.broadcast %cst_46 : f32 to vector<8x1xf32>
    %138 = arith.addf %134, %137 : vector<8x1xf32>
    %139 = math.rsqrt %138 : vector<8x1xf32>
    %140 = vector.broadcast %139 : vector<8x1xf32> to vector<8x32xf32>
    %141 = arith.mulf %136, %140 : vector<8x32xf32>
    %142 = vector.broadcast %122 : vector<1x32xf32> to vector<8x32xf32>
    %143 = arith.mulf %141, %142 : vector<8x32xf32>
    %144 = vector.broadcast %123 : vector<1x32xf32> to vector<8x32xf32>
    %145 = arith.addf %143, %144 : vector<8x32xf32>
    %c176 = arith.constant 176 : index
    %c0_47 = arith.constant 0 : index
    %146 = vector.load %arg4[%c176, %c0_47] : memref<1040x128xf32, #tpu.memory_space<vmem>>, vector<32x64xf32>
    %cst_48 = arith.constant dense<0.000000e+00> : vector<8x64xf32>
    %147 = tpu.matmul %145, %146, %cst_48 {dimension_numbers = #tpu.dot_dimension_numbers<[1], [0], [0], [1], [0, 0, 1, 1], [], []>} : vector<8x32xf32>, vector<32x64xf32>, vector<8x64xf32> -> vector<8x64xf32>
    %c208 = arith.constant 208 : index
    %c0_49 = arith.constant 0 : index
    %148 = vector.load %arg4[%c208, %c0_49] : memref<1040x128xf32, #tpu.memory_space<vmem>>, vector<1x64xf32>
    %149 = vector.broadcast %148 : vector<1x64xf32> to vector<8x64xf32>
    %150 = arith.addf %147, %149 : vector<8x64xf32>
    %151 = arith.mulf %150, %150 : vector<8x64xf32>
    %152 = arith.mulf %150, %151 : vector<8x64xf32>
    %cst_50 = arith.constant 4.471500e-02 : f32
    %153 = vector.broadcast %cst_50 : f32 to vector<8x64xf32>
    %154 = arith.mulf %153, %152 : vector<8x64xf32>
    %155 = arith.addf %150, %154 : vector<8x64xf32>
    %cst_51 = arith.constant 0.797884583 : f32
    %156 = vector.broadcast %cst_51 : f32 to vector<8x64xf32>
    %157 = arith.mulf %156, %155 : vector<8x64xf32>
    %158 = math.tanh %157 : vector<8x64xf32>
    %cst_52 = arith.constant 1.000000e+00 : f32
    %159 = vector.broadcast %cst_52 : f32 to vector<8x64xf32>
    %160 = arith.addf %159, %158 : vector<8x64xf32>
    %cst_53 = arith.constant 5.000000e-01 : f32
    %161 = vector.broadcast %cst_53 : f32 to vector<8x64xf32>
    %162 = arith.mulf %161, %160 : vector<8x64xf32>
    %163 = arith.mulf %150, %162 : vector<8x64xf32>
    %c216 = arith.constant 216 : index
    %c0_54 = arith.constant 0 : index
    %164 = vector.load %arg4[%c216, %c0_54] : memref<1040x128xf32, #tpu.memory_space<vmem>>, vector<64x32xf32>
    %cst_55 = arith.constant dense<0.000000e+00> : vector<8x32xf32>
    %165 = tpu.matmul %163, %164, %cst_55 {dimension_numbers = #tpu.dot_dimension_numbers<[1], [0], [0], [1], [0, 0, 1, 1], [], []>} : vector<8x64xf32>, vector<64x32xf32>, vector<8x32xf32> -> vector<8x32xf32>
    %166 = arith.addf %121, %165 : vector<8x32xf32>
    %c280 = arith.constant 280 : index
    %c0_56 = arith.constant 0 : index
    %167 = vector.load %arg4[%c280, %c0_56] : memref<1040x128xf32, #tpu.memory_space<vmem>>, vector<1x32xf32>
    %168 = vector.broadcast %167 : vector<1x32xf32> to vector<8x32xf32>
    %169 = arith.addf %166, %168 : vector<8x32xf32>
    %c288 = arith.constant 288 : index
    %c0_57 = arith.constant 0 : index
    %170 = vector.load %arg4[%c288, %c0_57] : memref<1040x128xf32, #tpu.memory_space<vmem>>, vector<1x32xf32>
    %c296 = arith.constant 296 : index
    %c0_58 = arith.constant 0 : index
    %171 = vector.load %arg4[%c296, %c0_58] : memref<1040x128xf32, #tpu.memory_space<vmem>>, vector<1x32xf32>
    %cst_59 = arith.constant dense<0.000000e+00> : vector<8xf32>
    %172 = vector.multi_reduction <add>, %169, %cst_59 [1] : vector<8x32xf32> to vector<8xf32>
    %173 = vector.shape_cast %172 : vector<8xf32> to vector<8x1xf32>
    %cst_60 = arith.constant 3.200000e+01 : f32
    %174 = vector.broadcast %cst_60 : f32 to vector<8x1xf32>
    %175 = arith.divf %173, %174 : vector<8x1xf32>
    %176 = vector.broadcast %175 : vector<8x1xf32> to vector<8x32xf32>
    %177 = arith.subf %169, %176 : vector<8x32xf32>
    %178 = arith.mulf %177, %177 : vector<8x32xf32>
    %cst_61 = arith.constant dense<0.000000e+00> : vector<8xf32>
    %179 = vector.multi_reduction <add>, %178, %cst_61 [1] : vector<8x32xf32> to vector<8xf32>
    %180 = vector.shape_cast %179 : vector<8xf32> to vector<8x1xf32>
    %cst_62 = arith.constant 3.200000e+01 : f32
    %181 = vector.broadcast %cst_62 : f32 to vector<8x1xf32>
    %182 = arith.divf %180, %181 : vector<8x1xf32>
    %183 = vector.broadcast %175 : vector<8x1xf32> to vector<8x32xf32>
    %184 = arith.subf %169, %183 : vector<8x32xf32>
    %cst_63 = arith.constant 9.99999996E-13 : f32
    %185 = vector.broadcast %cst_63 : f32 to vector<8x1xf32>
    %186 = arith.addf %182, %185 : vector<8x1xf32>
    %187 = math.rsqrt %186 : vector<8x1xf32>
    %188 = vector.broadcast %187 : vector<8x1xf32> to vector<8x32xf32>
    %189 = arith.mulf %184, %188 : vector<8x32xf32>
    %190 = vector.broadcast %170 : vector<1x32xf32> to vector<8x32xf32>
    %191 = arith.mulf %189, %190 : vector<8x32xf32>
    %192 = vector.broadcast %171 : vector<1x32xf32> to vector<8x32xf32>
    %193 = arith.addf %191, %192 : vector<8x32xf32>
    %c304 = arith.constant 304 : index
    %c0_64 = arith.constant 0 : index
    %194 = vector.load %arg4[%c304, %c0_64] : memref<1040x128xf32, #tpu.memory_space<vmem>>, vector<32x96xf32>
    %cst_65 = arith.constant dense<0.000000e+00> : vector<8x96xf32>
    %195 = tpu.matmul %193, %194, %cst_65 {dimension_numbers = #tpu.dot_dimension_numbers<[1], [0], [0], [1], [0, 0, 1, 1], [], []>} : vector<8x32xf32>, vector<32x96xf32>, vector<8x96xf32> -> vector<8x96xf32>
    %c336 = arith.constant 336 : index
    %c0_66 = arith.constant 0 : index
    %196 = vector.load %arg4[%c336, %c0_66] : memref<1040x128xf32, #tpu.memory_space<vmem>>, vector<1x96xf32>
    %197 = vector.broadcast %196 : vector<1x96xf32> to vector<8x96xf32>
    %198 = arith.addf %195, %197 : vector<8x96xf32>
    %199 = vector.extract_strided_slice %198 {offsets = [0, 0], sizes = [8, 8], strides = [1, 1]} : vector<8x96xf32> to vector<8x8xf32>
    %200 = vector.extract_strided_slice %198 {offsets = [0, 32], sizes = [8, 8], strides = [1, 1]} : vector<8x96xf32> to vector<8x8xf32>
    %201 = vector.extract_strided_slice %198 {offsets = [0, 64], sizes = [8, 8], strides = [1, 1]} : vector<8x96xf32> to vector<8x8xf32>
    %cst_67 = arith.constant dense<0.000000e+00> : vector<8x8xf32>
    %202 = tpu.matmul %199, %200, %cst_67 {dimension_numbers = #tpu.dot_dimension_numbers<[1], [1], [0], [0], [0, 0, 1, 0], [], []>} : vector<8x8xf32>, vector<8x8xf32>, vector<8x8xf32> -> vector<8x8xf32>
    %203 = vector.broadcast %6 : vector<1x8xf32> to vector<8x8xf32>
    %204 = arith.addf %202, %203 : vector<8x8xf32>
    %cst_68 = arith.constant dense<0xFF800000> : vector<8xf32>
    %205 = vector.multi_reduction <maximumf>, %204, %cst_68 [1] : vector<8x8xf32> to vector<8xf32>
    %206 = vector.shape_cast %205 : vector<8xf32> to vector<8x1xf32>
    %207 = vector.broadcast %206 : vector<8x1xf32> to vector<8x8xf32>
    %208 = arith.subf %204, %207 : vector<8x8xf32>
    %209 = math.exp %208 : vector<8x8xf32>
    %cst_69 = arith.constant dense<0.000000e+00> : vector<8xf32>
    %210 = vector.multi_reduction <add>, %209, %cst_69 [1] : vector<8x8xf32> to vector<8xf32>
    %211 = vector.shape_cast %210 : vector<8xf32> to vector<8x1xf32>
    %cst_70 = arith.constant dense<0.000000e+00> : vector<8x8xf32>
    %212 = tpu.matmul %209, %201, %cst_70 {dimension_numbers = #tpu.dot_dimension_numbers<[1], [0], [0], [1], [0, 0, 1, 1], [], []>} : vector<8x8xf32>, vector<8x8xf32>, vector<8x8xf32> -> vector<8x8xf32>
    %213 = tpu.reciprocal %211 {approx = true} : vector<8x1xf32> -> vector<8x1xf32>
    %214 = vector.broadcast %213 : vector<8x1xf32> to vector<8x8xf32>
    %215 = arith.mulf %212, %214 : vector<8x8xf32>
    %216 = vector.extract_strided_slice %198 {offsets = [0, 8], sizes = [8, 8], strides = [1, 1]} : vector<8x96xf32> to vector<8x8xf32>
    %217 = vector.extract_strided_slice %198 {offsets = [0, 40], sizes = [8, 8], strides = [1, 1]} : vector<8x96xf32> to vector<8x8xf32>
    %218 = vector.extract_strided_slice %198 {offsets = [0, 72], sizes = [8, 8], strides = [1, 1]} : vector<8x96xf32> to vector<8x8xf32>
    %cst_71 = arith.constant dense<0.000000e+00> : vector<8x8xf32>
    %219 = tpu.matmul %216, %217, %cst_71 {dimension_numbers = #tpu.dot_dimension_numbers<[1], [1], [0], [0], [0, 0, 1, 0], [], []>} : vector<8x8xf32>, vector<8x8xf32>, vector<8x8xf32> -> vector<8x8xf32>
    %220 = vector.broadcast %6 : vector<1x8xf32> to vector<8x8xf32>
    %221 = arith.addf %219, %220 : vector<8x8xf32>
    %cst_72 = arith.constant dense<0xFF800000> : vector<8xf32>
    %222 = vector.multi_reduction <maximumf>, %221, %cst_72 [1] : vector<8x8xf32> to vector<8xf32>
    %223 = vector.shape_cast %222 : vector<8xf32> to vector<8x1xf32>
    %224 = vector.broadcast %223 : vector<8x1xf32> to vector<8x8xf32>
    %225 = arith.subf %221, %224 : vector<8x8xf32>
    %226 = math.exp %225 : vector<8x8xf32>
    %cst_73 = arith.constant dense<0.000000e+00> : vector<8xf32>
    %227 = vector.multi_reduction <add>, %226, %cst_73 [1] : vector<8x8xf32> to vector<8xf32>
    %228 = vector.shape_cast %227 : vector<8xf32> to vector<8x1xf32>
    %cst_74 = arith.constant dense<0.000000e+00> : vector<8x8xf32>
    %229 = tpu.matmul %226, %218, %cst_74 {dimension_numbers = #tpu.dot_dimension_numbers<[1], [0], [0], [1], [0, 0, 1, 1], [], []>} : vector<8x8xf32>, vector<8x8xf32>, vector<8x8xf32> -> vector<8x8xf32>
    %230 = tpu.reciprocal %228 {approx = true} : vector<8x1xf32> -> vector<8x1xf32>
    %231 = vector.broadcast %230 : vector<8x1xf32> to vector<8x8xf32>
    %232 = arith.mulf %229, %231 : vector<8x8xf32>
    %233 = vector.extract_strided_slice %198 {offsets = [0, 16], sizes = [8, 8], strides = [1, 1]} : vector<8x96xf32> to vector<8x8xf32>
    %234 = vector.extract_strided_slice %198 {offsets = [0, 48], sizes = [8, 8], strides = [1, 1]} : vector<8x96xf32> to vector<8x8xf32>
    %235 = vector.extract_strided_slice %198 {offsets = [0, 80], sizes = [8, 8], strides = [1, 1]} : vector<8x96xf32> to vector<8x8xf32>
    %cst_75 = arith.constant dense<0.000000e+00> : vector<8x8xf32>
    %236 = tpu.matmul %233, %234, %cst_75 {dimension_numbers = #tpu.dot_dimension_numbers<[1], [1], [0], [0], [0, 0, 1, 0], [], []>} : vector<8x8xf32>, vector<8x8xf32>, vector<8x8xf32> -> vector<8x8xf32>
    %237 = vector.broadcast %6 : vector<1x8xf32> to vector<8x8xf32>
    %238 = arith.addf %236, %237 : vector<8x8xf32>
    %cst_76 = arith.constant dense<0xFF800000> : vector<8xf32>
    %239 = vector.multi_reduction <maximumf>, %238, %cst_76 [1] : vector<8x8xf32> to vector<8xf32>
    %240 = vector.shape_cast %239 : vector<8xf32> to vector<8x1xf32>
    %241 = vector.broadcast %240 : vector<8x1xf32> to vector<8x8xf32>
    %242 = arith.subf %238, %241 : vector<8x8xf32>
    %243 = math.exp %242 : vector<8x8xf32>
    %cst_77 = arith.constant dense<0.000000e+00> : vector<8xf32>
    %244 = vector.multi_reduction <add>, %243, %cst_77 [1] : vector<8x8xf32> to vector<8xf32>
    %245 = vector.shape_cast %244 : vector<8xf32> to vector<8x1xf32>
    %cst_78 = arith.constant dense<0.000000e+00> : vector<8x8xf32>
    %246 = tpu.matmul %243, %235, %cst_78 {dimension_numbers = #tpu.dot_dimension_numbers<[1], [0], [0], [1], [0, 0, 1, 1], [], []>} : vector<8x8xf32>, vector<8x8xf32>, vector<8x8xf32> -> vector<8x8xf32>
    %247 = tpu.reciprocal %245 {approx = true} : vector<8x1xf32> -> vector<8x1xf32>
    %248 = vector.broadcast %247 : vector<8x1xf32> to vector<8x8xf32>
    %249 = arith.mulf %246, %248 : vector<8x8xf32>
    %250 = vector.extract_strided_slice %198 {offsets = [0, 24], sizes = [8, 8], strides = [1, 1]} : vector<8x96xf32> to vector<8x8xf32>
    %251 = vector.extract_strided_slice %198 {offsets = [0, 56], sizes = [8, 8], strides = [1, 1]} : vector<8x96xf32> to vector<8x8xf32>
    %252 = vector.extract_strided_slice %198 {offsets = [0, 88], sizes = [8, 8], strides = [1, 1]} : vector<8x96xf32> to vector<8x8xf32>
    %cst_79 = arith.constant dense<0.000000e+00> : vector<8x8xf32>
    %253 = tpu.matmul %250, %251, %cst_79 {dimension_numbers = #tpu.dot_dimension_numbers<[1], [1], [0], [0], [0, 0, 1, 0], [], []>} : vector<8x8xf32>, vector<8x8xf32>, vector<8x8xf32> -> vector<8x8xf32>
    %254 = vector.broadcast %6 : vector<1x8xf32> to vector<8x8xf32>
    %255 = arith.addf %253, %254 : vector<8x8xf32>
    %cst_80 = arith.constant dense<0xFF800000> : vector<8xf32>
    %256 = vector.multi_reduction <maximumf>, %255, %cst_80 [1] : vector<8x8xf32> to vector<8xf32>
    %257 = vector.shape_cast %256 : vector<8xf32> to vector<8x1xf32>
    %258 = vector.broadcast %257 : vector<8x1xf32> to vector<8x8xf32>
    %259 = arith.subf %255, %258 : vector<8x8xf32>
    %260 = math.exp %259 : vector<8x8xf32>
    %cst_81 = arith.constant dense<0.000000e+00> : vector<8xf32>
    %261 = vector.multi_reduction <add>, %260, %cst_81 [1] : vector<8x8xf32> to vector<8xf32>
    %262 = vector.shape_cast %261 : vector<8xf32> to vector<8x1xf32>
    %cst_82 = arith.constant dense<0.000000e+00> : vector<8x8xf32>
    %263 = tpu.matmul %260, %252, %cst_82 {dimension_numbers = #tpu.dot_dimension_numbers<[1], [0], [0], [1], [0, 0, 1, 1], [], []>} : vector<8x8xf32>, vector<8x8xf32>, vector<8x8xf32> -> vector<8x8xf32>
    %264 = tpu.reciprocal %262 {approx = true} : vector<8x1xf32> -> vector<8x1xf32>
    %265 = vector.broadcast %264 : vector<8x1xf32> to vector<8x8xf32>
    %266 = arith.mulf %263, %265 : vector<8x8xf32>
    %267 = tpu.concatenate %215, %232, %249, %266 in 1 : vector<8x8xf32>, vector<8x8xf32>, vector<8x8xf32>, vector<8x8xf32> -> vector<8x32xf32>
    %c344 = arith.constant 344 : index
    %c0_83 = arith.constant 0 : index
    %268 = vector.load %arg4[%c344, %c0_83] : memref<1040x128xf32, #tpu.memory_space<vmem>>, vector<32x32xf32>
    %cst_84 = arith.constant dense<0.000000e+00> : vector<8x32xf32>
    %269 = tpu.matmul %267, %268, %cst_84 {dimension_numbers = #tpu.dot_dimension_numbers<[1], [0], [0], [1], [0, 0, 1, 1], [], []>} : vector<8x32xf32>, vector<32x32xf32>, vector<8x32xf32> -> vector<8x32xf32>
    %270 = arith.addf %169, %269 : vector<8x32xf32>
    %c376 = arith.constant 376 : index
    %c0_85 = arith.constant 0 : index
    %271 = vector.load %arg4[%c376, %c0_85] : memref<1040x128xf32, #tpu.memory_space<vmem>>, vector<1x32xf32>
    %272 = vector.broadcast %271 : vector<1x32xf32> to vector<8x32xf32>
    %273 = arith.addf %270, %272 : vector<8x32xf32>
    %c384 = arith.constant 384 : index
    %c0_86 = arith.constant 0 : index
    %274 = vector.load %arg4[%c384, %c0_86] : memref<1040x128xf32, #tpu.memory_space<vmem>>, vector<1x32xf32>
    %c392 = arith.constant 392 : index
    %c0_87 = arith.constant 0 : index
    %275 = vector.load %arg4[%c392, %c0_87] : memref<1040x128xf32, #tpu.memory_space<vmem>>, vector<1x32xf32>
    %cst_88 = arith.constant dense<0.000000e+00> : vector<8xf32>
    %276 = vector.multi_reduction <add>, %273, %cst_88 [1] : vector<8x32xf32> to vector<8xf32>
    %277 = vector.shape_cast %276 : vector<8xf32> to vector<8x1xf32>
    %cst_89 = arith.constant 3.200000e+01 : f32
    %278 = vector.broadcast %cst_89 : f32 to vector<8x1xf32>
    %279 = arith.divf %277, %278 : vector<8x1xf32>
    %280 = vector.broadcast %279 : vector<8x1xf32> to vector<8x32xf32>
    %281 = arith.subf %273, %280 : vector<8x32xf32>
    %282 = arith.mulf %281, %281 : vector<8x32xf32>
    %cst_90 = arith.constant dense<0.000000e+00> : vector<8xf32>
    %283 = vector.multi_reduction <add>, %282, %cst_90 [1] : vector<8x32xf32> to vector<8xf32>
    %284 = vector.shape_cast %283 : vector<8xf32> to vector<8x1xf32>
    %cst_91 = arith.constant 3.200000e+01 : f32
    %285 = vector.broadcast %cst_91 : f32 to vector<8x1xf32>
    %286 = arith.divf %284, %285 : vector<8x1xf32>
    %287 = vector.broadcast %279 : vector<8x1xf32> to vector<8x32xf32>
    %288 = arith.subf %273, %287 : vector<8x32xf32>
    %cst_92 = arith.constant 9.99999996E-13 : f32
    %289 = vector.broadcast %cst_92 : f32 to vector<8x1xf32>
    %290 = arith.addf %286, %289 : vector<8x1xf32>
    %291 = math.rsqrt %290 : vector<8x1xf32>
    %292 = vector.broadcast %291 : vector<8x1xf32> to vector<8x32xf32>
    %293 = arith.mulf %288, %292 : vector<8x32xf32>
    %294 = vector.broadcast %274 : vector<1x32xf32> to vector<8x32xf32>
    %295 = arith.mulf %293, %294 : vector<8x32xf32>
    %296 = vector.broadcast %275 : vector<1x32xf32> to vector<8x32xf32>
    %297 = arith.addf %295, %296 : vector<8x32xf32>
    %c400 = arith.constant 400 : index
    %c0_93 = arith.constant 0 : index
    %298 = vector.load %arg4[%c400, %c0_93] : memref<1040x128xf32, #tpu.memory_space<vmem>>, vector<32x64xf32>
    %cst_94 = arith.constant dense<0.000000e+00> : vector<8x64xf32>
    %299 = tpu.matmul %297, %298, %cst_94 {dimension_numbers = #tpu.dot_dimension_numbers<[1], [0], [0], [1], [0, 0, 1, 1], [], []>} : vector<8x32xf32>, vector<32x64xf32>, vector<8x64xf32> -> vector<8x64xf32>
    %c432 = arith.constant 432 : index
    %c0_95 = arith.constant 0 : index
    %300 = vector.load %arg4[%c432, %c0_95] : memref<1040x128xf32, #tpu.memory_space<vmem>>, vector<1x64xf32>
    %301 = vector.broadcast %300 : vector<1x64xf32> to vector<8x64xf32>
    %302 = arith.addf %299, %301 : vector<8x64xf32>
    %303 = arith.mulf %302, %302 : vector<8x64xf32>
    %304 = arith.mulf %302, %303 : vector<8x64xf32>
    %cst_96 = arith.constant 4.471500e-02 : f32
    %305 = vector.broadcast %cst_96 : f32 to vector<8x64xf32>
    %306 = arith.mulf %305, %304 : vector<8x64xf32>
    %307 = arith.addf %302, %306 : vector<8x64xf32>
    %cst_97 = arith.constant 0.797884583 : f32
    %308 = vector.broadcast %cst_97 : f32 to vector<8x64xf32>
    %309 = arith.mulf %308, %307 : vector<8x64xf32>
    %310 = math.tanh %309 : vector<8x64xf32>
    %cst_98 = arith.constant 1.000000e+00 : f32
    %311 = vector.broadcast %cst_98 : f32 to vector<8x64xf32>
    %312 = arith.addf %311, %310 : vector<8x64xf32>
    %cst_99 = arith.constant 5.000000e-01 : f32
    %313 = vector.broadcast %cst_99 : f32 to vector<8x64xf32>
    %314 = arith.mulf %313, %312 : vector<8x64xf32>
    %315 = arith.mulf %302, %314 : vector<8x64xf32>
    %c440 = arith.constant 440 : index
    %c0_100 = arith.constant 0 : index
    %316 = vector.load %arg4[%c440, %c0_100] : memref<1040x128xf32, #tpu.memory_space<vmem>>, vector<64x32xf32>
    %cst_101 = arith.constant dense<0.000000e+00> : vector<8x32xf32>
    %317 = tpu.matmul %315, %316, %cst_101 {dimension_numbers = #tpu.dot_dimension_numbers<[1], [0], [0], [1], [0, 0, 1, 1], [], []>} : vector<8x64xf32>, vector<64x32xf32>, vector<8x32xf32> -> vector<8x32xf32>
    %318 = arith.addf %273, %317 : vector<8x32xf32>
    %c504 = arith.constant 504 : index
    %c0_102 = arith.constant 0 : index
    %319 = vector.load %arg4[%c504, %c0_102] : memref<1040x128xf32, #tpu.memory_space<vmem>>, vector<1x32xf32>
    %320 = vector.broadcast %319 : vector<1x32xf32> to vector<8x32xf32>
    %321 = arith.addf %318, %320 : vector<8x32xf32>
    %c512 = arith.constant 512 : index
    %c0_103 = arith.constant 0 : index
    %322 = vector.load %arg4[%c512, %c0_103] : memref<1040x128xf32, #tpu.memory_space<vmem>>, vector<1x32xf32>
    %c520 = arith.constant 520 : index
    %c0_104 = arith.constant 0 : index
    %323 = vector.load %arg4[%c520, %c0_104] : memref<1040x128xf32, #tpu.memory_space<vmem>>, vector<1x32xf32>
    %cst_105 = arith.constant dense<0.000000e+00> : vector<8xf32>
    %324 = vector.multi_reduction <add>, %321, %cst_105 [1] : vector<8x32xf32> to vector<8xf32>
    %325 = vector.shape_cast %324 : vector<8xf32> to vector<8x1xf32>
    %cst_106 = arith.constant 3.200000e+01 : f32
    %326 = vector.broadcast %cst_106 : f32 to vector<8x1xf32>
    %327 = arith.divf %325, %326 : vector<8x1xf32>
    %328 = vector.broadcast %327 : vector<8x1xf32> to vector<8x32xf32>
    %329 = arith.subf %321, %328 : vector<8x32xf32>
    %330 = arith.mulf %329, %329 : vector<8x32xf32>
    %cst_107 = arith.constant dense<0.000000e+00> : vector<8xf32>
    %331 = vector.multi_reduction <add>, %330, %cst_107 [1] : vector<8x32xf32> to vector<8xf32>
    %332 = vector.shape_cast %331 : vector<8xf32> to vector<8x1xf32>
    %cst_108 = arith.constant 3.200000e+01 : f32
    %333 = vector.broadcast %cst_108 : f32 to vector<8x1xf32>
    %334 = arith.divf %332, %333 : vector<8x1xf32>
    %335 = vector.broadcast %327 : vector<8x1xf32> to vector<8x32xf32>
    %336 = arith.subf %321, %335 : vector<8x32xf32>
    %cst_109 = arith.constant 9.99999996E-13 : f32
    %337 = vector.broadcast %cst_109 : f32 to vector<8x1xf32>
    %338 = arith.addf %334, %337 : vector<8x1xf32>
    %339 = math.rsqrt %338 : vector<8x1xf32>
    %340 = vector.broadcast %339 : vector<8x1xf32> to vector<8x32xf32>
    %341 = arith.mulf %336, %340 : vector<8x32xf32>
    %342 = vector.broadcast %322 : vector<1x32xf32> to vector<8x32xf32>
    %343 = arith.mulf %341, %342 : vector<8x32xf32>
    %344 = vector.broadcast %323 : vector<1x32xf32> to vector<8x32xf32>
    %345 = arith.addf %343, %344 : vector<8x32xf32>
    %346 = vector.extract_strided_slice %345 {offsets = [0, 0], sizes = [1, 32], strides = [1, 1]} : vector<8x32xf32> to vector<1x32xf32>
    %347 = vector.extract_strided_slice %345 {offsets = [1, 0], sizes = [1, 32], strides = [1, 1]} : vector<8x32xf32> to vector<1x32xf32>
    %348 = vector.extract_strided_slice %345 {offsets = [2, 0], sizes = [1, 32], strides = [1, 1]} : vector<8x32xf32> to vector<1x32xf32>
    %349 = vector.extract_strided_slice %345 {offsets = [3, 0], sizes = [1, 32], strides = [1, 1]} : vector<8x32xf32> to vector<1x32xf32>
    %350 = vector.extract_strided_slice %345 {offsets = [4, 0], sizes = [1, 32], strides = [1, 1]} : vector<8x32xf32> to vector<1x32xf32>
    %351 = vector.extract_strided_slice %345 {offsets = [5, 0], sizes = [1, 32], strides = [1, 1]} : vector<8x32xf32> to vector<1x32xf32>
    %352 = vector.extract_strided_slice %345 {offsets = [6, 0], sizes = [1, 32], strides = [1, 1]} : vector<8x32xf32> to vector<1x32xf32>
    %353 = vector.extract_strided_slice %345 {offsets = [7, 0], sizes = [1, 32], strides = [1, 1]} : vector<8x32xf32> to vector<1x32xf32>
    %354 = tpu.concatenate %346, %347, %348, %349, %350, %351, %352, %353 in 1 : vector<1x32xf32>, vector<1x32xf32>, vector<1x32xf32>, vector<1x32xf32>, vector<1x32xf32>, vector<1x32xf32>, vector<1x32xf32>, vector<1x32xf32> -> vector<1x256xf32>
    %355 = vector.shape_cast %354 : vector<1x256xf32> to vector<1x1x256xf32>
    %c0_110 = arith.constant 0 : index
    %c0_111 = arith.constant 0 : index
    %c0_112 = arith.constant 0 : index
    %356 = vector.load %arg5[%c0_110, %c0_111, %c0_112] : memref<1x1x256xf32, #tpu.memory_space<vmem>>, vector<1x1x256xf32>
    tpu.vector_store %arg5[%c0_110, %c0_111, %c0_112], %355 {strides = array<i32>} : memref<1x1x256xf32, #tpu.memory_space<vmem>>, vector<1x1x256xf32>,
    %c528 = arith.constant 528 : index
    %c0_113 = arith.constant 0 : index
    %357 = vector.load %arg4[%c528, %c0_113] : memref<1040x128xf32, #tpu.memory_space<vmem>>, vector<4x32xf32>
    %c536 = arith.constant 536 : index
    %c0_114 = arith.constant 0 : index
    %358 = vector.load %arg4[%c536, %c0_114] : memref<1040x128xf32, #tpu.memory_space<vmem>>, vector<1x32xf32>
    %c544 = arith.constant 544 : index
    %c0_115 = arith.constant 0 : index
    %359 = vector.load %arg4[%c544, %c0_115] : memref<1040x128xf32, #tpu.memory_space<vmem>>, vector<1x32xf32>
    %cst_116 = arith.constant dense<0.000000e+00> : vector<8xf32>
    %360 = vector.multi_reduction <add>, %345, %cst_116 [1] : vector<8x32xf32> to vector<8xf32>
    %361 = vector.shape_cast %360 : vector<8xf32> to vector<8x1xf32>
    %cst_117 = arith.constant 3.200000e+01 : f32
    %362 = vector.broadcast %cst_117 : f32 to vector<8x1xf32>
    %363 = arith.divf %361, %362 : vector<8x1xf32>
    %364 = vector.broadcast %363 : vector<8x1xf32> to vector<8x32xf32>
    %365 = arith.subf %345, %364 : vector<8x32xf32>
    %366 = arith.mulf %365, %365 : vector<8x32xf32>
    %cst_118 = arith.constant dense<0.000000e+00> : vector<8xf32>
    %367 = vector.multi_reduction <add>, %366, %cst_118 [1] : vector<8x32xf32> to vector<8xf32>
    %368 = vector.shape_cast %367 : vector<8xf32> to vector<8x1xf32>
    %cst_119 = arith.constant 3.200000e+01 : f32
    %369 = vector.broadcast %cst_119 : f32 to vector<8x1xf32>
    %370 = arith.divf %368, %369 : vector<8x1xf32>
    %371 = vector.broadcast %363 : vector<8x1xf32> to vector<8x32xf32>
    %372 = arith.subf %345, %371 : vector<8x32xf32>
    %cst_120 = arith.constant 9.99999974E-6 : f32
    %373 = vector.broadcast %cst_120 : f32 to vector<8x1xf32>
    %374 = arith.addf %370, %373 : vector<8x1xf32>
    %375 = math.rsqrt %374 : vector<8x1xf32>
    %376 = vector.broadcast %375 : vector<8x1xf32> to vector<8x32xf32>
    %377 = arith.mulf %372, %376 : vector<8x32xf32>
    %378 = vector.broadcast %358 : vector<1x32xf32> to vector<8x32xf32>
    %379 = arith.mulf %377, %378 : vector<8x32xf32>
    %380 = vector.broadcast %359 : vector<1x32xf32> to vector<8x32xf32>
    %381 = arith.addf %379, %380 : vector<8x32xf32>
    %c552 = arith.constant 552 : index
    %c0_121 = arith.constant 0 : index
    %382 = vector.load %arg4[%c552, %c0_121] : memref<1040x128xf32, #tpu.memory_space<vmem>>, vector<1x32xf32>
    %c560 = arith.constant 560 : index
    %c0_122 = arith.constant 0 : index
    %383 = vector.load %arg4[%c560, %c0_122] : memref<1040x128xf32, #tpu.memory_space<vmem>>, vector<1x32xf32>
    %cst_123 = arith.constant dense<0.000000e+00> : vector<4xf32>
    %384 = vector.multi_reduction <add>, %357, %cst_123 [1] : vector<4x32xf32> to vector<4xf32>
    %385 = vector.shape_cast %384 : vector<4xf32> to vector<4x1xf32>
    %cst_124 = arith.constant 3.200000e+01 : f32
    %386 = vector.broadcast %cst_124 : f32 to vector<4x1xf32>
    %387 = arith.divf %385, %386 : vector<4x1xf32>
    %388 = vector.broadcast %387 : vector<4x1xf32> to vector<4x32xf32>
    %389 = arith.subf %357, %388 : vector<4x32xf32>
    %390 = arith.mulf %389, %389 : vector<4x32xf32>
    %cst_125 = arith.constant dense<0.000000e+00> : vector<4xf32>
    %391 = vector.multi_reduction <add>, %390, %cst_125 [1] : vector<4x32xf32> to vector<4xf32>
    %392 = vector.shape_cast %391 : vector<4xf32> to vector<4x1xf32>
    %cst_126 = arith.constant 3.200000e+01 : f32
    %393 = vector.broadcast %cst_126 : f32 to vector<4x1xf32>
    %394 = arith.divf %392, %393 : vector<4x1xf32>
    %395 = vector.broadcast %387 : vector<4x1xf32> to vector<4x32xf32>
    %396 = arith.subf %357, %395 : vector<4x32xf32>
    %cst_127 = arith.constant 9.99999974E-6 : f32
    %397 = vector.broadcast %cst_127 : f32 to vector<4x1xf32>
    %398 = arith.addf %394, %397 : vector<4x1xf32>
    %399 = math.rsqrt %398 : vector<4x1xf32>
    %400 = vector.broadcast %399 : vector<4x1xf32> to vector<4x32xf32>
    %401 = arith.mulf %396, %400 : vector<4x32xf32>
    %402 = vector.broadcast %382 : vector<1x32xf32> to vector<4x32xf32>
    %403 = arith.mulf %401, %402 : vector<4x32xf32>
    %404 = vector.broadcast %383 : vector<1x32xf32> to vector<4x32xf32>
    %405 = arith.addf %403, %404 : vector<4x32xf32>
    %c568 = arith.constant 568 : index
    %c0_128 = arith.constant 0 : index
    %406 = vector.load %arg4[%c568, %c0_128] : memref<1040x128xf32, #tpu.memory_space<vmem>>, vector<32x96xf32>
    %cst_129 = arith.constant dense<0.000000e+00> : vector<4x96xf32>
    %407 = tpu.matmul %405, %406, %cst_129 {dimension_numbers = #tpu.dot_dimension_numbers<[1], [0], [0], [1], [0, 0, 1, 1], [], []>} : vector<4x32xf32>, vector<32x96xf32>, vector<4x96xf32> -> vector<4x96xf32>
    %408 = vector.extract_strided_slice %406 {offsets = [0, 32], sizes = [32, 64], strides = [1, 1]} : vector<32x96xf32> to vector<32x64xf32>
    %cst_130 = arith.constant dense<0.000000e+00> : vector<8x64xf32>
    %409 = tpu.matmul %381, %408, %cst_130 {dimension_numbers = #tpu.dot_dimension_numbers<[1], [0], [0], [1], [0, 0, 1, 1], [], []>} : vector<8x32xf32>, vector<32x64xf32>, vector<8x64xf32> -> vector<8x64xf32>
    %410 = vector.extract_strided_slice %407 {offsets = [0, 0], sizes = [4, 8], strides = [1, 1]} : vector<4x96xf32> to vector<4x8xf32>
    %411 = vector.extract_strided_slice %407 {offsets = [0, 32], sizes = [4, 8], strides = [1, 1]} : vector<4x96xf32> to vector<4x8xf32>
    %412 = vector.extract_strided_slice %407 {offsets = [0, 64], sizes = [4, 8], strides = [1, 1]} : vector<4x96xf32> to vector<4x8xf32>
    %413 = vector.extract_strided_slice %409 {offsets = [0, 0], sizes = [8, 8], strides = [1, 1]} : vector<8x64xf32> to vector<8x8xf32>
    %414 = vector.extract_strided_slice %409 {offsets = [0, 32], sizes = [8, 8], strides = [1, 1]} : vector<8x64xf32> to vector<8x8xf32>
    %cst_131 = arith.constant dense<0.000000e+00> : vector<4x8xf32>
    %415 = tpu.matmul %410, %413, %cst_131 {dimension_numbers = #tpu.dot_dimension_numbers<[1], [1], [0], [0], [0, 0, 1, 0], [], []>} : vector<4x8xf32>, vector<8x8xf32>, vector<4x8xf32> -> vector<4x8xf32>
    %416 = vector.broadcast %6 : vector<1x8xf32> to vector<4x8xf32>
    %417 = arith.addf %415, %416 : vector<4x8xf32>
    %cst_132 = arith.constant dense<0.000000e+00> : vector<4x4xf32>
    %418 = tpu.matmul %410, %411, %cst_132 {dimension_numbers = #tpu.dot_dimension_numbers<[1], [1], [0], [0], [0, 0, 1, 0], [], []>} : vector<4x8xf32>, vector<4x8xf32>, vector<4x4xf32> -> vector<4x4xf32>
    %cst_133 = arith.constant dense<0xFF800000> : vector<4xf32>
    %419 = vector.multi_reduction <maximumf>, %417, %cst_133 [1] : vector<4x8xf32> to vector<4xf32>
    %420 = vector.shape_cast %419 : vector<4xf32> to vector<4x1xf32>
    %cst_134 = arith.constant dense<0xFF800000> : vector<4xf32>
    %421 = vector.multi_reduction <maximumf>, %418, %cst_134 [1] : vector<4x4xf32> to vector<4xf32>
    %422 = vector.shape_cast %421 : vector<4xf32> to vector<4x1xf32>
    %423 = arith.maximumf %420, %422 : vector<4x1xf32>
    %424 = vector.broadcast %423 : vector<4x1xf32> to vector<4x8xf32>
    %425 = arith.subf %417, %424 : vector<4x8xf32>
    %426 = math.exp %425 : vector<4x8xf32>
    %427 = vector.broadcast %423 : vector<4x1xf32> to vector<4x4xf32>
    %428 = arith.subf %418, %427 : vector<4x4xf32>
    %429 = math.exp %428 : vector<4x4xf32>
    %cst_135 = arith.constant dense<0.000000e+00> : vector<4xf32>
    %430 = vector.multi_reduction <add>, %426, %cst_135 [1] : vector<4x8xf32> to vector<4xf32>
    %431 = vector.shape_cast %430 : vector<4xf32> to vector<4x1xf32>
    %cst_136 = arith.constant dense<0.000000e+00> : vector<4xf32>
    %432 = vector.multi_reduction <add>, %429, %cst_136 [1] : vector<4x4xf32> to vector<4xf32>
    %433 = vector.shape_cast %432 : vector<4xf32> to vector<4x1xf32>
    %434 = arith.addf %431, %433 : vector<4x1xf32>
    %cst_137 = arith.constant dense<0.000000e+00> : vector<4x8xf32>
    %435 = tpu.matmul %426, %414, %cst_137 {dimension_numbers = #tpu.dot_dimension_numbers<[1], [0], [0], [1], [0, 0, 1, 1], [], []>} : vector<4x8xf32>, vector<8x8xf32>, vector<4x8xf32> -> vector<4x8xf32>
    %cst_138 = arith.constant dense<0.000000e+00> : vector<4x8xf32>
    %436 = tpu.matmul %429, %412, %cst_138 {dimension_numbers = #tpu.dot_dimension_numbers<[1], [0], [0], [1], [0, 0, 1, 1], [], []>} : vector<4x4xf32>, vector<4x8xf32>, vector<4x8xf32> -> vector<4x8xf32>
    %437 = arith.addf %435, %436 : vector<4x8xf32>
    %438 = tpu.reciprocal %434 {approx = true} : vector<4x1xf32> -> vector<4x1xf32>
    %439 = vector.broadcast %438 : vector<4x1xf32> to vector<4x8xf32>
    %440 = arith.mulf %437, %439 : vector<4x8xf32>
    %441 = vector.extract_strided_slice %407 {offsets = [0, 8], sizes = [4, 8], strides = [1, 1]} : vector<4x96xf32> to vector<4x8xf32>
    %442 = vector.extract_strided_slice %407 {offsets = [0, 40], sizes = [4, 8], strides = [1, 1]} : vector<4x96xf32> to vector<4x8xf32>
    %443 = vector.extract_strided_slice %407 {offsets = [0, 72], sizes = [4, 8], strides = [1, 1]} : vector<4x96xf32> to vector<4x8xf32>
    %444 = vector.extract_strided_slice %409 {offsets = [0, 8], sizes = [8, 8], strides = [1, 1]} : vector<8x64xf32> to vector<8x8xf32>
    %445 = vector.extract_strided_slice %409 {offsets = [0, 40], sizes = [8, 8], strides = [1, 1]} : vector<8x64xf32> to vector<8x8xf32>
    %cst_139 = arith.constant dense<0.000000e+00> : vector<4x8xf32>
    %446 = tpu.matmul %441, %444, %cst_139 {dimension_numbers = #tpu.dot_dimension_numbers<[1], [1], [0], [0], [0, 0, 1, 0], [], []>} : vector<4x8xf32>, vector<8x8xf32>, vector<4x8xf32> -> vector<4x8xf32>
    %447 = vector.broadcast %6 : vector<1x8xf32> to vector<4x8xf32>
    %448 = arith.addf %446, %447 : vector<4x8xf32>
    %cst_140 = arith.constant dense<0.000000e+00> : vector<4x4xf32>
    %449 = tpu.matmul %441, %442, %cst_140 {dimension_numbers = #tpu.dot_dimension_numbers<[1], [1], [0], [0], [0, 0, 1, 0], [], []>} : vector<4x8xf32>, vector<4x8xf32>, vector<4x4xf32> -> vector<4x4xf32>
    %cst_141 = arith.constant dense<0xFF800000> : vector<4xf32>
    %450 = vector.multi_reduction <maximumf>, %448, %cst_141 [1] : vector<4x8xf32> to vector<4xf32>
    %451 = vector.shape_cast %450 : vector<4xf32> to vector<4x1xf32>
    %cst_142 = arith.constant dense<0xFF800000> : vector<4xf32>
    %452 = vector.multi_reduction <maximumf>, %449, %cst_142 [1] : vector<4x4xf32> to vector<4xf32>
    %453 = vector.shape_cast %452 : vector<4xf32> to vector<4x1xf32>
    %454 = arith.maximumf %451, %453 : vector<4x1xf32>
    %455 = vector.broadcast %454 : vector<4x1xf32> to vector<4x8xf32>
    %456 = arith.subf %448, %455 : vector<4x8xf32>
    %457 = math.exp %456 : vector<4x8xf32>
    %458 = vector.broadcast %454 : vector<4x1xf32> to vector<4x4xf32>
    %459 = arith.subf %449, %458 : vector<4x4xf32>
    %460 = math.exp %459 : vector<4x4xf32>
    %cst_143 = arith.constant dense<0.000000e+00> : vector<4xf32>
    %461 = vector.multi_reduction <add>, %457, %cst_143 [1] : vector<4x8xf32> to vector<4xf32>
    %462 = vector.shape_cast %461 : vector<4xf32> to vector<4x1xf32>
    %cst_144 = arith.constant dense<0.000000e+00> : vector<4xf32>
    %463 = vector.multi_reduction <add>, %460, %cst_144 [1] : vector<4x4xf32> to vector<4xf32>
    %464 = vector.shape_cast %463 : vector<4xf32> to vector<4x1xf32>
    %465 = arith.addf %462, %464 : vector<4x1xf32>
    %cst_145 = arith.constant dense<0.000000e+00> : vector<4x8xf32>
    %466 = tpu.matmul %457, %445, %cst_145 {dimension_numbers = #tpu.dot_dimension_numbers<[1], [0], [0], [1], [0, 0, 1, 1], [], []>} : vector<4x8xf32>, vector<8x8xf32>, vector<4x8xf32> -> vector<4x8xf32>
    %cst_146 = arith.constant dense<0.000000e+00> : vector<4x8xf32>
    %467 = tpu.matmul %460, %443, %cst_146 {dimension_numbers = #tpu.dot_dimension_numbers<[1], [0], [0], [1], [0, 0, 1, 1], [], []>} : vector<4x4xf32>, vector<4x8xf32>, vector<4x8xf32> -> vector<4x8xf32>
    %468 = arith.addf %466, %467 : vector<4x8xf32>
    %469 = tpu.reciprocal %465 {approx = true} : vector<4x1xf32> -> vector<4x1xf32>
    %470 = vector.broadcast %469 : vector<4x1xf32> to vector<4x8xf32>
    %471 = arith.mulf %468, %470 : vector<4x8xf32>
    %472 = vector.extract_strided_slice %407 {offsets = [0, 16], sizes = [4, 8], strides = [1, 1]} : vector<4x96xf32> to vector<4x8xf32>
    %473 = vector.extract_strided_slice %407 {offsets = [0, 48], sizes = [4, 8], strides = [1, 1]} : vector<4x96xf32> to vector<4x8xf32>
    %474 = vector.extract_strided_slice %407 {offsets = [0, 80], sizes = [4, 8], strides = [1, 1]} : vector<4x96xf32> to vector<4x8xf32>
    %475 = vector.extract_strided_slice %409 {offsets = [0, 16], sizes = [8, 8], strides = [1, 1]} : vector<8x64xf32> to vector<8x8xf32>
    %476 = vector.extract_strided_slice %409 {offsets = [0, 48], sizes = [8, 8], strides = [1, 1]} : vector<8x64xf32> to vector<8x8xf32>
    %cst_147 = arith.constant dense<0.000000e+00> : vector<4x8xf32>
    %477 = tpu.matmul %472, %475, %cst_147 {dimension_numbers = #tpu.dot_dimension_numbers<[1], [1], [0], [0], [0, 0, 1, 0], [], []>} : vector<4x8xf32>, vector<8x8xf32>, vector<4x8xf32> -> vector<4x8xf32>
    %478 = vector.broadcast %6 : vector<1x8xf32> to vector<4x8xf32>
    %479 = arith.addf %477, %478 : vector<4x8xf32>
    %cst_148 = arith.constant dense<0.000000e+00> : vector<4x4xf32>
    %480 = tpu.matmul %472, %473, %cst_148 {dimension_numbers = #tpu.dot_dimension_numbers<[1], [1], [0], [0], [0, 0, 1, 0], [], []>} : vector<4x8xf32>, vector<4x8xf32>, vector<4x4xf32> -> vector<4x4xf32>
    %cst_149 = arith.constant dense<0xFF800000> : vector<4xf32>
    %481 = vector.multi_reduction <maximumf>, %479, %cst_149 [1] : vector<4x8xf32> to vector<4xf32>
    %482 = vector.shape_cast %481 : vector<4xf32> to vector<4x1xf32>
    %cst_150 = arith.constant dense<0xFF800000> : vector<4xf32>
    %483 = vector.multi_reduction <maximumf>, %480, %cst_150 [1] : vector<4x4xf32> to vector<4xf32>
    %484 = vector.shape_cast %483 : vector<4xf32> to vector<4x1xf32>
    %485 = arith.maximumf %482, %484 : vector<4x1xf32>
    %486 = vector.broadcast %485 : vector<4x1xf32> to vector<4x8xf32>
    %487 = arith.subf %479, %486 : vector<4x8xf32>
    %488 = math.exp %487 : vector<4x8xf32>
    %489 = vector.broadcast %485 : vector<4x1xf32> to vector<4x4xf32>
    %490 = arith.subf %480, %489 : vector<4x4xf32>
    %491 = math.exp %490 : vector<4x4xf32>
    %cst_151 = arith.constant dense<0.000000e+00> : vector<4xf32>
    %492 = vector.multi_reduction <add>, %488, %cst_151 [1] : vector<4x8xf32> to vector<4xf32>
    %493 = vector.shape_cast %492 : vector<4xf32> to vector<4x1xf32>
    %cst_152 = arith.constant dense<0.000000e+00> : vector<4xf32>
    %494 = vector.multi_reduction <add>, %491, %cst_152 [1] : vector<4x4xf32> to vector<4xf32>
    %495 = vector.shape_cast %494 : vector<4xf32> to vector<4x1xf32>
    %496 = arith.addf %493, %495 : vector<4x1xf32>
    %cst_153 = arith.constant dense<0.000000e+00> : vector<4x8xf32>
    %497 = tpu.matmul %488, %476, %cst_153 {dimension_numbers = #tpu.dot_dimension_numbers<[1], [0], [0], [1], [0, 0, 1, 1], [], []>} : vector<4x8xf32>, vector<8x8xf32>, vector<4x8xf32> -> vector<4x8xf32>
    %cst_154 = arith.constant dense<0.000000e+00> : vector<4x8xf32>
    %498 = tpu.matmul %491, %474, %cst_154 {dimension_numbers = #tpu.dot_dimension_numbers<[1], [0], [0], [1], [0, 0, 1, 1], [], []>} : vector<4x4xf32>, vector<4x8xf32>, vector<4x8xf32> -> vector<4x8xf32>
    %499 = arith.addf %497, %498 : vector<4x8xf32>
    %500 = tpu.reciprocal %496 {approx = true} : vector<4x1xf32> -> vector<4x1xf32>
    %501 = vector.broadcast %500 : vector<4x1xf32> to vector<4x8xf32>
    %502 = arith.mulf %499, %501 : vector<4x8xf32>
    %503 = vector.extract_strided_slice %407 {offsets = [0, 24], sizes = [4, 8], strides = [1, 1]} : vector<4x96xf32> to vector<4x8xf32>
    %504 = vector.extract_strided_slice %407 {offsets = [0, 56], sizes = [4, 8], strides = [1, 1]} : vector<4x96xf32> to vector<4x8xf32>
    %505 = vector.extract_strided_slice %407 {offsets = [0, 88], sizes = [4, 8], strides = [1, 1]} : vector<4x96xf32> to vector<4x8xf32>
    %506 = vector.extract_strided_slice %409 {offsets = [0, 24], sizes = [8, 8], strides = [1, 1]} : vector<8x64xf32> to vector<8x8xf32>
    %507 = vector.extract_strided_slice %409 {offsets = [0, 56], sizes = [8, 8], strides = [1, 1]} : vector<8x64xf32> to vector<8x8xf32>
    %cst_155 = arith.constant dense<0.000000e+00> : vector<4x8xf32>
    %508 = tpu.matmul %503, %506, %cst_155 {dimension_numbers = #tpu.dot_dimension_numbers<[1], [1], [0], [0], [0, 0, 1, 0], [], []>} : vector<4x8xf32>, vector<8x8xf32>, vector<4x8xf32> -> vector<4x8xf32>
    %509 = vector.broadcast %6 : vector<1x8xf32> to vector<4x8xf32>
    %510 = arith.addf %508, %509 : vector<4x8xf32>
    %cst_156 = arith.constant dense<0.000000e+00> : vector<4x4xf32>
    %511 = tpu.matmul %503, %504, %cst_156 {dimension_numbers = #tpu.dot_dimension_numbers<[1], [1], [0], [0], [0, 0, 1, 0], [], []>} : vector<4x8xf32>, vector<4x8xf32>, vector<4x4xf32> -> vector<4x4xf32>
    %cst_157 = arith.constant dense<0xFF800000> : vector<4xf32>
    %512 = vector.multi_reduction <maximumf>, %510, %cst_157 [1] : vector<4x8xf32> to vector<4xf32>
    %513 = vector.shape_cast %512 : vector<4xf32> to vector<4x1xf32>
    %cst_158 = arith.constant dense<0xFF800000> : vector<4xf32>
    %514 = vector.multi_reduction <maximumf>, %511, %cst_158 [1] : vector<4x4xf32> to vector<4xf32>
    %515 = vector.shape_cast %514 : vector<4xf32> to vector<4x1xf32>
    %516 = arith.maximumf %513, %515 : vector<4x1xf32>
    %517 = vector.broadcast %516 : vector<4x1xf32> to vector<4x8xf32>
    %518 = arith.subf %510, %517 : vector<4x8xf32>
    %519 = math.exp %518 : vector<4x8xf32>
    %520 = vector.broadcast %516 : vector<4x1xf32> to vector<4x4xf32>
    %521 = arith.subf %511, %520 : vector<4x4xf32>
    %522 = math.exp %521 : vector<4x4xf32>
    %cst_159 = arith.constant dense<0.000000e+00> : vector<4xf32>
    %523 = vector.multi_reduction <add>, %519, %cst_159 [1] : vector<4x8xf32> to vector<4xf32>
    %524 = vector.shape_cast %523 : vector<4xf32> to vector<4x1xf32>
    %cst_160 = arith.constant dense<0.000000e+00> : vector<4xf32>
    %525 = vector.multi_reduction <add>, %522, %cst_160 [1] : vector<4x4xf32> to vector<4xf32>
    %526 = vector.shape_cast %525 : vector<4xf32> to vector<4x1xf32>
    %527 = arith.addf %524, %526 : vector<4x1xf32>
    %cst_161 = arith.constant dense<0.000000e+00> : vector<4x8xf32>
    %528 = tpu.matmul %519, %507, %cst_161 {dimension_numbers = #tpu.dot_dimension_numbers<[1], [0], [0], [1], [0, 0, 1, 1], [], []>} : vector<4x8xf32>, vector<8x8xf32>, vector<4x8xf32> -> vector<4x8xf32>
    %cst_162 = arith.constant dense<0.000000e+00> : vector<4x8xf32>
    %529 = tpu.matmul %522, %505, %cst_162 {dimension_numbers = #tpu.dot_dimension_numbers<[1], [0], [0], [1], [0, 0, 1, 1], [], []>} : vector<4x4xf32>, vector<4x8xf32>, vector<4x8xf32> -> vector<4x8xf32>
    %530 = arith.addf %528, %529 : vector<4x8xf32>
    %531 = tpu.reciprocal %527 {approx = true} : vector<4x1xf32> -> vector<4x1xf32>
    %532 = vector.broadcast %531 : vector<4x1xf32> to vector<4x8xf32>
    %533 = arith.mulf %530, %532 : vector<4x8xf32>
    %534 = tpu.concatenate %440, %471, %502, %533 in 1 : vector<4x8xf32>, vector<4x8xf32>, vector<4x8xf32>, vector<4x8xf32> -> vector<4x32xf32>
    %c600 = arith.constant 600 : index
    %c0_163 = arith.constant 0 : index
    %535 = vector.load %arg4[%c600, %c0_163] : memref<1040x128xf32, #tpu.memory_space<vmem>>, vector<32x32xf32>
    %cst_164 = arith.constant dense<0.000000e+00> : vector<4x32xf32>
    %536 = tpu.matmul %534, %535, %cst_164 {dimension_numbers = #tpu.dot_dimension_numbers<[1], [0], [0], [1], [0, 0, 1, 1], [], []>} : vector<4x32xf32>, vector<32x32xf32>, vector<4x32xf32> -> vector<4x32xf32>
    %537 = arith.addf %357, %536 : vector<4x32xf32>
    %c632 = arith.constant 632 : index
    %c0_165 = arith.constant 0 : index
    %538 = vector.load %arg4[%c632, %c0_165] : memref<1040x128xf32, #tpu.memory_space<vmem>>, vector<1x32xf32>
    %c640 = arith.constant 640 : index
    %c0_166 = arith.constant 0 : index
    %539 = vector.load %arg4[%c640, %c0_166] : memref<1040x128xf32, #tpu.memory_space<vmem>>, vector<1x32xf32>
    %cst_167 = arith.constant dense<0.000000e+00> : vector<4xf32>
    %540 = vector.multi_reduction <add>, %537, %cst_167 [1] : vector<4x32xf32> to vector<4xf32>
    %541 = vector.shape_cast %540 : vector<4xf32> to vector<4x1xf32>
    %cst_168 = arith.constant 3.200000e+01 : f32
    %542 = vector.broadcast %cst_168 : f32 to vector<4x1xf32>
    %543 = arith.divf %541, %542 : vector<4x1xf32>
    %544 = vector.broadcast %543 : vector<4x1xf32> to vector<4x32xf32>
    %545 = arith.subf %537, %544 : vector<4x32xf32>
    %546 = arith.mulf %545, %545 : vector<4x32xf32>
    %cst_169 = arith.constant dense<0.000000e+00> : vector<4xf32>
    %547 = vector.multi_reduction <add>, %546, %cst_169 [1] : vector<4x32xf32> to vector<4xf32>
    %548 = vector.shape_cast %547 : vector<4xf32> to vector<4x1xf32>
    %cst_170 = arith.constant 3.200000e+01 : f32
    %549 = vector.broadcast %cst_170 : f32 to vector<4x1xf32>
    %550 = arith.divf %548, %549 : vector<4x1xf32>
    %551 = vector.broadcast %543 : vector<4x1xf32> to vector<4x32xf32>
    %552 = arith.subf %537, %551 : vector<4x32xf32>
    %cst_171 = arith.constant 9.99999974E-6 : f32
    %553 = vector.broadcast %cst_171 : f32 to vector<4x1xf32>
    %554 = arith.addf %550, %553 : vector<4x1xf32>
    %555 = math.rsqrt %554 : vector<4x1xf32>
    %556 = vector.broadcast %555 : vector<4x1xf32> to vector<4x32xf32>
    %557 = arith.mulf %552, %556 : vector<4x32xf32>
    %558 = vector.broadcast %538 : vector<1x32xf32> to vector<4x32xf32>
    %559 = arith.mulf %557, %558 : vector<4x32xf32>
    %560 = vector.broadcast %539 : vector<1x32xf32> to vector<4x32xf32>
    %561 = arith.addf %559, %560 : vector<4x32xf32>
    %c648 = arith.constant 648 : index
    %c0_172 = arith.constant 0 : index
    %562 = vector.load %arg4[%c648, %c0_172] : memref<1040x128xf32, #tpu.memory_space<vmem>>, vector<32x64xf32>
    %cst_173 = arith.constant dense<0.000000e+00> : vector<4x64xf32>
    %563 = tpu.matmul %561, %562, %cst_173 {dimension_numbers = #tpu.dot_dimension_numbers<[1], [0], [0], [1], [0, 0, 1, 1], [], []>} : vector<4x32xf32>, vector<32x64xf32>, vector<4x64xf32> -> vector<4x64xf32>
    %c680 = arith.constant 680 : index
    %c0_174 = arith.constant 0 : index
    %564 = vector.load %arg4[%c680, %c0_174] : memref<1040x128xf32, #tpu.memory_space<vmem>>, vector<1x64xf32>
    %565 = vector.broadcast %564 : vector<1x64xf32> to vector<4x64xf32>
    %566 = arith.addf %563, %565 : vector<4x64xf32>
    %567 = arith.mulf %566, %566 : vector<4x64xf32>
    %568 = arith.mulf %566, %567 : vector<4x64xf32>
    %cst_175 = arith.constant 4.471500e-02 : f32
    %569 = vector.broadcast %cst_175 : f32 to vector<4x64xf32>
    %570 = arith.mulf %569, %568 : vector<4x64xf32>
    %571 = arith.addf %566, %570 : vector<4x64xf32>
    %cst_176 = arith.constant 0.797884583 : f32
    %572 = vector.broadcast %cst_176 : f32 to vector<4x64xf32>
    %573 = arith.mulf %572, %571 : vector<4x64xf32>
    %574 = math.tanh %573 : vector<4x64xf32>
    %cst_177 = arith.constant 1.000000e+00 : f32
    %575 = vector.broadcast %cst_177 : f32 to vector<4x64xf32>
    %576 = arith.addf %575, %574 : vector<4x64xf32>
    %cst_178 = arith.constant 5.000000e-01 : f32
    %577 = vector.broadcast %cst_178 : f32 to vector<4x64xf32>
    %578 = arith.mulf %577, %576 : vector<4x64xf32>
    %579 = arith.mulf %566, %578 : vector<4x64xf32>
    %c688 = arith.constant 688 : index
    %c0_179 = arith.constant 0 : index
    %580 = vector.load %arg4[%c688, %c0_179] : memref<1040x128xf32, #tpu.memory_space<vmem>>, vector<64x32xf32>
    %cst_180 = arith.constant dense<0.000000e+00> : vector<4x32xf32>
    %581 = tpu.matmul %579, %580, %cst_180 {dimension_numbers = #tpu.dot_dimension_numbers<[1], [0], [0], [1], [0, 0, 1, 1], [], []>} : vector<4x64xf32>, vector<64x32xf32>, vector<4x32xf32> -> vector<4x32xf32>
    %582 = arith.addf %537, %581 : vector<4x32xf32>
    %c752 = arith.constant 752 : index
    %c0_181 = arith.constant 0 : index
    %583 = vector.load %arg4[%c752, %c0_181] : memref<1040x128xf32, #tpu.memory_space<vmem>>, vector<1x32xf32>
    %584 = vector.broadcast %583 : vector<1x32xf32> to vector<4x32xf32>
    %585 = arith.addf %582, %584 : vector<4x32xf32>
    %c760 = arith.constant 760 : index
    %c0_182 = arith.constant 0 : index
    %586 = vector.load %arg4[%c760, %c0_182] : memref<1040x128xf32, #tpu.memory_space<vmem>>, vector<1x32xf32>
    %c768 = arith.constant 768 : index
    %c0_183 = arith.constant 0 : index
    %587 = vector.load %arg4[%c768, %c0_183] : memref<1040x128xf32, #tpu.memory_space<vmem>>, vector<1x32xf32>
    %cst_184 = arith.constant dense<0.000000e+00> : vector<8xf32>
    %588 = vector.multi_reduction <add>, %345, %cst_184 [1] : vector<8x32xf32> to vector<8xf32>
    %589 = vector.shape_cast %588 : vector<8xf32> to vector<8x1xf32>
    %cst_185 = arith.constant 3.200000e+01 : f32
    %590 = vector.broadcast %cst_185 : f32 to vector<8x1xf32>
    %591 = arith.divf %589, %590 : vector<8x1xf32>
    %592 = vector.broadcast %591 : vector<8x1xf32> to vector<8x32xf32>
    %593 = arith.subf %345, %592 : vector<8x32xf32>
    %594 = arith.mulf %593, %593 : vector<8x32xf32>
    %cst_186 = arith.constant dense<0.000000e+00> : vector<8xf32>
    %595 = vector.multi_reduction <add>, %594, %cst_186 [1] : vector<8x32xf32> to vector<8xf32>
    %596 = vector.shape_cast %595 : vector<8xf32> to vector<8x1xf32>
    %cst_187 = arith.constant 3.200000e+01 : f32
    %597 = vector.broadcast %cst_187 : f32 to vector<8x1xf32>
    %598 = arith.divf %596, %597 : vector<8x1xf32>
    %599 = vector.broadcast %591 : vector<8x1xf32> to vector<8x32xf32>
    %600 = arith.subf %345, %599 : vector<8x32xf32>
    %cst_188 = arith.constant 9.99999974E-6 : f32
    %601 = vector.broadcast %cst_188 : f32 to vector<8x1xf32>
    %602 = arith.addf %598, %601 : vector<8x1xf32>
    %603 = math.rsqrt %602 : vector<8x1xf32>
    %604 = vector.broadcast %603 : vector<8x1xf32> to vector<8x32xf32>
    %605 = arith.mulf %600, %604 : vector<8x32xf32>
    %606 = vector.broadcast %586 : vector<1x32xf32> to vector<8x32xf32>
    %607 = arith.mulf %605, %606 : vector<8x32xf32>
    %608 = vector.broadcast %587 : vector<1x32xf32> to vector<8x32xf32>
    %609 = arith.addf %607, %608 : vector<8x32xf32>
    %c776 = arith.constant 776 : index
    %c0_189 = arith.constant 0 : index
    %610 = vector.load %arg4[%c776, %c0_189] : memref<1040x128xf32, #tpu.memory_space<vmem>>, vector<1x32xf32>
    %c784 = arith.constant 784 : index
    %c0_190 = arith.constant 0 : index
    %611 = vector.load %arg4[%c784, %c0_190] : memref<1040x128xf32, #tpu.memory_space<vmem>>, vector<1x32xf32>
    %cst_191 = arith.constant dense<0.000000e+00> : vector<4xf32>
    %612 = vector.multi_reduction <add>, %585, %cst_191 [1] : vector<4x32xf32> to vector<4xf32>
    %613 = vector.shape_cast %612 : vector<4xf32> to vector<4x1xf32>
    %cst_192 = arith.constant 3.200000e+01 : f32
    %614 = vector.broadcast %cst_192 : f32 to vector<4x1xf32>
    %615 = arith.divf %613, %614 : vector<4x1xf32>
    %616 = vector.broadcast %615 : vector<4x1xf32> to vector<4x32xf32>
    %617 = arith.subf %585, %616 : vector<4x32xf32>
    %618 = arith.mulf %617, %617 : vector<4x32xf32>
    %cst_193 = arith.constant dense<0.000000e+00> : vector<4xf32>
    %619 = vector.multi_reduction <add>, %618, %cst_193 [1] : vector<4x32xf32> to vector<4xf32>
    %620 = vector.shape_cast %619 : vector<4xf32> to vector<4x1xf32>
    %cst_194 = arith.constant 3.200000e+01 : f32
    %621 = vector.broadcast %cst_194 : f32 to vector<4x1xf32>
    %622 = arith.divf %620, %621 : vector<4x1xf32>
    %623 = vector.broadcast %615 : vector<4x1xf32> to vector<4x32xf32>
    %624 = arith.subf %585, %623 : vector<4x32xf32>
    %cst_195 = arith.constant 9.99999974E-6 : f32
    %625 = vector.broadcast %cst_195 : f32 to vector<4x1xf32>
    %626 = arith.addf %622, %625 : vector<4x1xf32>
    %627 = math.rsqrt %626 : vector<4x1xf32>
    %628 = vector.broadcast %627 : vector<4x1xf32> to vector<4x32xf32>
    %629 = arith.mulf %624, %628 : vector<4x32xf32>
    %630 = vector.broadcast %610 : vector<1x32xf32> to vector<4x32xf32>
    %631 = arith.mulf %629, %630 : vector<4x32xf32>
    %632 = vector.broadcast %611 : vector<1x32xf32> to vector<4x32xf32>
    %633 = arith.addf %631, %632 : vector<4x32xf32>
    %c792 = arith.constant 792 : index
    %c0_196 = arith.constant 0 : index
    %634 = vector.load %arg4[%c792, %c0_196] : memref<1040x128xf32, #tpu.memory_space<vmem>>, vector<32x96xf32>
    %cst_197 = arith.constant dense<0.000000e+00> : vector<4x96xf32>
    %635 = tpu.matmul %633, %634, %cst_197 {dimension_numbers = #tpu.dot_dimension_numbers<[1], [0], [0], [1], [0, 0, 1, 1], [], []>} : vector<4x32xf32>, vector<32x96xf32>, vector<4x96xf32> -> vector<4x96xf32>
    %636 = vector.extract_strided_slice %634 {offsets = [0, 32], sizes = [32, 64], strides = [1, 1]} : vector<32x96xf32> to vector<32x64xf32>
    %cst_198 = arith.constant dense<0.000000e+00> : vector<8x64xf32>
    %637 = tpu.matmul %609, %636, %cst_198 {dimension_numbers = #tpu.dot_dimension_numbers<[1], [0], [0], [1], [0, 0, 1, 1], [], []>} : vector<8x32xf32>, vector<32x64xf32>, vector<8x64xf32> -> vector<8x64xf32>
    %638 = vector.extract_strided_slice %635 {offsets = [0, 0], sizes = [4, 8], strides = [1, 1]} : vector<4x96xf32> to vector<4x8xf32>
    %639 = vector.extract_strided_slice %635 {offsets = [0, 32], sizes = [4, 8], strides = [1, 1]} : vector<4x96xf32> to vector<4x8xf32>
    %640 = vector.extract_strided_slice %635 {offsets = [0, 64], sizes = [4, 8], strides = [1, 1]} : vector<4x96xf32> to vector<4x8xf32>
    %641 = vector.extract_strided_slice %637 {offsets = [0, 0], sizes = [8, 8], strides = [1, 1]} : vector<8x64xf32> to vector<8x8xf32>
    %642 = vector.extract_strided_slice %637 {offsets = [0, 32], sizes = [8, 8], strides = [1, 1]} : vector<8x64xf32> to vector<8x8xf32>
    %cst_199 = arith.constant dense<0.000000e+00> : vector<4x8xf32>
    %643 = tpu.matmul %638, %641, %cst_199 {dimension_numbers = #tpu.dot_dimension_numbers<[1], [1], [0], [0], [0, 0, 1, 0], [], []>} : vector<4x8xf32>, vector<8x8xf32>, vector<4x8xf32> -> vector<4x8xf32>
    %644 = vector.broadcast %6 : vector<1x8xf32> to vector<4x8xf32>
    %645 = arith.addf %643, %644 : vector<4x8xf32>
    %cst_200 = arith.constant dense<0.000000e+00> : vector<4x4xf32>
    %646 = tpu.matmul %638, %639, %cst_200 {dimension_numbers = #tpu.dot_dimension_numbers<[1], [1], [0], [0], [0, 0, 1, 0], [], []>} : vector<4x8xf32>, vector<4x8xf32>, vector<4x4xf32> -> vector<4x4xf32>
    %cst_201 = arith.constant dense<0xFF800000> : vector<4xf32>
    %647 = vector.multi_reduction <maximumf>, %645, %cst_201 [1] : vector<4x8xf32> to vector<4xf32>
    %648 = vector.shape_cast %647 : vector<4xf32> to vector<4x1xf32>
    %cst_202 = arith.constant dense<0xFF800000> : vector<4xf32>
    %649 = vector.multi_reduction <maximumf>, %646, %cst_202 [1] : vector<4x4xf32> to vector<4xf32>
    %650 = vector.shape_cast %649 : vector<4xf32> to vector<4x1xf32>
    %651 = arith.maximumf %648, %650 : vector<4x1xf32>
    %652 = vector.broadcast %651 : vector<4x1xf32> to vector<4x8xf32>
    %653 = arith.subf %645, %652 : vector<4x8xf32>
    %654 = math.exp %653 : vector<4x8xf32>
    %655 = vector.broadcast %651 : vector<4x1xf32> to vector<4x4xf32>
    %656 = arith.subf %646, %655 : vector<4x4xf32>
    %657 = math.exp %656 : vector<4x4xf32>
    %cst_203 = arith.constant dense<0.000000e+00> : vector<4xf32>
    %658 = vector.multi_reduction <add>, %654, %cst_203 [1] : vector<4x8xf32> to vector<4xf32>
    %659 = vector.shape_cast %658 : vector<4xf32> to vector<4x1xf32>
    %cst_204 = arith.constant dense<0.000000e+00> : vector<4xf32>
    %660 = vector.multi_reduction <add>, %657, %cst_204 [1] : vector<4x4xf32> to vector<4xf32>
    %661 = vector.shape_cast %660 : vector<4xf32> to vector<4x1xf32>
    %662 = arith.addf %659, %661 : vector<4x1xf32>
    %cst_205 = arith.constant dense<0.000000e+00> : vector<4x8xf32>
    %663 = tpu.matmul %654, %642, %cst_205 {dimension_numbers = #tpu.dot_dimension_numbers<[1], [0], [0], [1], [0, 0, 1, 1], [], []>} : vector<4x8xf32>, vector<8x8xf32>, vector<4x8xf32> -> vector<4x8xf32>
    %cst_206 = arith.constant dense<0.000000e+00> : vector<4x8xf32>
    %664 = tpu.matmul %657, %640, %cst_206 {dimension_numbers = #tpu.dot_dimension_numbers<[1], [0], [0], [1], [0, 0, 1, 1], [], []>} : vector<4x4xf32>, vector<4x8xf32>, vector<4x8xf32> -> vector<4x8xf32>
    %665 = arith.addf %663, %664 : vector<4x8xf32>
    %666 = tpu.reciprocal %662 {approx = true} : vector<4x1xf32> -> vector<4x1xf32>
    %667 = vector.broadcast %666 : vector<4x1xf32> to vector<4x8xf32>
    %668 = arith.mulf %665, %667 : vector<4x8xf32>
    %669 = vector.extract_strided_slice %635 {offsets = [0, 8], sizes = [4, 8], strides = [1, 1]} : vector<4x96xf32> to vector<4x8xf32>
    %670 = vector.extract_strided_slice %635 {offsets = [0, 40], sizes = [4, 8], strides = [1, 1]} : vector<4x96xf32> to vector<4x8xf32>
    %671 = vector.extract_strided_slice %635 {offsets = [0, 72], sizes = [4, 8], strides = [1, 1]} : vector<4x96xf32> to vector<4x8xf32>
    %672 = vector.extract_strided_slice %637 {offsets = [0, 8], sizes = [8, 8], strides = [1, 1]} : vector<8x64xf32> to vector<8x8xf32>
    %673 = vector.extract_strided_slice %637 {offsets = [0, 40], sizes = [8, 8], strides = [1, 1]} : vector<8x64xf32> to vector<8x8xf32>
    %cst_207 = arith.constant dense<0.000000e+00> : vector<4x8xf32>
    %674 = tpu.matmul %669, %672, %cst_207 {dimension_numbers = #tpu.dot_dimension_numbers<[1], [1], [0], [0], [0, 0, 1, 0], [], []>} : vector<4x8xf32>, vector<8x8xf32>, vector<4x8xf32> -> vector<4x8xf32>
    %675 = vector.broadcast %6 : vector<1x8xf32> to vector<4x8xf32>
    %676 = arith.addf %674, %675 : vector<4x8xf32>
    %cst_208 = arith.constant dense<0.000000e+00> : vector<4x4xf32>
    %677 = tpu.matmul %669, %670, %cst_208 {dimension_numbers = #tpu.dot_dimension_numbers<[1], [1], [0], [0], [0, 0, 1, 0], [], []>} : vector<4x8xf32>, vector<4x8xf32>, vector<4x4xf32> -> vector<4x4xf32>
    %cst_209 = arith.constant dense<0xFF800000> : vector<4xf32>
    %678 = vector.multi_reduction <maximumf>, %676, %cst_209 [1] : vector<4x8xf32> to vector<4xf32>
    %679 = vector.shape_cast %678 : vector<4xf32> to vector<4x1xf32>
    %cst_210 = arith.constant dense<0xFF800000> : vector<4xf32>
    %680 = vector.multi_reduction <maximumf>, %677, %cst_210 [1] : vector<4x4xf32> to vector<4xf32>
    %681 = vector.shape_cast %680 : vector<4xf32> to vector<4x1xf32>
    %682 = arith.maximumf %679, %681 : vector<4x1xf32>
    %683 = vector.broadcast %682 : vector<4x1xf32> to vector<4x8xf32>
    %684 = arith.subf %676, %683 : vector<4x8xf32>
    %685 = math.exp %684 : vector<4x8xf32>
    %686 = vector.broadcast %682 : vector<4x1xf32> to vector<4x4xf32>
    %687 = arith.subf %677, %686 : vector<4x4xf32>
    %688 = math.exp %687 : vector<4x4xf32>
    %cst_211 = arith.constant dense<0.000000e+00> : vector<4xf32>
    %689 = vector.multi_reduction <add>, %685, %cst_211 [1] : vector<4x8xf32> to vector<4xf32>
    %690 = vector.shape_cast %689 : vector<4xf32> to vector<4x1xf32>
    %cst_212 = arith.constant dense<0.000000e+00> : vector<4xf32>
    %691 = vector.multi_reduction <add>, %688, %cst_212 [1] : vector<4x4xf32> to vector<4xf32>
    %692 = vector.shape_cast %691 : vector<4xf32> to vector<4x1xf32>
    %693 = arith.addf %690, %692 : vector<4x1xf32>
    %cst_213 = arith.constant dense<0.000000e+00> : vector<4x8xf32>
    %694 = tpu.matmul %685, %673, %cst_213 {dimension_numbers = #tpu.dot_dimension_numbers<[1], [0], [0], [1], [0, 0, 1, 1], [], []>} : vector<4x8xf32>, vector<8x8xf32>, vector<4x8xf32> -> vector<4x8xf32>
    %cst_214 = arith.constant dense<0.000000e+00> : vector<4x8xf32>
    %695 = tpu.matmul %688, %671, %cst_214 {dimension_numbers = #tpu.dot_dimension_numbers<[1], [0], [0], [1], [0, 0, 1, 1], [], []>} : vector<4x4xf32>, vector<4x8xf32>, vector<4x8xf32> -> vector<4x8xf32>
    %696 = arith.addf %694, %695 : vector<4x8xf32>
    %697 = tpu.reciprocal %693 {approx = true} : vector<4x1xf32> -> vector<4x1xf32>
    %698 = vector.broadcast %697 : vector<4x1xf32> to vector<4x8xf32>
    %699 = arith.mulf %696, %698 : vector<4x8xf32>
    %700 = vector.extract_strided_slice %635 {offsets = [0, 16], sizes = [4, 8], strides = [1, 1]} : vector<4x96xf32> to vector<4x8xf32>
    %701 = vector.extract_strided_slice %635 {offsets = [0, 48], sizes = [4, 8], strides = [1, 1]} : vector<4x96xf32> to vector<4x8xf32>
    %702 = vector.extract_strided_slice %635 {offsets = [0, 80], sizes = [4, 8], strides = [1, 1]} : vector<4x96xf32> to vector<4x8xf32>
    %703 = vector.extract_strided_slice %637 {offsets = [0, 16], sizes = [8, 8], strides = [1, 1]} : vector<8x64xf32> to vector<8x8xf32>
    %704 = vector.extract_strided_slice %637 {offsets = [0, 48], sizes = [8, 8], strides = [1, 1]} : vector<8x64xf32> to vector<8x8xf32>
    %cst_215 = arith.constant dense<0.000000e+00> : vector<4x8xf32>
    %705 = tpu.matmul %700, %703, %cst_215 {dimension_numbers = #tpu.dot_dimension_numbers<[1], [1], [0], [0], [0, 0, 1, 0], [], []>} : vector<4x8xf32>, vector<8x8xf32>, vector<4x8xf32> -> vector<4x8xf32>
    %706 = vector.broadcast %6 : vector<1x8xf32> to vector<4x8xf32>
    %707 = arith.addf %705, %706 : vector<4x8xf32>
    %cst_216 = arith.constant dense<0.000000e+00> : vector<4x4xf32>
    %708 = tpu.matmul %700, %701, %cst_216 {dimension_numbers = #tpu.dot_dimension_numbers<[1], [1], [0], [0], [0, 0, 1, 0], [], []>} : vector<4x8xf32>, vector<4x8xf32>, vector<4x4xf32> -> vector<4x4xf32>
    %cst_217 = arith.constant dense<0xFF800000> : vector<4xf32>
    %709 = vector.multi_reduction <maximumf>, %707, %cst_217 [1] : vector<4x8xf32> to vector<4xf32>
    %710 = vector.shape_cast %709 : vector<4xf32> to vector<4x1xf32>
    %cst_218 = arith.constant dense<0xFF800000> : vector<4xf32>
    %711 = vector.multi_reduction <maximumf>, %708, %cst_218 [1] : vector<4x4xf32> to vector<4xf32>
    %712 = vector.shape_cast %711 : vector<4xf32> to vector<4x1xf32>
    %713 = arith.maximumf %710, %712 : vector<4x1xf32>
    %714 = vector.broadcast %713 : vector<4x1xf32> to vector<4x8xf32>
    %715 = arith.subf %707, %714 : vector<4x8xf32>
    %716 = math.exp %715 : vector<4x8xf32>
    %717 = vector.broadcast %713 : vector<4x1xf32> to vector<4x4xf32>
    %718 = arith.subf %708, %717 : vector<4x4xf32>
    %719 = math.exp %718 : vector<4x4xf32>
    %cst_219 = arith.constant dense<0.000000e+00> : vector<4xf32>
    %720 = vector.multi_reduction <add>, %716, %cst_219 [1] : vector<4x8xf32> to vector<4xf32>
    %721 = vector.shape_cast %720 : vector<4xf32> to vector<4x1xf32>
    %cst_220 = arith.constant dense<0.000000e+00> : vector<4xf32>
    %722 = vector.multi_reduction <add>, %719, %cst_220 [1] : vector<4x4xf32> to vector<4xf32>
    %723 = vector.shape_cast %722 : vector<4xf32> to vector<4x1xf32>
    %724 = arith.addf %721, %723 : vector<4x1xf32>
    %cst_221 = arith.constant dense<0.000000e+00> : vector<4x8xf32>
    %725 = tpu.matmul %716, %704, %cst_221 {dimension_numbers = #tpu.dot_dimension_numbers<[1], [0], [0], [1], [0, 0, 1, 1], [], []>} : vector<4x8xf32>, vector<8x8xf32>, vector<4x8xf32> -> vector<4x8xf32>
    %cst_222 = arith.constant dense<0.000000e+00> : vector<4x8xf32>
    %726 = tpu.matmul %719, %702, %cst_222 {dimension_numbers = #tpu.dot_dimension_numbers<[1], [0], [0], [1], [0, 0, 1, 1], [], []>} : vector<4x4xf32>, vector<4x8xf32>, vector<4x8xf32> -> vector<4x8xf32>
    %727 = arith.addf %725, %726 : vector<4x8xf32>
    %728 = tpu.reciprocal %724 {approx = true} : vector<4x1xf32> -> vector<4x1xf32>
    %729 = vector.broadcast %728 : vector<4x1xf32> to vector<4x8xf32>
    %730 = arith.mulf %727, %729 : vector<4x8xf32>
    %731 = vector.extract_strided_slice %635 {offsets = [0, 24], sizes = [4, 8], strides = [1, 1]} : vector<4x96xf32> to vector<4x8xf32>
    %732 = vector.extract_strided_slice %635 {offsets = [0, 56], sizes = [4, 8], strides = [1, 1]} : vector<4x96xf32> to vector<4x8xf32>
    %733 = vector.extract_strided_slice %635 {offsets = [0, 88], sizes = [4, 8], strides = [1, 1]} : vector<4x96xf32> to vector<4x8xf32>
    %734 = vector.extract_strided_slice %637 {offsets = [0, 24], sizes = [8, 8], strides = [1, 1]} : vector<8x64xf32> to vector<8x8xf32>
    %735 = vector.extract_strided_slice %637 {offsets = [0, 56], sizes = [8, 8], strides = [1, 1]} : vector<8x64xf32> to vector<8x8xf32>
    %cst_223 = arith.constant dense<0.000000e+00> : vector<4x8xf32>
    %736 = tpu.matmul %731, %734, %cst_223 {dimension_numbers = #tpu.dot_dimension_numbers<[1], [1], [0], [0], [0, 0, 1, 0], [], []>} : vector<4x8xf32>, vector<8x8xf32>, vector<4x8xf32> -> vector<4x8xf32>
    %737 = vector.broadcast %6 : vector<1x8xf32> to vector<4x8xf32>
    %738 = arith.addf %736, %737 : vector<4x8xf32>
    %cst_224 = arith.constant dense<0.000000e+00> : vector<4x4xf32>
    %739 = tpu.matmul %731, %732, %cst_224 {dimension_numbers = #tpu.dot_dimension_numbers<[1], [1], [0], [0], [0, 0, 1, 0], [], []>} : vector<4x8xf32>, vector<4x8xf32>, vector<4x4xf32> -> vector<4x4xf32>
    %cst_225 = arith.constant dense<0xFF800000> : vector<4xf32>
    %740 = vector.multi_reduction <maximumf>, %738, %cst_225 [1] : vector<4x8xf32> to vector<4xf32>
    %741 = vector.shape_cast %740 : vector<4xf32> to vector<4x1xf32>
    %cst_226 = arith.constant dense<0xFF800000> : vector<4xf32>
    %742 = vector.multi_reduction <maximumf>, %739, %cst_226 [1] : vector<4x4xf32> to vector<4xf32>
    %743 = vector.shape_cast %742 : vector<4xf32> to vector<4x1xf32>
    %744 = arith.maximumf %741, %743 : vector<4x1xf32>
    %745 = vector.broadcast %744 : vector<4x1xf32> to vector<4x8xf32>
    %746 = arith.subf %738, %745 : vector<4x8xf32>
    %747 = math.exp %746 : vector<4x8xf32>
    %748 = vector.broadcast %744 : vector<4x1xf32> to vector<4x4xf32>
    %749 = arith.subf %739, %748 : vector<4x4xf32>
    %750 = math.exp %749 : vector<4x4xf32>
    %cst_227 = arith.constant dense<0.000000e+00> : vector<4xf32>
    %751 = vector.multi_reduction <add>, %747, %cst_227 [1] : vector<4x8xf32> to vector<4xf32>
    %752 = vector.shape_cast %751 : vector<4xf32> to vector<4x1xf32>
    %cst_228 = arith.constant dense<0.000000e+00> : vector<4xf32>
    %753 = vector.multi_reduction <add>, %750, %cst_228 [1] : vector<4x4xf32> to vector<4xf32>
    %754 = vector.shape_cast %753 : vector<4xf32> to vector<4x1xf32>
    %755 = arith.addf %752, %754 : vector<4x1xf32>
    %cst_229 = arith.constant dense<0.000000e+00> : vector<4x8xf32>
    %756 = tpu.matmul %747, %735, %cst_229 {dimension_numbers = #tpu.dot_dimension_numbers<[1], [0], [0], [1], [0, 0, 1, 1], [], []>} : vector<4x8xf32>, vector<8x8xf32>, vector<4x8xf32> -> vector<4x8xf32>
    %cst_230 = arith.constant dense<0.000000e+00> : vector<4x8xf32>
    %757 = tpu.matmul %750, %733, %cst_230 {dimension_numbers = #tpu.dot_dimension_numbers<[1], [0], [0], [1], [0, 0, 1, 1], [], []>} : vector<4x4xf32>, vector<4x8xf32>, vector<4x8xf32> -> vector<4x8xf32>
    %758 = arith.addf %756, %757 : vector<4x8xf32>
    %759 = tpu.reciprocal %755 {approx = true} : vector<4x1xf32> -> vector<4x1xf32>
    %760 = vector.broadcast %759 : vector<4x1xf32> to vector<4x8xf32>
    %761 = arith.mulf %758, %760 : vector<4x8xf32>
    %762 = tpu.concatenate %668, %699, %730, %761 in 1 : vector<4x8xf32>, vector<4x8xf32>, vector<4x8xf32>, vector<4x8xf32> -> vector<4x32xf32>
    %c824 = arith.constant 824 : index
    %c0_231 = arith.constant 0 : index
    %763 = vector.load %arg4[%c824, %c0_231] : memref<1040x128xf32, #tpu.memory_space<vmem>>, vector<32x32xf32>
    %cst_232 = arith.constant dense<0.000000e+00> : vector<4x32xf32>
    %764 = tpu.matmul %762, %763, %cst_232 {dimension_numbers = #tpu.dot_dimension_numbers<[1], [0], [0], [1], [0, 0, 1, 1], [], []>} : vector<4x32xf32>, vector<32x32xf32>, vector<4x32xf32> -> vector<4x32xf32>
    %765 = arith.addf %585, %764 : vector<4x32xf32>
    %c856 = arith.constant 856 : index
    %c0_233 = arith.constant 0 : index
    %766 = vector.load %arg4[%c856, %c0_233] : memref<1040x128xf32, #tpu.memory_space<vmem>>, vector<1x32xf32>
    %c864 = arith.constant 864 : index
    %c0_234 = arith.constant 0 : index
    %767 = vector.load %arg4[%c864, %c0_234] : memref<1040x128xf32, #tpu.memory_space<vmem>>, vector<1x32xf32>
    %cst_235 = arith.constant dense<0.000000e+00> : vector<4xf32>
    %768 = vector.multi_reduction <add>, %765, %cst_235 [1] : vector<4x32xf32> to vector<4xf32>
    %769 = vector.shape_cast %768 : vector<4xf32> to vector<4x1xf32>
    %cst_236 = arith.constant 3.200000e+01 : f32
    %770 = vector.broadcast %cst_236 : f32 to vector<4x1xf32>
    %771 = arith.divf %769, %770 : vector<4x1xf32>
    %772 = vector.broadcast %771 : vector<4x1xf32> to vector<4x32xf32>
    %773 = arith.subf %765, %772 : vector<4x32xf32>
    %774 = arith.mulf %773, %773 : vector<4x32xf32>
    %cst_237 = arith.constant dense<0.000000e+00> : vector<4xf32>
    %775 = vector.multi_reduction <add>, %774, %cst_237 [1] : vector<4x32xf32> to vector<4xf32>
    %776 = vector.shape_cast %775 : vector<4xf32> to vector<4x1xf32>
    %cst_238 = arith.constant 3.200000e+01 : f32
    %777 = vector.broadcast %cst_238 : f32 to vector<4x1xf32>
    %778 = arith.divf %776, %777 : vector<4x1xf32>
    %779 = vector.broadcast %771 : vector<4x1xf32> to vector<4x32xf32>
    %780 = arith.subf %765, %779 : vector<4x32xf32>
    %cst_239 = arith.constant 9.99999974E-6 : f32
    %781 = vector.broadcast %cst_239 : f32 to vector<4x1xf32>
    %782 = arith.addf %778, %781 : vector<4x1xf32>
    %783 = math.rsqrt %782 : vector<4x1xf32>
    %784 = vector.broadcast %783 : vector<4x1xf32> to vector<4x32xf32>
    %785 = arith.mulf %780, %784 : vector<4x32xf32>
    %786 = vector.broadcast %766 : vector<1x32xf32> to vector<4x32xf32>
    %787 = arith.mulf %785, %786 : vector<4x32xf32>
    %788 = vector.broadcast %767 : vector<1x32xf32> to vector<4x32xf32>
    %789 = arith.addf %787, %788 : vector<4x32xf32>
    %c872 = arith.constant 872 : index
    %c0_240 = arith.constant 0 : index
    %790 = vector.load %arg4[%c872, %c0_240] : memref<1040x128xf32, #tpu.memory_space<vmem>>, vector<32x64xf32>
    %cst_241 = arith.constant dense<0.000000e+00> : vector<4x64xf32>
    %791 = tpu.matmul %789, %790, %cst_241 {dimension_numbers = #tpu.dot_dimension_numbers<[1], [0], [0], [1], [0, 0, 1, 1], [], []>} : vector<4x32xf32>, vector<32x64xf32>, vector<4x64xf32> -> vector<4x64xf32>
    %c904 = arith.constant 904 : index
    %c0_242 = arith.constant 0 : index
    %792 = vector.load %arg4[%c904, %c0_242] : memref<1040x128xf32, #tpu.memory_space<vmem>>, vector<1x64xf32>
    %793 = vector.broadcast %792 : vector<1x64xf32> to vector<4x64xf32>
    %794 = arith.addf %791, %793 : vector<4x64xf32>
    %795 = arith.mulf %794, %794 : vector<4x64xf32>
    %796 = arith.mulf %794, %795 : vector<4x64xf32>
    %cst_243 = arith.constant 4.471500e-02 : f32
    %797 = vector.broadcast %cst_243 : f32 to vector<4x64xf32>
    %798 = arith.mulf %797, %796 : vector<4x64xf32>
    %799 = arith.addf %794, %798 : vector<4x64xf32>
    %cst_244 = arith.constant 0.797884583 : f32
    %800 = vector.broadcast %cst_244 : f32 to vector<4x64xf32>
    %801 = arith.mulf %800, %799 : vector<4x64xf32>
    %802 = math.tanh %801 : vector<4x64xf32>
    %cst_245 = arith.constant 1.000000e+00 : f32
    %803 = vector.broadcast %cst_245 : f32 to vector<4x64xf32>
    %804 = arith.addf %803, %802 : vector<4x64xf32>
    %cst_246 = arith.constant 5.000000e-01 : f32
    %805 = vector.broadcast %cst_246 : f32 to vector<4x64xf32>
    %806 = arith.mulf %805, %804 : vector<4x64xf32>
    %807 = arith.mulf %794, %806 : vector<4x64xf32>
    %c912 = arith.constant 912 : index
    %c0_247 = arith.constant 0 : index
    %808 = vector.load %arg4[%c912, %c0_247] : memref<1040x128xf32, #tpu.memory_space<vmem>>, vector<64x32xf32>
    %cst_248 = arith.constant dense<0.000000e+00> : vector<4x32xf32>
    %809 = tpu.matmul %807, %808, %cst_248 {dimension_numbers = #tpu.dot_dimension_numbers<[1], [0], [0], [1], [0, 0, 1, 1], [], []>} : vector<4x64xf32>, vector<64x32xf32>, vector<4x32xf32> -> vector<4x32xf32>
    %810 = arith.addf %765, %809 : vector<4x32xf32>
    %c976 = arith.constant 976 : index
    %c0_249 = arith.constant 0 : index
    %811 = vector.load %arg4[%c976, %c0_249] : memref<1040x128xf32, #tpu.memory_space<vmem>>, vector<1x32xf32>
    %812 = vector.broadcast %811 : vector<1x32xf32> to vector<4x32xf32>
    %813 = arith.addf %810, %812 : vector<4x32xf32>
    %c984 = arith.constant 984 : index
    %c0_250 = arith.constant 0 : index
    %814 = vector.load %arg4[%c984, %c0_250] : memref<1040x128xf32, #tpu.memory_space<vmem>>, vector<32x32xf32>
    %cst_251 = arith.constant dense<0.000000e+00> : vector<4x32xf32>
    %815 = tpu.matmul %813, %814, %cst_251 {dimension_numbers = #tpu.dot_dimension_numbers<[1], [0], [0], [1], [0, 0, 1, 1], [], []>} : vector<4x32xf32>, vector<32x32xf32>, vector<4x32xf32> -> vector<4x32xf32>
    %c1016 = arith.constant 1016 : index
    %c0_252 = arith.constant 0 : index
    %816 = vector.load %arg4[%c1016, %c0_252] : memref<1040x128xf32, #tpu.memory_space<vmem>>, vector<1x32xf32>
    %817 = vector.broadcast %816 : vector<1x32xf32> to vector<4x32xf32>
    %818 = arith.addf %815, %817 : vector<4x32xf32>
    %c1024 = arith.constant 1024 : index
    %c0_253 = arith.constant 0 : index
    %819 = vector.load %arg4[%c1024, %c0_253] : memref<1040x128xf32, #tpu.memory_space<vmem>>, vector<1x32xf32>
    %c1032 = arith.constant 1032 : index
    %c0_254 = arith.constant 0 : index
    %820 = vector.load %arg4[%c1032, %c0_254] : memref<1040x128xf32, #tpu.memory_space<vmem>>, vector<1x32xf32>
    %cst_255 = arith.constant dense<0.000000e+00> : vector<4xf32>
    %821 = vector.multi_reduction <add>, %818, %cst_255 [1] : vector<4x32xf32> to vector<4xf32>
    %822 = vector.shape_cast %821 : vector<4xf32> to vector<4x1xf32>
    %cst_256 = arith.constant 3.200000e+01 : f32
    %823 = vector.broadcast %cst_256 : f32 to vector<4x1xf32>
    %824 = arith.divf %822, %823 : vector<4x1xf32>
    %825 = vector.broadcast %824 : vector<4x1xf32> to vector<4x32xf32>
    %826 = arith.subf %818, %825 : vector<4x32xf32>
    %827 = arith.mulf %826, %826 : vector<4x32xf32>
    %cst_257 = arith.constant dense<0.000000e+00> : vector<4xf32>
    %828 = vector.multi_reduction <add>, %827, %cst_257 [1] : vector<4x32xf32> to vector<4xf32>
    %829 = vector.shape_cast %828 : vector<4xf32> to vector<4x1xf32>
    %cst_258 = arith.constant 3.200000e+01 : f32
    %830 = vector.broadcast %cst_258 : f32 to vector<4x1xf32>
    %831 = arith.divf %829, %830 : vector<4x1xf32>
    %832 = vector.broadcast %824 : vector<4x1xf32> to vector<4x32xf32>
    %833 = arith.subf %818, %832 : vector<4x32xf32>
    %cst_259 = arith.constant 9.99999974E-6 : f32
    %834 = vector.broadcast %cst_259 : f32 to vector<4x1xf32>
    %835 = arith.addf %831, %834 : vector<4x1xf32>
    %836 = math.rsqrt %835 : vector<4x1xf32>
    %837 = vector.broadcast %836 : vector<4x1xf32> to vector<4x32xf32>
    %838 = arith.mulf %833, %837 : vector<4x32xf32>
    %839 = vector.broadcast %819 : vector<1x32xf32> to vector<4x32xf32>
    %840 = arith.mulf %838, %839 : vector<4x32xf32>
    %841 = vector.broadcast %820 : vector<1x32xf32> to vector<4x32xf32>
    %842 = arith.addf %840, %841 : vector<4x32xf32>
    %843 = vector.extract_strided_slice %842 {offsets = [0, 0], sizes = [1, 32], strides = [1, 1]} : vector<4x32xf32> to vector<1x32xf32>
    %844 = vector.extract_strided_slice %842 {offsets = [1, 0], sizes = [1, 32], strides = [1, 1]} : vector<4x32xf32> to vector<1x32xf32>
    %845 = vector.extract_strided_slice %842 {offsets = [2, 0], sizes = [1, 32], strides = [1, 1]} : vector<4x32xf32> to vector<1x32xf32>
    %846 = vector.extract_strided_slice %842 {offsets = [3, 0], sizes = [1, 32], strides = [1, 1]} : vector<4x32xf32> to vector<1x32xf32>
    %847 = tpu.concatenate %843, %844, %845, %846 in 1 : vector<1x32xf32>, vector<1x32xf32>, vector<1x32xf32>, vector<1x32xf32> -> vector<1x128xf32>
    %848 = vector.shape_cast %847 : vector<1x128xf32> to vector<1x1x128xf32>
    %c0_260 = arith.constant 0 : index
    %c0_261 = arith.constant 0 : index
    %c0_262 = arith.constant 0 : index
    %849 = vector.load %arg6[%c0_260, %c0_261, %c0_262] : memref<1x1x128xf32, #tpu.memory_space<vmem>>, vector<1x1x128xf32>
    tpu.vector_store %arg6[%c0_260, %c0_261, %c0_262], %848 {strides = array<i32>} : memref<1x1x128xf32, #tpu.memory_space<vmem>>, vector<1x1x128xf32>,
    return
  }
  func.func @transform_0(%arg0: i32) -> (i32, i32) {
    %c0_i32 = arith.constant 0 : i32
    %c0_i32_0 = arith.constant 0 : i32
    return %arg0, %c0_i32 : i32, i32
  }
  func.func @transform_1(%arg0: i32) -> (i32, i32) {
    %c0_i32 = arith.constant 0 : i32
    %c0_i32_0 = arith.constant 0 : i32
    return %arg0, %c0_i32 : i32, i32
  }
  func.func @transform_2(%arg0: i32) -> (i32, i32, i32) {
    %c0_i32 = arith.constant 0 : i32
    %c0_i32_0 = arith.constant 0 : i32
    %c0_i32_1 = arith.constant 0 : i32
    return %arg0, %c0_i32, %c0_i32_0 : i32, i32, i32
  }
  func.func @transform_3(%arg0: i32) -> (i32, i32) {
    %c0_i32 = arith.constant 0 : i32
    %c0_i32_0 = arith.constant 0 : i32
    %c0_i32_1 = arith.constant 0 : i32
    return %c0_i32, %c0_i32_0 : i32, i32
  }
  func.func @transform_4(%arg0: i32) -> (i32, i32, i32) {
    %c0_i32 = arith.constant 0 : i32
    %c0_i32_0 = arith.constant 0 : i32
    %c0_i32_1 = arith.constant 0 : i32
    return %arg0, %c0_i32, %c0_i32_0 : i32, i32, i32
  }
  func.func @transform_5(%arg0: i32) -> (i32, i32, i32) {
    %c0_i32 = arith.constant 0 : i32
    %c0_i32_0 = arith.constant 0 : i32
    %c0_i32_1 = arith.constant 0 : i32
    return %arg0, %c0_i32, %c0_i32_0 : i32, i32, i32
  }
}

</mosaic_0001>

<bundles_post_ra>
// kernel: forward.1
= control target key start
LH: loop header
LB: loop body
LE: loop exit
PB: predicated region body
PF: predicated region fallthrough
CT: control target
= control target key end

     0   :  { %11 = vsyncpa [#allocation3], 0  ;;  %s7772_s18 = smov 0   ;;  %s8537_s0 = inlined_call_operand.vmem [shape: s32[16,1], index: 0, kind: input, shape index: {}]   ;;  %s8538_s1 = inlined_call_operand.vmem [shape: f32[16,1], index: 1, kind: input, shape index: {}]   ;;  %s8539_s2 = inlined_call_operand.vmem [shape: f32[2,1,8], index: 2, kind: input, shape index: {}]   ;;  %s8540_s3 = inlined_call_operand.hbm [shape: f32[1040,128], index: 3, kind: input, shape index: {}]   ;;  %s8541_s4 = inlined_call_operand.vmem [shape: f32[2,1,256], index: 4, kind: output, shape index: {0}]   ;;  %s8542_s5 = inlined_call_operand.vmem [shape: f32[2,1,128], index: 5, kind: output, shape index: {1}]  }
   0x1 LB: > { %s7778_s19 = sadd.s32 4294967295, %s7716_s18   ;;  %p6475_p0 = scmp.ge.s32.totalorder %s7716_s18, 1  ;;  %s7716_s18 = sphi %s7772_s18, %s17_s18  }
   0x2   : > { %p173_p1 = scmp.lt.s32.totalorder %s7716_s18, 3  ;;  %s7718_s20 = smov [#allocation2]  }
   0x3   : > { %s185_s21 = sshll.u32 %s7718_s20, 4  ;;  %p8543_p3 = scmp.eq.s32.totalorder %s7778_s19, 0  ;;  %s186_s21 = int_to_ptr.vmem [resolvable:$true] %s185_s21 }
   0x4   : > { %p7782_p2 = pnand %p6475_p0, %p173_p1  ;;  %s7678_s26 = scalar_lea.hbm %s8540_s3, 16640 }
   0x5   : > { %p7679_p6 = scmp.ne.s32.totalorder %s8540_s3, %s7678_s26  ;;  %p7685_p10 = scmp.lt.u32.totalorder %s7678_s26, %s8540_s3 }
   0x6   : > { %s8545_s22 = scalar_select %p7782_p2, 1, 0 }
   0x7   : > { %p7509_p4 = pneg %p7782_p2 }
   0x9   : > { %p7791_p5 = pnand %p8543_p3, %p7509_p4 }
   0xb   : > { %p7680_p7 = pneg %p7791_p5 }
   0xd   : > { %p7681_p8 = pnand %p7680_p7, %p7679_p6 }
   0xf   : > { %p7682_p9 = pneg %p7681_p8 }
  0x11   : > { %p7687_p11 = pnand %p7685_p10, %p7682_p9 }
  0x13   : > { %7690 = shalt.err (!%p7687_p11)
}
  0x14   : > { %s7691_s6 = scalar_lea.vmem %s186_s21, 16640  ;;  %p7699_p1 = scmp.lt.s32.totalorder %s186_s21, %s186_s21 }
  0x15   : > { %p7692_p12 = scmp.ne.s32.totalorder %s186_s21, %s7691_s6  ;;  %p7700_p4 = scmp.lt.s32.totalorder %s7691_s6, %s7691_s6 }
  0x17   : > { %p7694_p13 = pnand %p7692_p12, %p7680_p7  ;;  %p7701_p3 = por %p7700_p4, %p7699_p1 }
  0x19   : > { %p7695_p0 = pneg %p7694_p13 }
  0x1b   : > { %p7702_p2 = pnand %p7701_p3, %p7695_p0 }
  0x1d   : > { %7705 = shalt.err (!%p7702_p2)
}
  0x1e   : > { %s7719_s7 = smov 128   ;;  %s7720_s8 = smov 8  }
  0x1f   : > { %7512 = dma.hbm_to_vmem [thread:$0]  (!%p7791_p5), %s8540_s3, 16640, %s186_s21, [#allocation3], %s7719_s7, %s7719_s7, %s7720_s8  }
  0x20   : > { %p8547_p6 = scmp.ne.s32.totalorder %s8545_s22, 0 }
  0x21   : > { %p8548_p8 = scmp.eq.s32.totalorder (!%p8547_p6), %s7778_s19, 0 }
  0x22   : > { %221 = sbr.rel (%p8547_p6) target bundleno = 10877 (0x2a7d), region = 36 }
  0x29   : > { %7711 = dma.done.wait (%p8548_p8), [#allocation3], 16640   ;;  %p8549_p7 = pmov %p8548_p8 }
  0x2a   : > { %p257_p2 = scmp.lt.s32.totalorder %s7778_s19, 1  ;;  %v7721_v0 = vmov 0   ;;  %v7722_v1 = vmov 0.0|0.0   ;;  %v287_v3 = vld [vmem:[#allocation2] sm:$0xff]  ;;  %v288_v4 = vld [vmem:[#allocation2 + $0x8] sm:$0xff]  ;;  %v289_v5 = vld [vmem:[#allocation2 + $0x10] sm:$0xff]  ;;  %v279_v17 = vlaneseq }
  0x2b   : > { %7713 = vsyncadd (%p8549_p7), [#allocation3], 4294950656  ;;  %7547 = vset.pattern.permute.xlu0 %v7721_v0  ;;  %7339 = vmatprep.subr.bf16.mxu0 %v7722_v1  ;;  %v7340_v7 = vpack.c.bf16 %v288_v4, %v287_v3  ;;  %v290_v8 = vld [vmem:[#allocation2 + $0x18] sm:$0xff]  ;;  %vm7723_vm0 = vmmov 0   ;;  %v7724_v9 = vmov 0.0   ;;  %v291_v11 = vld [vmem:[#allocation2 + $0x20] sm:$0xff] }
  0x2c   : > { %s8551_s19 = smov (!%p257_p2, %s7778_s19), 1  ;;  %7351 = vmatprep.subr.bf16.mxu1 %v7722_v1  ;;  %6855 = vmatprep.mubr.msk.f32.mxu0 %vm7723_vm0, %v7724_v9  ;;  %v7343_v10 = vpack.c.bf16 %v290_v8, %v289_v5  ;;  %v292_v12 = vld [vmem:[#allocation2 + $0x28] sm:$0xff]  ;;  %v293_v14 = vld [vmem:[#allocation2 + $0x30] sm:$0xff]  ;;  %v294_v15 = vld [vmem:[#allocation2 + $0x38] sm:$0xff]  ;;  %v280_v18 = vand.u32 127, %v279_v17  ;;  %vm295_vm1 = vcmask 523264  }
  0x2d   : > { %s6480_s11 = sshll.u32 %s8551_s19, 3  ;;  %6866 = vmatprep.mubr.msk.f32.mxu1 %vm7723_vm0, %v7724_v9  ;;  %7341 = vmatpush3.bf16.msra.mxu0 %v7340_v7  ;;  %v7346_v13 = vpack.c.bf16 %v292_v12, %v291_v11  ;;  %v7349_v16 = vpack.c.bf16 %v294_v15, %v293_v14  ;;  %vm378_vm3 = vcmask 261120   ;;  %v403_v31 = vld [vmem:[#allocation2 + $0x50] sm:$0xff]  ;;  %v404_v32 = vld [vmem:[#allocation2 + $0x58] sm:$0xff]  ;;  %v405_v33 = vld [vmem:[#allocation2 + $0x60] sm:$0xff]  ;;  %s7725_s20 = smov 88  }
  0x2e   : > { %s260_s14 = scalar_lea.vmem %s8537_s0, %s6480_s11  ;;  %s264_s17 = scalar_lea.vmem %s8538_s1, %s6480_s11  ;;  %7342 = vmatprep.subr.bf16.mxu0 %v7722_v1  ;;  %v7352_v34 = vpack.c.bf16 %v404_v32, %v403_v31  ;;  %v406_v35 = vld [vmem:[#allocation2 + $0x68] sm:$0xff]  ;;  %v6485_v41 = vld [vmem:[#allocation2 + $0x40] ss:$0 sm:$0xff]  ;;  %v6487_v46 = vld [vmem:[#allocation2 + $0x70] ss:$0 sm:$0xff]  ;;  %vm494_vm4 = vcmask 64512  }
  0x2f   : > { %v278_v2 = vld [vmem:[%s260_s14] sm:$0xff]  ;;  %v7355_v36 = vpack.c.bf16 %v406_v35, %v405_v33  ;;  %v6486_v43 = vld [vmem:[#allocation2 + $0x48] ss:$0 sm:$0xff]  ;;  %s7726_s21 = smov 96   ;;  %s7727_s22 = smov 104   ;;  %v7899_v59 = vshrl.u32 %v279_v17, 7 }
  0x30   : > { %282 = vperm.xlu0 %7547, %v278_v2   ;;  %v369_v6 = vld [vmem:[%s264_s17] sm:$0xff]  ;;  %7353 = vmatpush3.bf16.msra.mxu1 %v7352_v34  ;;  %s7728_s23 = smov 120   ;;  %s7729_s24 = smov 64   ;;  %v7733_v61 = vmov -1e+30   ;;  %vm1164_vm6 = vcmask 130048  }
  0x31   : > { %7344 = vmatpush3.bf16.msra.mxu0 %v7343_v10  ;;  %7354 = vmatprep.subr.bf16.mxu1 %v7722_v1  ;;  %s7730_s25 = smov 80   ;;  %s7731_s26 = smov 112   ;;  %v488_v60 = vsub.s32 0, %v7899_v59  ;;  %vm1166_vm7 = vcmask 195584   ;;  %vm2635_vm8 = vcmask 257024   ;;  %vm2979_vm9 = vcmask 27648  }
  0x32   : > { %7345 = vmatprep.subr.bf16.mxu0 %v7722_v1  ;;  %s7732_s27 = smov 72   ;;  %s267_s30 = scalar_lea.vmem %s8539_s2, %s8551_s19  ;;  %vm3003_vm10 = vcmask 1043456   ;;  %vm2975_vm11 = vcmask 60416   ;;  %vm2999_vm12 = vcmask 31744   ;;  %vm2579_vm13 = vcmask 785408  }
  0x33   : > { %v275_v58 = vld [vmem:[%s267_s30] sm:$0x1]  ;;  %s7734_s6 = smov 48   ;;  %s7735_s7 = smov 40   ;;  %vm2604_vm14 = vcmp.lt.s32.totalorder %v279_v17, 256 }
  0x34   : > { %372 = vperm.xlu0 %7547, %v369_v6   ;;  %7356 = vmatpush3.bf16.msra.mxu1 %v7355_v36  ;;  %vm276_vm5 = vcmp.gt.f32.partialorder %v275_v58, 0.5  ;;  %s7736_s8 = smov 56   ;;  %s7737_s9 = smov 8  }
  0x35   : > { %7347 = vmatpush3.bf16.msra.mxu0 %v7346_v13  ;;  %6869 = vmatprep.subr.mxu1 %v7724_v9  ;;  %v277_v62 = vsel %vm276_vm5, 0.0, %v7733_v61  ;;  %s7738_s10 = smov 16   ;;  %s7739_s11 = smov 24  }
  0x36   : > { %7348 = vmatprep.subr.bf16.mxu0 %v7722_v1  ;;  %v7902_v63 = vrot.slane %v277_v62, %v488_v60  ;;  %s7740_s12 = smov 32   ;;  %s6482_s13 = sshll.u32 %s8551_s19, 1 }
  0x37   : > { %s271_s16 = scalar_lea.vmem %s8541_s4, %s6482_s13 }
  0x39   : > { %7350 = vmatpush3.bf16.msra.mxu0 %v7349_v16 }
  0x3a   : > { %6879 = vmatprep.subr.mxu0 %v7724_v9 }
  0xaf   : > { %v283_v19 = vpop.permute.xlu0 %282 }
  0xb0   : > { %vm284_vm2 = vcmp.eq.s32.totalorder %v283_v19, %v280_v18 }
  0xb1   : > { %v6483_v20 = vsel %vm284_vm2, 1.0, %v7724_v9 }
  0xb2   : > { %6856 = vmatmul.mubr.msk.f32.vlgmr.msra.gmra.mrb[0].mxu0 %vm295_vm1, %v6483_v20 }
  0xb3   : > { %6881 = vmatprep.mubr.msk.f32.mxu0 %vm7723_vm0, %v7724_v9  ;;  %v373_v21 = vpop.permute.xlu0 %372 }
 0x185   : > { %v365_v22 = vpop.f32.mrb[0].mxu0 }
 0x186   : > { %v7843_v23 = vmul.f32 %v373_v21, %v365_v22  ;;  %v6857_v24 = vpop.f32.mrb[1].mxu0 }
 0x188   : > { %v379_v25 = vsel %vm378_vm3, %v7843_v23, 0.0 }
 0x189   : > { %380 = vadd.xlane.f32.xlu1 %v379_v25 }
 0x216   : > { %v381_v26 = vpop.xlane.xlu1 %380 }
 0x217   : > { %v383_v27 = vmul.f32 0.03125, %v381_v26 }
 0x219   : > { %v384_v28 = vsub.f32 %v7843_v23, %v383_v27 }
 0x21b   : > { %v385_v29 = vmul.f32 %v384_v28, %v384_v28 }
 0x21d   : > { %v386_v30 = vsel %vm378_vm3, %v385_v29, 0.0 }
 0x21e   : > { %387 = vadd.xlane.f32.xlu1 %v386_v30 }
 0x2ab   : > { %v388_v37 = vpop.xlane.xlu1 %387 }
 0x2ac   : > { %v389_v38 = vmul.f32 0.03125, %v388_v37 }
 0x2ae   : > { %v390_v39 = vadd.f32 1e-12, %v389_v38 }
 0x2b0   : > { %7568 = vrsqrt.f32 %v390_v39 }
 0x2ba   : > { %v7569_v40 = vpop.eup %7568 }
 0x2bb   : > { %v392_v42 = vmul.f32 %v7569_v40, %v384_v28 }
 0x2bd   : > { %v397_v44 = vmul.f32 %v6485_v41, %v392_v42 }
 0x2bf   : > { %v402_v45 = vadd.f32 %v6486_v43, %v397_v44 }
 0x2c1   : > { %6867 = vmatmul.mubr.msk.f32.vlgmr.msra.gmra.mrb[0].mxu1 %vm378_vm3, %v402_v45  ;;  %v1168_v45 = vld [vmem:[#allocation2 + $0x78] sm:$0xff] }
 0x2c2   : > { %6871 = vmatprep.mubr.msk.f32.mxu1 %vm7723_vm0, %v7724_v9 }
 0x394   : > { %v481_v47 = vpop.f32.mrb[0].mxu1 }
 0x395   : > { %v7854_v48 = vadd.f32 %v6487_v46, %v481_v47  ;;  %v6868_v49 = vpop.f32.mrb[1].mxu1  ;;  %v1169_v46 = vld [vmem:[#allocation2 + $0x80] sm:$0xff] }
 0x396   : > { %v7358_v47 = vpack.c.bf16 %v1169_v46, %v1168_v45  ;;  %v1170_v49 = vld [vmem:[#allocation2 + $0x88] sm:$0xff]  ;;  %v1371_v46 = vld [vmem:[#allocation2 + $0xf0] sm:$0xff] }
 0x397   : > { %658 = vrot.lane.b32.xlu1 %v7854_v48, %s7725_s20  ;;  %492 = vrot.lane.b32.xlu0 %v7854_v48, %s7726_s21  ;;  %v1370_v45 = vld [vmem:[#allocation2 + $0xe8] sm:$0xff] }
 0x39b   : > { %986 = vrot.lane.b32.xlu1 %v7854_v48, %s7727_s22  ;;  %656 = vrot.lane.b32.xlu0 %v7854_v48, %s7728_s23 }
 0x39f   : > { %578 = vrot.lane.b32.xlu1 %v7854_v48, %s7729_s24  ;;  %823 = vrot.lane.b32.xlu0 %v7854_v48, %s7730_s25 }
 0x3a3   : > { %821 = vrot.lane.b32.xlu0 %v7854_v48, %s7731_s26 }
 0x3a7   : > { %988 = vrot.lane.b32.xlu0 %v7854_v48, %s7732_s27 }
 0x409   : > { %v659_v50 = vpop.permute.xlu1 %658  ;;  %v493_v51 = vpop.permute.xlu0 %492 }
 0x40a   : > { %6870 = vmatpush3.xpose.msk.msra.mxu1 %vm494_vm4, %v493_v51  ;;  %6880 = vmatpush3.xpose.msk.msra.mxu0 %vm494_vm4, %v659_v50  ;;  %v1171_v50 = vld [vmem:[#allocation2 + $0x90] sm:$0xff] }
 0x40b   : > { %6889 = vmatprep.subr.mxu0 %v7724_v9  ;;  %6874 = vmatprep.subr.mxu1 %v7724_v9 }
 0x40d   : > { %v987_v52 = vpop.permute.xlu1 %986  ;;  %6872 = vmatmul.mubr.msk.f32.vlgmr.msra.gmra.mrb[2].mxu1 %vm494_vm4, %v7854_v48  ;;  %v657_v53 = vpop.permute.xlu0 %656 }
 0x40e   : > { %6882 = vmatmul.mubr.msk.f32.vlgmr.msra.gmra.mrb[2].mxu0 %vm494_vm4, %v657_v53  ;;  %6876 = vmatprep.mubr.msk.f32.mxu1 %vm7723_vm0, %v7724_v9 }
 0x40f   : > { %6891 = vmatprep.mubr.msk.f32.mxu0 %vm7723_vm0, %v7724_v9 }
 0x411   : > { %v579_v54 = vpop.permute.xlu1 %578  ;;  %v824_v55 = vpop.permute.xlu0 %823 }
 0x412   : > { %6875 = vmatpush3.msra.mxu1 %v579_v54  ;;  %6890 = vmatpush3.xpose.msk.msra.mxu0 %vm494_vm4, %v824_v55 }
 0x413   : > { %6899 = vmatprep.subr.mxu0 %v7724_v9  ;;  %6884 = vmatprep.subr.mxu1 %v7724_v9 }
 0x415   : > { %v822_v56 = vpop.permute.xlu0 %821 }
 0x416   : > { %6892 = vmatmul.mubr.msk.f32.vlgmr.msra.gmra.mrb[4].mxu0 %vm494_vm4, %v822_v56 }
 0x417   : > { %6901 = vmatprep.mubr.msk.f32.mxu0 %vm7723_vm0, %v7724_v9 }
 0x419   : > { %v989_v57 = vpop.permute.xlu0 %988 }
 0x41a   : > { %6900 = vmatpush3.xpose.msk.msra.mxu0 %vm494_vm4, %v989_v57 }
 0x41b   : > { %7357 = vmatprep.subr.bf16.mxu0 %v7722_v1 }
 0x41d   : > { %6902 = vmatmul.mubr.msk.f32.vlgmr.msra.gmra.mrb[6].mxu0 %vm494_vm4, %v987_v52  ;;  %v7361_v52 = vpack.c.bf16 %v1171_v50, %v1170_v49  ;;  %v1373_v49 = vld [vmem:[#allocation2 + $0x100] sm:$0xff] }
 0x41e   : > { %6917 = vmatprep.mubr.msk.f32.mxu0 %vm7723_vm0, %v7724_v9  ;;  %7359 = vmatpush3.bf16.msra.mxu0 %v7358_v47  ;;  %v7373_v47 = vpack.c.bf16 %v1371_v46, %v1370_v45 }
 0x41f   : > { %7360 = vmatprep.subr.bf16.mxu0 %v7722_v1 }
 0x422   : > { %7362 = vmatpush3.bf16.msra.mxu0 %v7361_v52  ;;  %v1375_v52 = vld [vmem:[#allocation2 + $0x110] sm:$0xff] }
 0x423   : > { %7369 = vmatprep.subr.bf16.mxu0 %v7722_v1 }
 0x4e0   : > { %v565_v0 = vpop.f32.mrb[2].mxu1 }
 0x4e1   : > { %v566_v2 = vadd.f32 %v565_v0, %v7902_v63  ;;  %v6873_v3 = vpop.f32.mrb[3].mxu1  ;;  %v730_v4 = vpop.f32.mrb[2].mxu0 }
 0x4e2   : > { %v731_v5 = vadd.f32 %v730_v4, %v7902_v63  ;;  %v6883_v6 = vpop.f32.mrb[3].mxu0 }
 0x4e3   : > { %v569_v7 = vsel %vm494_vm4, %v566_v2, -inf }
 0x4e4   : > { %570 = vmax.xlane.f32.xlu0 %v569_v7  ;;  %v734_v8 = vsel %vm494_vm4, %v731_v5, -inf }
 0x4e5   : > { %735 = vmax.xlane.f32.xlu1 %v734_v8 }
 0x4e9   : > { %v895_v10 = vpop.f32.mrb[4].mxu0 }
 0x4ea   : > { %v896_v11 = vadd.f32 %v895_v10, %v7902_v63  ;;  %v6893_v12 = vpop.f32.mrb[5].mxu0 }
 0x4ec   : > { %v899_v13 = vsel %vm494_vm4, %v896_v11, -inf }
 0x4ed   : > { %900 = vmax.xlane.f32.xlu0 %v899_v13 }
 0x4f0   : > { %v1060_v14 = vpop.f32.mrb[6].mxu0 }
 0x4f1   : > { %v1061_v15 = vadd.f32 %v1060_v14, %v7902_v63  ;;  %v6903_v16 = vpop.f32.mrb[7].mxu0 }
 0x4f2   : > { %v6502_v16 = vld [vmem:[#allocation2 + $0x98] ss:$0 sm:$0xff] }
 0x4f3   : > { %v1064_v18 = vsel %vm494_vm4, %v1061_v15, -inf }
 0x4f4   : > { %1065 = vmax.xlane.f32.xlu0 %v1064_v18 }
 0x4f6   : > { %908 = vrot.lane.b32.xlu1 %v7854_v48, %s7734_s6 }
 0x4fa   : > { %1073 = vrot.lane.b32.xlu1 %v7854_v48, %s7735_s7 }
 0x50a   : > { %743 = vrot.lane.b32.xlu0 %v7854_v48, %s7736_s8 }
 0x571   : > { %v571_v19 = vpop.xlane.xlu0 %570 }
 0x572   : > { %v572_v20 = vsub.f32 %v566_v2, %v571_v19  ;;  %v736_v21 = vpop.xlane.xlu1 %735 }
 0x573   : > { %v737_v22 = vsub.f32 %v731_v5, %v736_v21 }
 0x574   : > { %v573_v24 = vmul.f32 1.442695, %v572_v20 }
 0x575   : > { %v738_v25 = vmul.f32 1.442695, %v737_v22 }
 0x576   : > { %7570 = vpow2.f32 %v573_v24  ;;  %v909_v35 = vpop.permute.xlu1 %908 }
 0x577   : > { %7572 = vpow2.f32 %v738_v25 }
 0x57a   : > { %v901_v26 = vpop.xlane.xlu0 %900  ;;  %v1074_v39 = vpop.permute.xlu1 %1073 }
 0x57b   : > { %v902_v27 = vsub.f32 %v896_v11, %v901_v26 }
 0x57d   : > { %v903_v28 = vmul.f32 1.442695, %v902_v27 }
 0x57f   : > { %7574 = vpow2.f32 %v903_v28  ;;  %v1277_v28 = vld [vmem:[#allocation2 + $0xb0] sm:$0xff] }
 0x580   : > { %v7571_v29 = vpop.eup %7570 }
 0x581   : > { %v7573_v30 = vpop.eup %7572  ;;  %6877 = vmatmul.mubr.msk.f32.vlgmr.msra.gmra.mrb[4].mxu1 %vm494_vm4, %v7571_v29  ;;  %v1066_v31 = vpop.xlane.xlu0 %1065  ;;  %v575_v42 = vsel %vm494_vm4, %v7571_v29, 0.0  ;;  %v1278_v29 = vld [vmem:[#allocation2 + $0xb8] sm:$0xff] }
 0x582   : > { %v1067_v32 = vsub.f32 %v1061_v15, %v1066_v31  ;;  %v740_v33 = vsel %vm494_vm4, %v7573_v30, 0.0  ;;  %6886 = vmatprep.mubr.msk.f32.mxu1 %vm7723_vm0, %v7724_v9  ;;  %v1280_v31 = vld [vmem:[#allocation2 + $0xc8] sm:$0xff] }
 0x583   : > { %741 = vadd.xlane.f32.xlu0 %v740_v33 }
 0x584   : > { %v1068_v34 = vmul.f32 1.442695, %v1067_v32 }
 0x585   : > { %v744_v36 = vpop.permute.xlu0 %743 }
 0x586   : > { %7576 = vpow2.f32 %v1068_v34  ;;  %6885 = vmatpush3.msra.mxu1 %v744_v36 }
 0x587   : > { %6887 = vmatmul.mubr.msk.f32.vlgmr.msra.gmra.mrb[6].mxu1 %vm494_vm4, %v7573_v30  ;;  %6894 = vmatprep.subr.mxu1 %v7724_v9  ;;  %v7364_v30 = vpack.c.bf16 %v1278_v29, %v1277_v28 }
 0x588   : > { %6895 = vmatpush3.msra.mxu1 %v909_v35  ;;  %6896 = vmatprep.mubr.msk.f32.mxu1 %vm7723_vm0, %v7724_v9 }
 0x589   : > { %v7575_v37 = vpop.eup %7574  ;;  %6904 = vmatprep.subr.mxu1 %v7724_v9 }
 0x58a   : > { %v905_v38 = vsel %vm494_vm4, %v7575_v37, 0.0 }
 0x58b   : > { %906 = vadd.xlane.f32.xlu1 %v905_v38  ;;  %6897 = vmatmul.mubr.msk.f32.vlgmr.msra.gmra.mrb[8].mxu1 %vm494_vm4, %v7575_v37  ;;  %v6503_v37 = vld [vmem:[#allocation2 + $0xa0] ss:$0 sm:$0xff] }
 0x58c   : > { %6905 = vmatpush3.msra.mxu1 %v1074_v39  ;;  %6906 = vmatprep.mubr.msk.f32.mxu1 %vm7723_vm0, %v7724_v9  ;;  %v6504_v39 = vld [vmem:[#allocation2 + $0xa8] ss:$0 sm:$0xff] }
 0x58d   : > { %7363 = vmatprep.subr.bf16.mxu1 %v7722_v1 }
 0x590   : > { %v7577_v40 = vpop.eup %7576 }
 0x591   : > { %6907 = vmatmul.mubr.msk.f32.vlgmr.msra.gmra.mrb[10].mxu1 %vm494_vm4, %v7577_v40  ;;  %v1070_v41 = vsel %vm494_vm4, %v7577_v40, 0.0 }
 0x592   : > { %1071 = vadd.xlane.f32.xlu0 %v1070_v41  ;;  %6928 = vmatprep.mubr.msk.f32.mxu1 %vm7723_vm0, %v7724_v9 }
 0x593   : > { %7365 = vmatpush3.bf16.msra.mxu1 %v7364_v30  ;;  %v6509_v30 = vld [vmem:[#allocation2 + $0x120] ss:$0 sm:$0xff] }
 0x594   : > { %7366 = vmatprep.subr.bf16.mxu1 %v7722_v1 }
 0x596   : > { %576 = vadd.xlane.f32.xlu0 %v575_v42  ;;  %v1368_v42 = vld [vmem:[#allocation2 + $0xd8] sm:$0xff] }
 0x610   : > { %v742_v43 = vpop.xlane.xlu0 %741 }
 0x611   : > { %7578 = vrcp.f32 %v742_v43  ;;  %v1369_v43 = vld [vmem:[#allocation2 + $0xe0] sm:$0xff] }
 0x618   : > { %v907_v44 = vpop.xlane.xlu1 %906 }
 0x619   : > { %7580 = vrcp.f32 %v907_v44  ;;  %v7370_v44 = vpack.c.bf16 %v1369_v43, %v1368_v42 }
 0x61b   : > { %v7579_v54 = vpop.eup %7578 }
 0x61f   : > { %v1072_v53 = vpop.xlane.xlu0 %1071 }
 0x620   : > { %7582 = vrcp.f32 %v1072_v53 }
 0x623   : > { %v7581_v58 = vpop.eup %7580  ;;  %v577_v5 = vpop.xlane.xlu0 %576 }
 0x624   : > { %7584 = vrcp.f32 %v577_v5 }
 0x62a   : > { %v7583_v0 = vpop.eup %7582 }
 0x62e   : > { %v7585_v6 = vpop.eup %7584 }
 0x654   : > { %v650_v48 = vpop.f32.mrb[4].mxu1 }
 0x655   : > { %v6878_v51 = vpop.f32.mrb[5].mxu1  ;;  %v655_v8 = vmul.f32 %v7585_v6, %v650_v48  ;;  %v1372_v48 = vld [vmem:[#allocation2 + $0xf8] sm:$0xff] }
 0x656   : > { %v7376_v50 = vpack.c.bf16 %v1373_v49, %v1372_v48  ;;  %v1374_v51 = vld [vmem:[#allocation2 + $0x108] sm:$0xff] }
 0x657   : > { %v7379_v53 = vpack.c.bf16 %v1375_v52, %v1374_v51 }
 0x65a   : > { %v815_v55 = vpop.f32.mrb[6].mxu1 }
 0x65b   : > { %v820_v56 = vmul.f32 %v7579_v54, %v815_v55  ;;  %v6888_v57 = vpop.f32.mrb[7].mxu1  ;;  %v6505_v54 = vld [vmem:[#allocation2 + $0xd0] ss:$0 sm:$0xff] }
 0x65d   : > { %1152 = vrot.lane.b32.xlu1 %v820_v56, %s7737_s9 }
 0x65e   : > { %v980_v60 = vpop.f32.mrb[8].mxu1 }
 0x65f   : > { %v985_v61 = vmul.f32 %v7581_v58, %v980_v60  ;;  %v6898_v62 = vpop.f32.mrb[9].mxu1 }
 0x661   : > { %1156 = vrot.lane.b32.xlu0 %v985_v61, %s7738_s10 }
 0x664   : > { %v1145_v2 = vpop.f32.mrb[10].mxu1 }
 0x665   : > { %v1150_v3 = vmul.f32 %v7583_v0, %v1145_v2  ;;  %v6908_v4 = vpop.f32.mrb[11].mxu1 }
 0x667   : > { %1160 = vrot.lane.b32.xlu1 %v1150_v3, %s7739_s11 }
 0x6cf   : > { %v1153_v7 = vpop.permute.xlu1 %1152 }
 0x6d0   : > { %v1163_v11 = vsel %vm494_vm4, %v655_v8, %v1153_v7  ;;  %v6508_v7 = vld [vmem:[#allocation2 + $0x118] ss:$0 sm:$0xff] }
 0x6d3   : > { %v1157_v10 = vpop.permute.xlu0 %1156 }
 0x6d4   : > { %v1165_v12 = vsel %vm1164_vm6, %v1163_v11, %v1157_v10 }
 0x6d9   : > { %v1161_v13 = vpop.permute.xlu1 %1160 }
 0x6da   : > { %v1167_v14 = vsel %vm1166_vm7, %v1165_v12, %v1161_v13 }
 0x6db   : > { %6918 = vmatmul.mubr.msk.f32.vlgmr.msra.gmra.mrb[8].mxu0 %vm378_vm3, %v1167_v14 }
 0x6dc   : > { %6947 = vmatprep.mubr.msk.f32.mxu0 %vm7723_vm0, %v7724_v9  ;;  %7371 = vmatpush3.bf16.msra.mxu0 %v7370_v44 }
 0x6dd   : > { %7372 = vmatprep.subr.bf16.mxu0 %v7722_v1 }
 0x6e0   : > { %7374 = vmatpush3.bf16.msra.mxu0 %v7373_v47 }
 0x6e1   : > { %7375 = vmatprep.subr.bf16.mxu0 %v7722_v1 }
 0x6e4   : > { %7377 = vmatpush3.bf16.msra.mxu0 %v7376_v50 }
 0x6e5   : > { %7378 = vmatprep.subr.bf16.mxu0 %v7722_v1 }
 0x6e8   : > { %7380 = vmatpush3.bf16.msra.mxu0 %v7379_v53 }
 0x6e9   : > { %6971 = vmatprep.subr.mxu0 %v7724_v9 }
 0x7ae   : > { %v1241_v15 = vpop.f32.mrb[8].mxu0 }
 0x7af   : > { %v1245_v18 = vadd.f32 %v1241_v15, %v7843_v23  ;;  %v6919_v19 = vpop.f32.mrb[9].mxu0  ;;  %v1279_v23 = vld [vmem:[#allocation2 + $0xc0] sm:$0xff] }
 0x7b0   : > { %v7367_v32 = vpack.c.bf16 %v1280_v31, %v1279_v23  ;;  %v1481_v19 = vld [vmem:[#allocation2 + $0x130] sm:$0xff]  ;;  %v6510_v31 = vld [vmem:[#allocation2 + $0x128] ss:$0 sm:$0xff] }
 0x7b1   : > { %v7949_v20 = vadd.f32 %v6502_v16, %v1245_v18 }
 0x7b2   : > { %7368 = vmatpush3.bf16.msra.mxu1 %v7367_v32 }
 0x7b3   : > { %v1254_v21 = vsel %vm378_vm3, %v7949_v20, 0.0  ;;  %7381 = vmatprep.subr.bf16.mxu1 %v7722_v1 }
 0x7b4   : > { %1255 = vadd.xlane.f32.xlu1 %v1254_v21  ;;  %v1482_v21 = vld [vmem:[#allocation2 + $0x138] sm:$0xff] }
 0x841   : > { %v1256_v22 = vpop.xlane.xlu1 %1255 }
 0x842   : > { %v1257_v24 = vmul.f32 0.03125, %v1256_v22  ;;  %v7382_v22 = vpack.c.bf16 %v1482_v21, %v1481_v19 }
 0x844   : > { %v1258_v25 = vsub.f32 %v7949_v20, %v1257_v24  ;;  %v1484_v24 = vld [vmem:[#allocation2 + $0x148] sm:$0xff] }
 0x846   : > { %v1259_v26 = vmul.f32 %v1258_v25, %v1258_v25 }
 0x848   : > { %v1260_v27 = vsel %vm378_vm3, %v1259_v26, 0.0 }
 0x849   : > { %1261 = vadd.xlane.f32.xlu0 %v1260_v27 }
 0x8d6   : > { %v1262_v33 = vpop.xlane.xlu0 %1261 }
 0x8d7   : > { %v1263_v34 = vmul.f32 0.03125, %v1262_v33 }
 0x8d9   : > { %v1264_v35 = vadd.f32 1e-12, %v1263_v34  ;;  %v6511_v34 = vld [vmem:[#allocation2 + $0x150] ss:$0 sm:$0xff] }
 0x8db   : > { %7586 = vrsqrt.f32 %v1264_v35 }
 0x8e5   : > { %v7587_v36 = vpop.eup %7586 }
 0x8e6   : > { %v1266_v38 = vmul.f32 %v7587_v36, %v1258_v25 }
 0x8e8   : > { %v1271_v40 = vmul.f32 %v6503_v37, %v1266_v38 }
 0x8ea   : > { %v1276_v41 = vadd.f32 %v6504_v39, %v1271_v40 }
 0x8ec   : > { %6929 = vmatmul.mubr.msk.f32.vlgmr.msra.gmra.mrb[12].mxu1 %vm378_vm3, %v1276_v41 }
 0x8ed   : > { %6958 = vmatprep.mubr.msk.f32.mxu1 %vm7723_vm0, %v7724_v9  ;;  %7383 = vmatpush3.bf16.msra.mxu1 %v7382_v22 }
 0x8ee   : > { %7384 = vmatprep.subr.bf16.mxu1 %v7722_v1 }
 0x9bf   : > { %v1355_v55 = vpop.f32.mrb[12].mxu1 }
 0x9c0   : > { %v1356_v56 = vadd.f32 %v6505_v54, %v1355_v55  ;;  %v6930_v57 = vpop.f32.mrb[13].mxu1 }
 0x9c2   : > { %v1359_v58 = vmul.f32 %v1356_v56, %v1356_v56 }
 0x9c4   : > { %v1360_v60 = vmul.f32 %v1359_v58, %v1356_v56 }
 0x9c6   : > { %v1361_v61 = vmul.f32 0.044715, %v1360_v60 }
 0x9c8   : > { %v1362_v62 = vadd.f32 %v1361_v61, %v1356_v56 }
 0x9ca   : > { %v1363_v0 = vmul.f32 0.7978846, %v1362_v62 }
 0x9cc   : > { %7588 = vtanh.f32 %v1363_v0 }
 0x9d6   : > { %v7589_v2 = vpop.eup %7588 }
 0x9d7   : > { %v1365_v3 = vadd.f32 1.0, %v7589_v2 }
 0x9d9   : > { %v1366_v4 = vmul.f32 0.5, %v1365_v3 }
 0x9db   : > { %v1367_v5 = vmul.f32 %v1366_v4, %v1356_v56 }
 0x9dd   : > { %6948 = vmatmul.mubr.msk.f32.vlgmr.msra.gmra.mrb[10].mxu0 %vm295_vm1, %v1367_v5 }
 0x9de   : > { %6973 = vmatprep.mubr.msk.f32.mxu0 %vm7723_vm0, %v7724_v9 }
 0xab0   : > { %v1445_v6 = vpop.f32.mrb[10].mxu0 }
 0xab1   : > { %v1449_v8 = vadd.f32 %v1445_v6, %v7949_v20  ;;  %v6949_v10 = vpop.f32.mrb[11].mxu0  ;;  %v1483_v20 = vld [vmem:[#allocation2 + $0x140] sm:$0xff] }
 0xab2   : > { %v7385_v25 = vpack.c.bf16 %v1484_v24, %v1483_v20 }
 0xab3   : > { %v7968_v11 = vadd.f32 %v6508_v7, %v1449_v8 }
 0xab4   : > { %7386 = vmatpush3.bf16.msra.mxu1 %v7385_v25 }
 0xab5   : > { %v1458_v12 = vsel %vm378_vm3, %v7968_v11, 0.0  ;;  %6961 = vmatprep.subr.mxu1 %v7724_v9 }
 0xab6   : > { %1459 = vadd.xlane.f32.xlu0 %v1458_v12 }
 0xb43   : > { %v1460_v13 = vpop.xlane.xlu0 %1459 }
 0xb44   : > { %v1461_v14 = vmul.f32 0.03125, %v1460_v13 }
 0xb46   : > { %v1462_v15 = vsub.f32 %v7968_v11, %v1461_v14 }
 0xb48   : > { %v1463_v16 = vmul.f32 %v1462_v15, %v1462_v15 }
 0xb4a   : > { %v1464_v18 = vsel %vm378_vm3, %v1463_v16, 0.0 }
 0xb4b   : > { %1465 = vadd.xlane.f32.xlu1 %v1464_v18 }
 0xbd8   : > { %v1466_v26 = vpop.xlane.xlu1 %1465 }
 0xbd9   : > { %v1467_v27 = vmul.f32 0.03125, %v1466_v26 }
 0xbdb   : > { %v1468_v28 = vadd.f32 1e-12, %v1467_v27 }
 0xbdd   : > { %7590 = vrsqrt.f32 %v1468_v28 }
 0xbe7   : > { %v7591_v29 = vpop.eup %7590 }
 0xbe8   : > { %v1470_v23 = vmul.f32 %v7591_v29, %v1462_v15  ;;  %v2237_v29 = vld [vmem:[#allocation2 + $0x158] sm:$0xff] }
 0xbea   : > { %v1475_v32 = vmul.f32 %v6509_v30, %v1470_v23  ;;  %v2238_v30 = vld [vmem:[#allocation2 + $0x160] sm:$0xff] }
 0xbec   : > { %v1480_v33 = vadd.f32 %v6510_v31, %v1475_v32  ;;  %v7388_v31 = vpack.c.bf16 %v2238_v30, %v2237_v29  ;;  %v2239_v32 = vld [vmem:[#allocation2 + $0x168] sm:$0xff] }
 0xbed   : > { %v2439_v30 = vld [vmem:[#allocation2 + $0x1c8] sm:$0xff] }
 0xbee   : > { %6959 = vmatmul.mubr.msk.f32.vlgmr.msra.gmra.mrb[14].mxu1 %vm378_vm3, %v1480_v33  ;;  %v2240_v33 = vld [vmem:[#allocation2 + $0x170] sm:$0xff] }
 0xbef   : > { %6963 = vmatprep.mubr.msk.f32.mxu1 %vm7723_vm0, %v7724_v9 }
 0xcc1   : > { %v1559_v35 = vpop.f32.mrb[14].mxu1 }
 0xcc2   : > { %v1560_v36 = vadd.f32 %v6511_v34, %v1559_v35  ;;  %v6960_v37 = vpop.f32.mrb[15].mxu1  ;;  %v7391_v35 = vpack.c.bf16 %v2240_v33, %v2239_v32  ;;  %v2441_v32 = vld [vmem:[#allocation2 + $0x1d8] sm:$0xff]  ;;  %v2442_v33 = vld [vmem:[#allocation2 + $0x1e0] sm:$0xff] }
 0xcc4   : > { %1729 = vrot.lane.b32.xlu1 %v1560_v36, %s7725_s20  ;;  %1564 = vrot.lane.b32.xlu0 %v1560_v36, %s7726_s21 }
 0xcc8   : > { %1727 = vrot.lane.b32.xlu1 %v1560_v36, %s7728_s23  ;;  %1894 = vrot.lane.b32.xlu0 %v1560_v36, %s7730_s25 }
 0xccc   : > { %1892 = vrot.lane.b32.xlu1 %v1560_v36, %s7731_s26  ;;  %2059 = vrot.lane.b32.xlu0 %v1560_v36, %s7732_s27 }
 0xcd0   : > { %2057 = vrot.lane.b32.xlu1 %v1560_v36, %s7727_s22 }
 0xcd4   : > { %1649 = vrot.lane.b32.xlu1 %v1560_v36, %s7729_s24 }
 0xd36   : > { %v1730_v38 = vpop.permute.xlu1 %1729  ;;  %v1565_v39 = vpop.permute.xlu0 %1564 }
 0xd37   : > { %6962 = vmatpush3.xpose.msk.msra.mxu1 %vm494_vm4, %v1565_v39  ;;  %6972 = vmatpush3.xpose.msk.msra.mxu0 %vm494_vm4, %v1730_v38 }
 0xd38   : > { %6981 = vmatprep.subr.mxu0 %v7724_v9  ;;  %6966 = vmatprep.subr.mxu1 %v7724_v9 }
 0xd3a   : > { %v1728_v40 = vpop.permute.xlu1 %1727  ;;  %6964 = vmatmul.mubr.msk.f32.vlgmr.msra.gmra.mrb[16].mxu1 %vm494_vm4, %v1560_v36  ;;  %v1895_v41 = vpop.permute.xlu0 %1894 }
 0xd3b   : > { %6974 = vmatmul.mubr.msk.f32.vlgmr.msra.gmra.mrb[12].mxu0 %vm494_vm4, %v1728_v40  ;;  %6968 = vmatprep.mubr.msk.f32.mxu1 %vm7723_vm0, %v7724_v9 }
 0xd3c   : > { %6982 = vmatpush3.xpose.msk.msra.mxu0 %vm494_vm4, %v1895_v41  ;;  %6983 = vmatprep.mubr.msk.f32.mxu0 %vm7723_vm0, %v7724_v9 }
 0xd3d   : > { %6991 = vmatprep.subr.mxu0 %v7724_v9 }
 0xd3e   : > { %v1893_v42 = vpop.permute.xlu1 %1892  ;;  %v2060_v43 = vpop.permute.xlu0 %2059 }
 0xd3f   : > { %6984 = vmatmul.mubr.msk.f32.vlgmr.msra.gmra.mrb[14].mxu0 %vm494_vm4, %v1893_v42 }
 0xd40   : > { %6992 = vmatpush3.xpose.msk.msra.mxu0 %vm494_vm4, %v2060_v43  ;;  %6993 = vmatprep.mubr.msk.f32.mxu0 %vm7723_vm0, %v7724_v9 }
 0xd41   : > { %7387 = vmatprep.subr.bf16.mxu0 %v7722_v1 }
 0xd42   : > { %v2058_v44 = vpop.permute.xlu1 %2057 }
 0xd43   : > { %6994 = vmatmul.mubr.msk.f32.vlgmr.msra.gmra.mrb[16].mxu0 %vm494_vm4, %v2058_v44 }
 0xd44   : > { %7009 = vmatprep.mubr.msk.f32.mxu0 %vm7723_vm0, %v7724_v9  ;;  %7389 = vmatpush3.bf16.msra.mxu0 %v7388_v31 }
 0xd45   : > { %7390 = vmatprep.subr.bf16.mxu0 %v7722_v1 }
 0xd46   : > { %v1650_v45 = vpop.permute.xlu1 %1649 }
 0xd47   : > { %6967 = vmatpush3.msra.mxu1 %v1650_v45 }
 0xd48   : > { %6976 = vmatprep.subr.mxu1 %v7724_v9  ;;  %7392 = vmatpush3.bf16.msra.mxu0 %v7391_v35  ;;  %v2443_v35 = vld [vmem:[#allocation2 + $0x1e8] sm:$0xff] }
 0xd49   : > { %7399 = vmatprep.subr.bf16.mxu0 %v7722_v1 }
 0xe0d   : > { %v1636_v46 = vpop.f32.mrb[16].mxu1 }
 0xe0e   : > { %v1637_v47 = vadd.f32 %v1636_v46, %v7902_v63  ;;  %v6965_v48 = vpop.f32.mrb[17].mxu1  ;;  %v1801_v49 = vpop.f32.mrb[12].mxu0 }
 0xe0f   : > { %v1802_v50 = vadd.f32 %v1801_v49, %v7902_v63  ;;  %v6975_v51 = vpop.f32.mrb[13].mxu0 }
 0xe10   : > { %v1640_v52 = vsel %vm494_vm4, %v1637_v47, -inf }
 0xe11   : > { %1641 = vmax.xlane.f32.xlu0 %v1640_v52  ;;  %v1805_v53 = vsel %vm494_vm4, %v1802_v50, -inf }
 0xe12   : > { %1806 = vmax.xlane.f32.xlu1 %v1805_v53  ;;  %v1966_v54 = vpop.f32.mrb[14].mxu0 }
 0xe13   : > { %v1967_v55 = vadd.f32 %v1966_v54, %v7902_v63  ;;  %v6985_v56 = vpop.f32.mrb[15].mxu0 }
 0xe15   : > { %v1970_v57 = vsel %vm494_vm4, %v1967_v55, -inf }
 0xe16   : > { %1971 = vmax.xlane.f32.xlu0 %v1970_v57  ;;  %v2131_v58 = vpop.f32.mrb[16].mxu0 }
 0xe17   : > { %v2132_v60 = vadd.f32 %v2131_v58, %v7902_v63  ;;  %v6995_v61 = vpop.f32.mrb[17].mxu0 }
 0xe18   : > { %v6526_v61 = vld [vmem:[#allocation2 + $0x178] ss:$0 sm:$0xff] }
 0xe19   : > { %v2135_v62 = vsel %vm494_vm4, %v2132_v60, -inf }
 0xe1a   : > { %2136 = vmax.xlane.f32.xlu0 %v2135_v62 }
 0xe23   : > { %1979 = vrot.lane.b32.xlu1 %v1560_v36, %s7734_s6 }
 0xe27   : > { %2144 = vrot.lane.b32.xlu1 %v1560_v36, %s7735_s7 }
 0xe30   : > { %1814 = vrot.lane.b32.xlu0 %v1560_v36, %s7736_s8 }
 0xe9e   : > { %v1642_v0 = vpop.xlane.xlu0 %1641 }
 0xe9f   : > { %v1643_v2 = vsub.f32 %v1637_v47, %v1642_v0  ;;  %v1807_v3 = vpop.xlane.xlu1 %1806 }
 0xea0   : > { %v1808_v4 = vsub.f32 %v1802_v50, %v1807_v3 }
 0xea1   : > { %v1644_v5 = vmul.f32 1.442695, %v1643_v2 }
 0xea2   : > { %v1809_v6 = vmul.f32 1.442695, %v1808_v4 }
 0xea3   : > { %7592 = vpow2.f32 %v1644_v5  ;;  %v1972_v7 = vpop.xlane.xlu0 %1971  ;;  %v1980_v21 = vpop.permute.xlu1 %1979 }
 0xea4   : > { %7594 = vpow2.f32 %v1809_v6  ;;  %v1973_v8 = vsub.f32 %v1967_v55, %v1972_v7 }
 0xea6   : > { %v1974_v10 = vmul.f32 1.442695, %v1973_v8 }
 0xea7   : > { %v2137_v12 = vpop.xlane.xlu0 %2136  ;;  %v2145_v25 = vpop.permute.xlu1 %2144 }
 0xea8   : > { %7596 = vpow2.f32 %v1974_v10  ;;  %v2138_v13 = vsub.f32 %v2132_v60, %v2137_v12  ;;  %v2346_v10 = vld [vmem:[#allocation2 + $0x190] sm:$0xff]  ;;  %v2347_v12 = vld [vmem:[#allocation2 + $0x198] sm:$0xff] }
 0xeaa   : > { %v2139_v14 = vmul.f32 1.442695, %v2138_v13  ;;  %v7394_v13 = vpack.c.bf16 %v2347_v12, %v2346_v10  ;;  %v2660_v10 = vld [vmem:[#allocation2 + $0x240] sm:$0xff]  ;;  %v2661_v12 = vld [vmem:[#allocation2 + $0x248] sm:$0xff] }
 0xeab   : > { %v1815_v18 = vpop.permute.xlu0 %1814 }
 0xeac   : > { %7598 = vpow2.f32 %v2139_v14  ;;  %v2349_v14 = vld [vmem:[#allocation2 + $0x1a8] sm:$0xff] }
 0xead   : > { %v7593_v15 = vpop.eup %7592 }
 0xeae   : > { %v7595_v16 = vpop.eup %7594  ;;  %6969 = vmatmul.mubr.msk.f32.vlgmr.msra.gmra.mrb[18].mxu1 %vm494_vm4, %v7593_v15  ;;  %v1646_v27 = vsel %vm494_vm4, %v7593_v15, 0.0 }
 0xeaf   : > { %6977 = vmatpush3.msra.mxu1 %v1815_v18  ;;  %v1811_v19 = vsel %vm494_vm4, %v7595_v16, 0.0  ;;  %6978 = vmatprep.mubr.msk.f32.mxu1 %vm7723_vm0, %v7724_v9 }
 0xeb0   : > { %1812 = vadd.xlane.f32.xlu0 %v1811_v19  ;;  %6986 = vmatprep.subr.mxu1 %v7724_v9 }
 0xeb2   : > { %v7597_v22 = vpop.eup %7596  ;;  %6979 = vmatmul.mubr.msk.f32.vlgmr.msra.gmra.mrb[20].mxu1 %vm494_vm4, %v7595_v16 }
 0xeb3   : > { %6987 = vmatpush3.msra.mxu1 %v1980_v21  ;;  %v1976_v20 = vsel %vm494_vm4, %v7597_v22, 0.0  ;;  %6988 = vmatprep.mubr.msk.f32.mxu1 %vm7723_vm0, %v7724_v9 }
 0xeb4   : > { %1977 = vadd.xlane.f32.xlu1 %v1976_v20  ;;  %6996 = vmatprep.subr.mxu1 %v7724_v9 }
 0xeb6   : > { %v7599_v24 = vpop.eup %7598  ;;  %6989 = vmatmul.mubr.msk.f32.vlgmr.msra.gmra.mrb[22].mxu1 %vm494_vm4, %v7597_v22  ;;  %v6527_v22 = vld [vmem:[#allocation2 + $0x180] ss:$0 sm:$0xff] }
 0xeb7   : > { %6997 = vmatpush3.msra.mxu1 %v2145_v25  ;;  %v2141_v26 = vsel %vm494_vm4, %v7599_v24, 0.0  ;;  %6998 = vmatprep.mubr.msk.f32.mxu1 %vm7723_vm0, %v7724_v9 }
 0xeb8   : > { %2142 = vadd.xlane.f32.xlu0 %v2141_v26  ;;  %7393 = vmatprep.subr.bf16.mxu1 %v7722_v1 }
 0xeba   : > { %6999 = vmatmul.mubr.msk.f32.vlgmr.msra.gmra.mrb[24].mxu1 %vm494_vm4, %v7599_v24  ;;  %v6528_v24 = vld [vmem:[#allocation2 + $0x188] ss:$0 sm:$0xff] }
 0xebb   : > { %7020 = vmatprep.mubr.msk.f32.mxu1 %vm7723_vm0, %v7724_v9  ;;  %7395 = vmatpush3.bf16.msra.mxu1 %v7394_v13 }
 0xebc   : > { %1647 = vadd.xlane.f32.xlu0 %v1646_v27  ;;  %7396 = vmatprep.subr.bf16.mxu1 %v7722_v1  ;;  %v2437_v27 = vld [vmem:[#allocation2 + $0x1b8] sm:$0xff] }
 0xf3d   : > { %v1813_v28 = vpop.xlane.xlu0 %1812 }
 0xf3e   : > { %7600 = vrcp.f32 %v1813_v28  ;;  %v2438_v28 = vld [vmem:[#allocation2 + $0x1c0] sm:$0xff] }
 0xf3f   : > { %v7400_v29 = vpack.c.bf16 %v2438_v28, %v2437_v27 }
 0xf41   : > { %v1978_v23 = vpop.xlane.xlu1 %1977 }
 0xf42   : > { %7602 = vrcp.f32 %v1978_v23  ;;  %v2440_v23 = vld [vmem:[#allocation2 + $0x1d0] sm:$0xff] }
 0xf43   : > { %v7403_v31 = vpack.c.bf16 %v2440_v23, %v2439_v30 }
 0xf45   : > { %v2143_v34 = vpop.xlane.xlu0 %2142 }
 0xf46   : > { %7604 = vrcp.f32 %v2143_v34  ;;  %v7406_v34 = vpack.c.bf16 %v2442_v33, %v2441_v32 }
 0xf48   : > { %v7601_v38 = vpop.eup %7600 }
 0xf49   : > { %v1648_v50 = vpop.xlane.xlu0 %1647 }
 0xf4a   : > { %7606 = vrcp.f32 %v1648_v50 }
 0xf4c   : > { %v7603_v42 = vpop.eup %7602 }
 0xf50   : > { %v7605_v46 = vpop.eup %7604 }
 0xf54   : > { %v7607_v51 = vpop.eup %7606 }
 0xf81   : > { %v1721_v36 = vpop.f32.mrb[18].mxu1 }
 0xf82   : > { %v6970_v37 = vpop.f32.mrb[19].mxu1  ;;  %v1726_v53 = vmul.f32 %v7607_v51, %v1721_v36  ;;  %v2444_v36 = vld [vmem:[#allocation2 + $0x1f0] sm:$0xff] }
 0xf83   : > { %v7409_v37 = vpack.c.bf16 %v2444_v36, %v2443_v35 }
 0xf85   : > { %v1886_v39 = vpop.f32.mrb[20].mxu1 }
 0xf86   : > { %v1891_v40 = vmul.f32 %v7601_v38, %v1886_v39  ;;  %v6980_v41 = vpop.f32.mrb[21].mxu1  ;;  %v6529_v38 = vld [vmem:[#allocation2 + $0x1b0] ss:$0 sm:$0xff] }
 0xf88   : > { %2223 = vrot.lane.b32.xlu1 %v1891_v40, %s7737_s9 }
 0xf89   : > { %v2051_v43 = vpop.f32.mrb[22].mxu1 }
 0xf8a   : > { %v2056_v44 = vmul.f32 %v7603_v42, %v2051_v43  ;;  %v6990_v45 = vpop.f32.mrb[23].mxu1 }
 0xf8c   : > { %2227 = vrot.lane.b32.xlu0 %v2056_v44, %s7738_s10 }
 0xf8d   : > { %v2216_v47 = vpop.f32.mrb[24].mxu1 }
 0xf8e   : > { %v2221_v48 = vmul.f32 %v7605_v46, %v2216_v47  ;;  %v7000_v49 = vpop.f32.mrb[25].mxu1 }
 0xf90   : > { %2231 = vrot.lane.b32.xlu1 %v2221_v48, %s7739_s11 }
 0xffa   : > { %v2224_v52 = vpop.permute.xlu1 %2223 }
 0xffb   : > { %v2234_v55 = vsel %vm494_vm4, %v1726_v53, %v2224_v52  ;;  %v6532_v52 = vld [vmem:[#allocation2 + $0x1f8] ss:$0 sm:$0xff] }
 0xffe   : > { %v2228_v54 = vpop.permute.xlu0 %2227 }
 0xfff   : > { %v2235_v56 = vsel %vm1164_vm6, %v2234_v55, %v2228_v54 }
0x1002   : > { %v2232_v57 = vpop.permute.xlu1 %2231 }
0x1003   : > { %v2236_v58 = vsel %vm1166_vm7, %v2235_v56, %v2232_v57  ;;  %v8069_v56 = vld [vmem:[#allocation2 + $0x210] sm:$0xf] }
0x1004   : > { %7010 = vmatmul.mubr.msk.f32.vlgmr.msra.gmra.mrb[18].mxu0 %vm378_vm3, %v2236_v58  ;;  %v2636_v58 = vsel %vm2635_vm8, %v8069_v56, 0.0 }
0x1005   : > { %7039 = vmatprep.mubr.msk.f32.mxu0 %vm7723_vm0, %v7724_v9  ;;  %7401 = vmatpush3.bf16.msra.mxu0 %v7400_v29  ;;  %v6537_v29 = vld [vmem:[#allocation2 + $0x228] ss:$0 sm:$0xff] }
0x1006   : > { %7402 = vmatprep.subr.bf16.mxu0 %v7722_v1 }
0x1009   : > { %7404 = vmatpush3.bf16.msra.mxu0 %v7403_v31  ;;  %v6538_v31 = vld [vmem:[#allocation2 + $0x230] ss:$0 sm:$0xff] }
0x100a   : > { %7405 = vmatprep.subr.bf16.mxu0 %v7722_v1 }
0x100d   : > { %7407 = vmatpush3.bf16.msra.mxu0 %v7406_v34 }
0x100e   : > { %7408 = vmatprep.subr.bf16.mxu0 %v7722_v1 }
0x1011   : > { %7410 = vmatpush3.bf16.msra.mxu0 %v7409_v37 }
0x1012   : > { %7064 = vmatprep.subr.mxu0 %v7724_v9 }
0x10d7   : > { %v2310_v60 = vpop.f32.mrb[18].mxu0 }
0x10d8   : > { %v2314_v62 = vadd.f32 %v2310_v60, %v7968_v11  ;;  %v7011_v0 = vpop.f32.mrb[19].mxu0  ;;  %v2348_v11 = vld [vmem:[#allocation2 + $0x1a0] sm:$0xff] }
0x10d9   : > { %v7397_v15 = vpack.c.bf16 %v2349_v14, %v2348_v11  ;;  %v2662_v11 = vld [vmem:[#allocation2 + $0x250] sm:$0xff] }
0x10da   : > { %v8050_v2 = vadd.f32 %v6526_v61, %v2314_v62  ;;  %v7415_v14 = vpack.c.bf16 %v2662_v11, %v2661_v12 }
0x10db   : > { %7398 = vmatpush3.bf16.msra.mxu1 %v7397_v15 }
0x10dc   : > { %v2323_v3 = vsel %vm378_vm3, %v8050_v2, 0.0  ;;  %7411 = vmatprep.subr.bf16.mxu1 %v7722_v1 }
0x10dd   : > { %2324 = vadd.xlane.f32.xlu1 %v2323_v3 }
0x116a   : > { %v2325_v4 = vpop.xlane.xlu1 %2324 }
0x116b   : > { %v2326_v5 = vmul.f32 0.03125, %v2325_v4 }
0x116d   : > { %v2327_v6 = vsub.f32 %v8050_v2, %v2326_v5 }
0x116f   : > { %v2328_v7 = vmul.f32 %v2327_v6, %v2327_v6 }
0x1171   : > { %v2329_v8 = vsel %vm378_vm3, %v2328_v7, 0.0 }
0x1172   : > { %2330 = vadd.xlane.f32.xlu0 %v2329_v8  ;;  %v2659_v8 = vld [vmem:[#allocation2 + $0x238] sm:$0xff] }
0x1173   : > { %v7412_v13 = vpack.c.bf16 %v2660_v10, %v2659_v8  ;;  %v7548_v35 = vpack.i.bf16 %v2660_v10, %v2659_v8 }
0x11ff   : > { %v2331_v16 = vpop.xlane.xlu0 %2330 }
0x1200   : > { %v2332_v18 = vmul.f32 0.03125, %v2331_v16 }
0x1202   : > { %v2333_v19 = vadd.f32 1e-12, %v2332_v18 }
0x1204   : > { %7608 = vrsqrt.f32 %v2333_v19 }
0x120e   : > { %v7609_v21 = vpop.eup %7608 }
0x120f   : > { %v2335_v20 = vmul.f32 %v7609_v21, %v2327_v6 }
0x1211   : > { %v2340_v25 = vmul.f32 %v6527_v22, %v2335_v20 }
0x1213   : > { %v2345_v26 = vadd.f32 %v6528_v24, %v2340_v25  ;;  %v6533_v24 = vld [vmem:[#allocation2 + $0x200] ss:$0 sm:$0xff] }
0x1215   : > { %7021 = vmatmul.mubr.msk.f32.vlgmr.msra.gmra.mrb[26].mxu1 %vm378_vm3, %v2345_v26  ;;  %v6534_v26 = vld [vmem:[#allocation2 + $0x208] ss:$0 sm:$0xff] }
0x1216   : > { %7050 = vmatprep.mubr.msk.f32.mxu1 %vm7723_vm0, %v7724_v9  ;;  %7413 = vmatpush3.bf16.msra.mxu1 %v7412_v13 }
0x1217   : > { %7414 = vmatprep.subr.bf16.mxu1 %v7722_v1 }
0x121a   : > { %7416 = vmatpush3.bf16.msra.mxu1 %v7415_v14 }
0x121b   : > { %7417 = vmatprep.subr.bf16.mxu1 %v7722_v1 }
0x12e8   : > { %v2424_v39 = vpop.f32.mrb[26].mxu1 }
0x12e9   : > { %v2425_v40 = vadd.f32 %v6529_v38, %v2424_v39  ;;  %v7022_v41 = vpop.f32.mrb[27].mxu1 }
0x12ea   : > { %v7553_v41 = vpack.i.bf16 %v2662_v11, %v2661_v12 }
0x12eb   : > { %v2428_v42 = vmul.f32 %v2425_v40, %v2425_v40 }
0x12ed   : > { %v2429_v43 = vmul.f32 %v2428_v42, %v2425_v40 }
0x12ef   : > { %v2430_v44 = vmul.f32 0.044715, %v2429_v43 }
0x12f1   : > { %v2431_v45 = vadd.f32 %v2430_v44, %v2425_v40 }
0x12f3   : > { %v2432_v46 = vmul.f32 0.7978846, %v2431_v45 }
0x12f5   : > { %7610 = vtanh.f32 %v2432_v46 }
0x12ff   : > { %v7611_v47 = vpop.eup %7610 }
0x1300   : > { %v2434_v48 = vadd.f32 1.0, %v7611_v47 }
0x1302   : > { %v2435_v49 = vmul.f32 0.5, %v2434_v48 }
0x1304   : > { %v2436_v50 = vmul.f32 %v2435_v49, %v2425_v40 }
0x1306   : > { %7040 = vmatmul.mubr.msk.f32.vlgmr.msra.gmra.mrb[20].mxu0 %vm295_vm1, %v2436_v50 }
0x1307   : > { %7066 = vmatprep.mubr.msk.f32.mxu0 %vm7723_vm0, %v7724_v9 }
0x13d9   : > { %v2514_v51 = vpop.f32.mrb[20].mxu0 }
0x13da   : > { %v2518_v53 = vadd.f32 %v2514_v51, %v8050_v2  ;;  %v7041_v54 = vpop.f32.mrb[21].mxu0 }
0x13dc   : > { %v2524_v55 = vadd.f32 %v6532_v52, %v2518_v53 }
0x13de   : > { %v2527_v57 = vsel %vm378_vm3, %v2524_v55, 0.0 }
0x13df   : > { %2528 = vadd.xlane.f32.xlu0 %v2527_v57  ;;  %v6535_v57 = vld [vmem:[#allocation2 + $0x218] ss:$0 sm:$0xff] }
0x13e3   : > { %2637 = vadd.xlane.f32.xlu0 %v2636_v58 }
0x146c   : > { %v2529_v60 = vpop.xlane.xlu0 %2528 }
0x146d   : > { %v2530_v61 = vmul.f32 0.03125, %v2529_v60  ;;  %v6536_v60 = vld [vmem:[#allocation2 + $0x220] ss:$0 sm:$0xff] }
0x146f   : > { %v2531_v62 = vsub.f32 %v2524_v55, %v2530_v61 }
0x1470   : > { %v2638_v0 = vpop.xlane.xlu0 %2637 }
0x1471   : > { %v2532_v3 = vmul.f32 %v2531_v62, %v2531_v62  ;;  %v2639_v4 = vmul.f32 0.03125, %v2638_v0 }
0x1473   : > { %v2533_v2 = vsel %vm378_vm3, %v2532_v3, 0.0  ;;  %v2640_v5 = vsub.f32 %v8069_v56, %v2639_v4 }
0x1474   : > { %2534 = vadd.xlane.f32.xlu1 %v2533_v2 }
0x1475   : > { %v2641_v6 = vmul.f32 %v2640_v5, %v2640_v5 }
0x1477   : > { %v2642_v7 = vsel %vm2635_vm8, %v2641_v6, 0.0 }
0x1478   : > { %2643 = vadd.xlane.f32.xlu0 %v2642_v7 }
0x148e   : > { %7549 = vrot.lane.b32.xlu0 %v7548_v35, %s7726_s21 }
0x1501   : > { %v2535_v15 = vpop.xlane.xlu1 %2534 }
0x1502   : > { %v2536_v16 = vmul.f32 0.03125, %v2535_v15 }
0x1504   : > { %v2537_v18 = vadd.f32 1e-12, %v2536_v16 }
0x1505   : > { %v2644_v19 = vpop.xlane.xlu0 %2643 }
0x1506   : > { %7612 = vrsqrt.f32 %v2537_v18  ;;  %v2645_v21 = vmul.f32 0.03125, %v2644_v19 }
0x1508   : > { %v2646_v22 = vadd.f32 1e-05, %v2645_v21 }
0x1509   : > { %v7550_v42 = vpop.permute.xlu0 %7549 }
0x150a   : > { %7614 = vrsqrt.f32 %v2646_v22  ;;  %v7552_v43 = vunpack.i.h.bf16 %v7550_v42  ;;  %v7551_v44 = vunpack.i.l.bf16 %v7550_v42 }
0x150c   : > { %v7418_v45 = vpack.c.bf16 %v7552_v43, %v7551_v44 }
0x1510   : > { %v7613_v20 = vpop.eup %7612 }
0x1511   : > { %v2539_v25 = vmul.f32 %v7613_v20, %v2531_v62 }
0x1513   : > { %v2544_v27 = vmul.f32 %v6533_v24, %v2539_v25 }
0x1514   : > { %v7615_v28 = vpop.eup %7614 }
0x1515   : > { %v8079_v30 = vadd.f32 %v6534_v26, %v2544_v27  ;;  %v2648_v23 = vmul.f32 %v7615_v28, %v2640_v5 }
0x1517   : > { %v2610_v32 = vsel %vm378_vm3, %v8079_v30, 0.0  ;;  %v2653_v33 = vmul.f32 %v6537_v29, %v2648_v23 }
0x1518   : > { %2611 = vadd.xlane.f32.xlu1 %v2610_v32 }
0x1519   : > { %v2658_v34 = vadd.f32 %v6538_v31, %v2653_v33 }
0x151b   : > { %7051 = vmatmul.mubr.msk.f32.vlgmr.msra.gmra.mrb[28].mxu1 %vm378_vm3, %v2658_v34 }
0x151c   : > { %7061 = vmatprep.mubr.msk.f32.mxu1 %vm7723_vm0, %v7724_v9  ;;  %7419 = vmatpush3.bf16.msra.mxu1 %v7418_v45 }
0x151d   : > { %7420 = vmatprep.subr.bf16.mxu1 %v7722_v1 }
0x15a5   : > { %v2612_v36 = vpop.xlane.xlu1 %2611 }
0x15a6   : > { %v2613_v37 = vmul.f32 0.03125, %v2612_v36 }
0x15a8   : > { %v2614_v38 = vsub.f32 %v8079_v30, %v2613_v37 }
0x15aa   : > { %v2615_v39 = vmul.f32 %v2614_v38, %v2614_v38 }
0x15ac   : > { %v2616_v40 = vsel %vm378_vm3, %v2615_v39, 0.0 }
0x15ad   : > { %2617 = vadd.xlane.f32.xlu1 %v2616_v40 }
0x15be   : > { %7554 = vrot.lane.b32.xlu1 %v7553_v41, %s7726_s21 }
0x15ee   : > { %v8091_v46 = vpop.f32.mrb[28].mxu1 }
0x15ef   : > { %2901 = vrot.lane.b32.xlu1 %v8091_v46, %s7726_s21  ;;  %v7052_v47 = vpop.f32.mrb[29].mxu1 }
0x15f3   : > { %3154 = vrot.lane.b32.xlu1 %v8091_v46, %s7728_s23 }
0x163a   : > { %v2618_v48 = vpop.xlane.xlu1 %2617 }
0x163b   : > { %v2619_v49 = vmul.f32 0.03125, %v2618_v48 }
0x163d   : > { %v2620_v50 = vadd.f32 1e-05, %v2619_v49 }
0x163e   : > { %v7555_v51 = vpop.permute.xlu1 %7554 }
0x163f   : > { %7616 = vrsqrt.f32 %v2620_v50  ;;  %v7557_v52 = vunpack.i.h.bf16 %v7555_v51  ;;  %v7556_v53 = vunpack.i.l.bf16 %v7555_v51 }
0x1641   : > { %v7421_v54 = vpack.c.bf16 %v7557_v52, %v7556_v53 }
0x1643   : > { %7422 = vmatpush3.bf16.msra.mxu1 %v7421_v54 }
0x1644   : > { %7069 = vmatprep.subr.mxu1 %v7724_v9 }
0x1649   : > { %v7617_v55 = vpop.eup %7616 }
0x164a   : > { %v8098_v58 = vmul.f32 %v7617_v55, %v2614_v38 }
0x164c   : > { %v2627_v61 = vmul.f32 %v6535_v57, %v8098_v58 }
0x164e   : > { %v2632_v62 = vadd.f32 %v6536_v60, %v2627_v61 }
0x1650   : > { %7062 = vmatmul.mubr.msk.f32.vlgmr.msra.gmra.mrb[30].mxu1 %vm378_vm3, %v2632_v62 }
0x1651   : > { %7071 = vmatprep.mubr.msk.f32.mxu1 %vm7723_vm0, %v7724_v9 }
0x1661   : > { %v2902_v0 = vpop.permute.xlu1 %2901 }
0x1662   : > { %7070 = vmatpush3.xpose.msk.msra.mxu1 %vm494_vm4, %v2902_v0 }
0x1663   : > { %7084 = vmatprep.subr.mxu1 %v7724_v9 }
0x1665   : > { %7072 = vmatmul.mubr.msk.f32.vlgmr.msra.gmra.mrb[32].mxu1 %vm494_vm4, %v8091_v46  ;;  %v3155_v8 = vpop.permute.xlu1 %3154 }
0x1666   : > { %7086 = vmatprep.mubr.msk.f32.mxu1 %vm7723_vm0, %v7724_v9 }
0x1723   : > { %v8110_v3 = vpop.f32.mrb[30].mxu1 }
0x1724   : > { %3483 = vrot.lane.b32.xlu1 %v8110_v3, %s7731_s26  ;;  %3156 = vrot.lane.b32.xlu0 %v8110_v3, %s7728_s23  ;;  %v7063_v4 = vpop.f32.mrb[31].mxu1 }
0x1725   : > { %7065 = vmatpush3.xpose.msk.msra.mxu0 %vm494_vm4, %v8110_v3 }
0x1726   : > { %7074 = vmatprep.subr.mxu0 %v7724_v9 }
0x1728   : > { %7067 = vmatmul.mubr.msk.f32.vlgmr.msra.gmra.mrb[22].mxu0 %vm494_vm4, %v8091_v46  ;;  %3559 = vrot.lane.b32.xlu1 %v8091_v46, %s7730_s25 }
0x1729   : > { %3232 = vrot.lane.b32.xlu0 %v8091_v46, %s7725_s20  ;;  %7076 = vmatprep.mubr.msk.f32.mxu0 %vm7723_vm0, %v7724_v9 }
0x172c   : > { %3808 = vrot.lane.b32.xlu1 %v8091_v46, %s7727_s22 }
0x172d   : > { %3481 = vrot.lane.b32.xlu0 %v8091_v46, %s7731_s26 }
0x1730   : > { %3076 = vrot.lane.b32.xlu1 %v8110_v3, %s7726_s21 }
0x1731   : > { %3810 = vrot.lane.b32.xlu0 %v8110_v3, %s7727_s22 }
0x1735   : > { %3886 = vrot.lane.b32.xlu0 %v8091_v46, %s7732_s27 }
0x1738   : > { %v8137_v2 = vpop.f32.mrb[32].mxu1 }
0x1739   : > { %2997 = vrot.lane.b32.xlu0 %v8091_v46, %s7729_s24  ;;  %v7073_v5 = vpop.f32.mrb[33].mxu1  ;;  %v2980_v6 = vsel %vm2979_vm9, %v8137_v2, -inf }
0x1758   : > { %2981 = vmax.xlane.f32.xlu0 %v2980_v6 }
0x1796   : > { %v3157_v7 = vpop.permute.xlu0 %3156  ;;  %v3484_v12 = vpop.permute.xlu1 %3483 }
0x1797   : > { %7085 = vmatpush3.xpose.msk.msra.mxu1 %vm494_vm4, %v3157_v7 }
0x1798   : > { %7089 = vmatprep.subr.mxu1 %v7724_v9 }
0x179a   : > { %7087 = vmatmul.mubr.msk.f32.vlgmr.msra.gmra.mrb[34].mxu1 %vm494_vm4, %v3155_v8  ;;  %v3560_v11 = vpop.permute.xlu1 %3559 }
0x179b   : > { %v3233_v10 = vpop.permute.xlu0 %3232  ;;  %7091 = vmatprep.mubr.msk.f32.mxu1 %vm7723_vm0, %v7724_v9 }
0x179c   : > { %7090 = vmatpush3.xpose.msk.msra.mxu1 %vm494_vm4, %v3233_v10 }
0x179d   : > { %7104 = vmatprep.subr.mxu1 %v7724_v9 }
0x179e   : > { %v3809_v16 = vpop.permute.xlu1 %3808 }
0x179f   : > { %7092 = vmatmul.mubr.msk.f32.vlgmr.msra.gmra.mrb[36].mxu1 %vm494_vm4, %v3155_v8  ;;  %v3482_v13 = vpop.permute.xlu0 %3481 }
0x17a0   : > { %7105 = vmatpush3.xpose.msk.msra.mxu1 %vm494_vm4, %v3484_v12  ;;  %7106 = vmatprep.mubr.msk.f32.mxu1 %vm7723_vm0, %v7724_v9 }
0x17a1   : > { %7109 = vmatprep.subr.mxu1 %v7724_v9 }
0x17a2   : > { %v3077_v39 = vpop.permute.xlu1 %3076 }
0x17a3   : > { %7107 = vmatmul.mubr.msk.f32.vlgmr.msra.gmra.mrb[38].mxu1 %vm494_vm4, %v3482_v13  ;;  %v3811_v14 = vpop.permute.xlu0 %3810 }
0x17a4   : > { %7110 = vmatpush3.xpose.msk.msra.mxu1 %vm494_vm4, %v3560_v11  ;;  %7111 = vmatprep.mubr.msk.f32.mxu1 %vm7723_vm0, %v7724_v9 }
0x17a5   : > { %7124 = vmatprep.subr.mxu1 %v7724_v9 }
0x17a7   : > { %7112 = vmatmul.mubr.msk.f32.vlgmr.msra.gmra.mrb[40].mxu1 %vm494_vm4, %v3482_v13  ;;  %v3887_v15 = vpop.permute.xlu0 %3886 }
0x17a8   : > { %7125 = vmatpush3.xpose.msk.msra.mxu1 %vm494_vm4, %v3811_v14  ;;  %7126 = vmatprep.mubr.msk.f32.mxu1 %vm7723_vm0, %v7724_v9 }
0x17a9   : > { %7129 = vmatprep.subr.mxu1 %v7724_v9 }
0x17ab   : > { %7127 = vmatmul.mubr.msk.f32.vlgmr.msra.gmra.mrb[42].mxu1 %vm494_vm4, %v3809_v16  ;;  %v2998_v18 = vpop.permute.xlu0 %2997 }
0x17ac   : > { %7075 = vmatpush3.msk.msra.mxu0 %vm3003_vm10, %v2998_v18  ;;  %7130 = vmatpush3.xpose.msk.msra.mxu1 %vm494_vm4, %v3887_v15 }
0x17ad   : > { %7131 = vmatprep.mubr.msk.f32.mxu1 %vm7723_vm0, %v7724_v9  ;;  %7079 = vmatprep.subr.mxu0 %v7724_v9 }
0x17ae   : > { %7423 = vmatprep.subr.bf16.mxu1 %v7722_v1 }
0x17af   : > { %7132 = vmatmul.mubr.msk.f32.vlgmr.msra.gmra.mrb[44].mxu1 %vm494_vm4, %v3809_v16 }
0x17b0   : > { %7152 = vmatprep.mubr.msk.f32.mxu1 %vm7723_vm0, %v7724_v9 }
0x17e5   : > { %v2982_v40 = vpop.xlane.xlu0 %2981 }
0x17fb   : > { %v2897_v19 = vpop.f32.mrb[22].mxu0 }
0x17fc   : > { %v2898_v21 = vadd.f32 %v2897_v19, %v7902_v63  ;;  %v7068_v22 = vpop.f32.mrb[23].mxu0 }
0x17fe   : > { %v2976_v20 = vsel %vm2975_vm11, %v2898_v21, -inf }
0x17ff   : > { %2977 = vmax.xlane.f32.xlu1 %v2976_v20 }
0x186d   : > { %v3228_v24 = vpop.f32.mrb[34].mxu1 }
0x186e   : > { %v3229_v25 = vadd.f32 %v3228_v24, %v7902_v63  ;;  %v7088_v26 = vpop.f32.mrb[35].mxu1 }
0x1870   : > { %v3306_v27 = vsel %vm2975_vm11, %v3229_v25, -inf }
0x1871   : > { %3307 = vmax.xlane.f32.xlu0 %v3306_v27 }
0x1872   : > { %v3302_v28 = vpop.f32.mrb[36].mxu1 }
0x1873   : > { %v7093_v29 = vpop.f32.mrb[37].mxu1  ;;  %v3309_v23 = vsel %vm2979_vm9, %v3302_v28, -inf }
0x1874   : > { %3310 = vmax.xlane.f32.xlu1 %v3309_v23 }
0x1876   : > { %v3555_v31 = vpop.f32.mrb[38].mxu1 }
0x1877   : > { %v7108_v32 = vpop.f32.mrb[39].mxu1  ;;  %v3556_v49 = vadd.f32 %v3555_v31, %v7902_v63 }
0x1879   : > { %v3633_v50 = vsel %vm2975_vm11, %v3556_v49, -inf }
0x187a   : > { %v8180_v33 = vpop.f32.mrb[40].mxu1 }
0x187b   : > { %v7113_v34 = vpop.f32.mrb[41].mxu1  ;;  %v3636_v53 = vsel %vm2979_vm9, %v8180_v33, -inf }
0x187e   : > { %v3882_v35 = vpop.f32.mrb[42].mxu1 }
0x187f   : > { %v7128_v36 = vpop.f32.mrb[43].mxu1  ;;  %v3883_v52 = vadd.f32 %v3882_v35, %v7902_v63 }
0x1881   : > { %v3960_v54 = vsel %vm2975_vm11, %v3883_v52, -inf }
0x1882   : > { %v8182_v37 = vpop.f32.mrb[44].mxu1 }
0x1883   : > { %v7133_v38 = vpop.f32.mrb[45].mxu1  ;;  %v3963_v55 = vsel %vm2979_vm9, %v8182_v37, -inf }
0x1885   : > { %3653 = vrot.lane.b32.xlu1 %v8091_v46, %s7734_s6 }
0x1887   : > { %3326 = vrot.lane.b32.xlu0 %v8091_v46, %s7736_s8 }
0x188c   : > { %v2978_v41 = vpop.xlane.xlu1 %2977 }
0x188d   : > { %v2983_v42 = vmax.f32 %v2978_v41, %v2982_v40 }
0x188f   : > { %v2987_v43 = vsub.f32 %v8137_v2, %v2983_v42  ;;  %v2984_v45 = vsub.f32 %v2898_v21, %v2983_v42 }
0x1891   : > { %v2988_v44 = vmul.f32 1.442695, %v2987_v43  ;;  %v2985_v47 = vmul.f32 1.442695, %v2984_v45 }
0x1893   : > { %7618 = vpow2.f32 %v2988_v44 }
0x1894   : > { %7620 = vpow2.f32 %v2985_v47 }
0x189d   : > { %v8189_v48 = vpop.eup %7618 }
0x189e   : > { %7077 = vmatmul.mubr.msk.f32.vlgmr.msra.gmra.mrb[24].mxu0 %vm2999_vm12, %v8189_v48  ;;  %v8198_v51 = vpop.eup %7620 }
0x189f   : > { %7080 = vmatpush3.msra.mxu0 %v3077_v39  ;;  %7081 = vmatprep.mubr.msk.f32.mxu0 %vm7723_vm0, %v7724_v9  ;;  %v2993_v39 = vsel %vm2979_vm9, %v8189_v48, 0.0 }
0x18a0   : > { %7094 = vmatprep.subr.mxu0 %v7724_v9 }
0x18a6   : > { %3634 = vmax.xlane.f32.xlu0 %v3633_v50  ;;  %7082 = vmatmul.mubr.msk.f32.vlgmr.msra.gmra.mrb[24].mxu0 %vm494_vm4, %v8198_v51 }
0x18a7   : > { %7096 = vmatprep.mubr.msk.f32.mxu0 %vm7723_vm0, %v7724_v9 }
0x18a9   : > { %3637 = vmax.xlane.f32.xlu1 %v3636_v53  ;;  %v4150_v53 = vld [vmem:[#allocation2 + $0x258] sm:$0xff] }
0x18ad   : > { %3961 = vmax.xlane.f32.xlu1 %v3960_v54  ;;  %v4151_v54 = vld [vmem:[#allocation2 + $0x260] sm:$0xff] }
0x18b1   : > { %3964 = vmax.xlane.f32.xlu1 %v3963_v55  ;;  %v4152_v55 = vld [vmem:[#allocation2 + $0x268] sm:$0xff] }
0x18bc   : > { %3403 = vrot.lane.b32.xlu0 %v8110_v3, %s7725_s20 }
0x18c0   : > { %3730 = vrot.lane.b32.xlu0 %v8110_v3, %s7730_s25 }
0x18c2   : > { %3980 = vrot.lane.b32.xlu1 %v8091_v46, %s7735_s7 }
0x18c4   : > { %4057 = vrot.lane.b32.xlu0 %v8110_v3, %s7732_s27 }
0x18fe   : > { %v3308_v57 = vpop.xlane.xlu0 %3307 }
0x1901   : > { %v3311_v60 = vpop.xlane.xlu1 %3310 }
0x1902   : > { %v3312_v61 = vmax.f32 %v3308_v57, %v3311_v60  ;;  %v3327_v62 = vpop.permute.xlu0 %3326  ;;  %v7424_v57 = vpack.c.bf16 %v4151_v54, %v4150_v53  ;;  %v4153_v60 = vld [vmem:[#allocation2 + $0x270] sm:$0xff] }
0x1903   : > { %7095 = vmatpush3.msk.msra.mxu0 %vm3003_vm10, %v3327_v62  ;;  %v4348_v54 = vld [vmem:[#allocation2 + $0x2d0] sm:$0xff] }
0x1904   : > { %v3313_v0 = vsub.f32 %v3229_v25, %v3312_v61  ;;  %v3316_v4 = vsub.f32 %v3302_v28, %v3312_v61  ;;  %7099 = vmatprep.subr.mxu0 %v7724_v9  ;;  %7425 = vmatpush3.bf16.msra.mxu1 %v7424_v57  ;;  %v7427_v61 = vpack.c.bf16 %v4153_v60, %v4152_v55  ;;  %v4349_v55 = vld [vmem:[#allocation2 + $0x2d8] sm:$0xff]  ;;  %v4350_v60 = vld [vmem:[#allocation2 + $0x2e0] sm:$0xff] }
0x1905   : > { %v3654_v8 = vpop.permute.xlu1 %3653  ;;  %7426 = vmatprep.subr.bf16.mxu1 %v7722_v1  ;;  %v7442_v57 = vpack.c.bf16 %v4349_v55, %v4348_v54  ;;  %v6577_v54 = vld [vmem:[#allocation2 + $0x300] ss:$0 sm:$0xff] }
0x1906   : > { %v3314_v2 = vmul.f32 1.442695, %v3313_v0  ;;  %v3317_v5 = vmul.f32 1.442695, %v3316_v4 }
0x1908   : > { %7622 = vpow2.f32 %v3314_v2  ;;  %7428 = vmatpush3.bf16.msra.mxu1 %v7427_v61  ;;  %v4351_v61 = vld [vmem:[#allocation2 + $0x2e8] sm:$0xff] }
0x1909   : > { %7624 = vpow2.f32 %v3317_v5  ;;  %7435 = vmatprep.subr.bf16.mxu1 %v7722_v1 }
0x1912   : > { %v7623_v6 = vpop.eup %7622 }
0x1913   : > { %v7625_v7 = vpop.eup %7624  ;;  %v3319_v46 = vsel %vm2975_vm11, %v7623_v6, 0.0 }
0x1914   : > { %7097 = vmatmul.mubr.msk.f32.vlgmr.msra.gmra.mrb[26].mxu0 %vm2999_vm12, %v7625_v7  ;;  %v3322_v3 = vsel %vm2979_vm9, %v7625_v7, 0.0  ;;  %3320 = vadd.xlane.f32.xlu1 %v3319_v46 }
0x1915   : > { %3323 = vadd.xlane.f32.xlu0 %v3322_v3  ;;  %7101 = vmatprep.mubr.msk.f32.mxu0 %vm7723_vm0, %v7724_v9 }
0x1933   : > { %v3635_v10 = vpop.xlane.xlu0 %3634 }
0x1936   : > { %v3638_v12 = vpop.xlane.xlu1 %3637 }
0x1937   : > { %v3639_v13 = vmax.f32 %v3635_v10, %v3638_v12  ;;  %v3404_v11 = vpop.permute.xlu0 %3403 }
0x1938   : > { %7100 = vmatpush3.msra.mxu0 %v3404_v11 }
0x1939   : > { %v3640_v14 = vsub.f32 %v3556_v49, %v3639_v13  ;;  %v3643_v15 = vsub.f32 %v8180_v33, %v3639_v13  ;;  %7102 = vmatmul.mubr.msk.f32.vlgmr.msra.gmra.mrb[26].mxu0 %vm494_vm4, %v7623_v6  ;;  %7114 = vmatprep.subr.mxu0 %v7724_v9 }
0x193a   : > { %v3962_v16 = vpop.xlane.xlu1 %3961  ;;  %7115 = vmatpush3.msk.msra.mxu0 %vm3003_vm10, %v3654_v8  ;;  %7116 = vmatprep.mubr.msk.f32.mxu0 %vm7723_vm0, %v7724_v9 }
0x193b   : > { %v3641_v18 = vmul.f32 1.442695, %v3640_v14  ;;  %v3644_v19 = vmul.f32 1.442695, %v3643_v15  ;;  %7119 = vmatprep.subr.mxu0 %v7724_v9  ;;  %v3731_v23 = vpop.permute.xlu0 %3730 }
0x193d   : > { %7626 = vpow2.f32 %v3641_v18 }
0x193e   : > { %7628 = vpow2.f32 %v3644_v19  ;;  %v3965_v21 = vpop.xlane.xlu1 %3964 }
0x193f   : > { %v3966_v22 = vmax.f32 %v3962_v16, %v3965_v21  ;;  %v4058_v38 = vpop.permute.xlu0 %4057 }
0x1941   : > { %v3967_v20 = vsub.f32 %v3883_v52, %v3966_v22  ;;  %v3970_v24 = vsub.f32 %v8182_v37, %v3966_v22  ;;  %v2990_v37 = vsel %vm2975_vm11, %v8198_v51, 0.0 }
0x1942   : > { %v3981_v35 = vpop.permute.xlu1 %3980 }
0x1943   : > { %v3968_v25 = vmul.f32 1.442695, %v3967_v20  ;;  %v3971_v26 = vmul.f32 1.442695, %v3970_v24 }
0x1945   : > { %7630 = vpow2.f32 %v3968_v25 }
0x1946   : > { %7632 = vpow2.f32 %v3971_v26 }
0x1947   : > { %v7627_v27 = vpop.eup %7626 }
0x1948   : > { %v7629_v28 = vpop.eup %7628  ;;  %v3646_v29 = vsel %vm2975_vm11, %v7627_v27, 0.0 }
0x1949   : > { %7117 = vmatmul.mubr.msk.f32.vlgmr.msra.gmra.mrb[28].mxu0 %vm2999_vm12, %v7629_v28  ;;  %v3649_v31 = vsel %vm2979_vm9, %v7629_v28, 0.0  ;;  %3647 = vadd.xlane.f32.xlu0 %v3646_v29 }
0x194a   : > { %7120 = vmatpush3.msra.mxu0 %v3731_v23  ;;  %3650 = vadd.xlane.f32.xlu1 %v3649_v31 }
0x194b   : > { %7121 = vmatprep.mubr.msk.f32.mxu0 %vm7723_vm0, %v7724_v9  ;;  %7134 = vmatprep.subr.mxu0 %v7724_v9 }
0x194f   : > { %v7631_v32 = vpop.eup %7630 }
0x1950   : > { %v7633_v33 = vpop.eup %7632  ;;  %v3973_v34 = vsel %vm2975_vm11, %v7631_v32, 0.0 }
0x1951   : > { %7122 = vmatmul.mubr.msk.f32.vlgmr.msra.gmra.mrb[28].mxu0 %vm494_vm4, %v7627_v27  ;;  %v3976_v36 = vsel %vm2979_vm9, %v7633_v33, 0.0  ;;  %3974 = vadd.xlane.f32.xlu0 %v3973_v34  ;;  %v4254_v34 = vld [vmem:[#allocation2 + $0x290] sm:$0xff] }
0x1952   : > { %7135 = vmatpush3.msk.msra.mxu0 %vm3003_vm10, %v3981_v35  ;;  %3977 = vadd.xlane.f32.xlu1 %v3976_v36  ;;  %v4255_v36 = vld [vmem:[#allocation2 + $0x298] sm:$0xff] }
0x1953   : > { %7136 = vmatprep.mubr.msk.f32.mxu0 %vm7723_vm0, %v7724_v9  ;;  %7139 = vmatprep.subr.mxu0 %v7724_v9 }
0x1955   : > { %7137 = vmatmul.mubr.msk.f32.vlgmr.msra.gmra.mrb[30].mxu0 %vm2999_vm12, %v7633_v33  ;;  %2991 = vadd.xlane.f32.xlu0 %v2990_v37  ;;  %v4253_v33 = vld [vmem:[#allocation2 + $0x288] sm:$0xff] }
0x1956   : > { %7140 = vmatpush3.msra.mxu0 %v4058_v38  ;;  %2994 = vadd.xlane.f32.xlu1 %v2993_v39  ;;  %v7430_v35 = vpack.c.bf16 %v4254_v34, %v4253_v33 }
0x1957   : > { %7141 = vmatprep.mubr.msk.f32.mxu0 %vm7723_vm0, %v7724_v9  ;;  %7429 = vmatprep.subr.bf16.mxu0 %v7722_v1 }
0x195d   : > { %7142 = vmatmul.mubr.msk.f32.vlgmr.msra.gmra.mrb[30].mxu0 %vm494_vm4, %v7631_v32 }
0x195e   : > { %7163 = vmatprep.mubr.msk.f32.mxu0 %vm7723_vm0, %v7724_v9  ;;  %7431 = vmatpush3.bf16.msra.mxu0 %v7430_v35 }
0x195f   : > { %7432 = vmatprep.subr.bf16.mxu0 %v7722_v1 }
0x1979   : > { %v3148_v40 = vpop.f32.mrb[24].mxu0 }
0x197a   : > { %v7083_v41 = vpop.f32.mrb[25].mxu0 }
0x19a1   : > { %v3321_v43 = vpop.xlane.xlu1 %3320 }
0x19a2   : > { %v3324_v42 = vpop.xlane.xlu0 %3323 }
0x19a3   : > { %v3325_v44 = vadd.f32 %v3324_v42, %v3321_v43  ;;  %v6570_v42 = vld [vmem:[#allocation2 + $0x278] ss:$0 sm:$0xff] }
0x19a5   : > { %7634 = vrcp.f32 %v3325_v44  ;;  %v6571_v44 = vld [vmem:[#allocation2 + $0x280] ss:$0 sm:$0xff] }
0x19af   : > { %v7635_v45 = vpop.eup %7634 }
0x19d6   : > { %v3648_v50 = vpop.xlane.xlu0 %3647 }
0x19d7   : > { %v3651_v51 = vpop.xlane.xlu1 %3650 }
0x19d8   : > { %v3652_v52 = vadd.f32 %v3651_v51, %v3648_v50  ;;  %v4346_v51 = vld [vmem:[#allocation2 + $0x2c0] sm:$0xff] }
0x19da   : > { %7636 = vrcp.f32 %v3652_v52  ;;  %v4347_v52 = vld [vmem:[#allocation2 + $0x2c8] sm:$0xff] }
0x19db   : > { %v7439_v53 = vpack.c.bf16 %v4347_v52, %v4346_v51  ;;  %v6576_v51 = vld [vmem:[#allocation2 + $0x2f8] ss:$0 sm:$0xff] }
0x19de   : > { %v3975_v62 = vpop.xlane.xlu0 %3974 }
0x19df   : > { %v3978_v0 = vpop.xlane.xlu1 %3977 }
0x19e0   : > { %v3979_v4 = vadd.f32 %v3978_v0, %v3975_v62  ;;  %v7445_v62 = vpack.c.bf16 %v4351_v61, %v4350_v60  ;;  %v6572_v0 = vld [vmem:[#allocation2 + $0x2a8] ss:$0 sm:$0xff] }
0x19e2   : > { %7638 = vrcp.f32 %v3979_v4  ;;  %v2992_v12 = vpop.xlane.xlu0 %2991 }
0x19e3   : > { %v2995_v13 = vpop.xlane.xlu1 %2994 }
0x19e4   : > { %v7637_v2 = vpop.eup %7636  ;;  %v2996_v11 = vadd.f32 %v2995_v13, %v2992_v12 }
0x19e6   : > { %7640 = vrcp.f32 %v2996_v11 }
0x19ec   : > { %v7639_v46 = vpop.eup %7638 }
0x19f0   : > { %v7641_v14 = vpop.eup %7640 }
0x19f1   : > { %v3153_v18 = vmul.f32 %v7641_v14, %v3148_v40 }
0x1a0c   : > { %v3475_v47 = vpop.f32.mrb[26].mxu0 }
0x1a0d   : > { %v3480_v48 = vmul.f32 %v7635_v45, %v3475_v47  ;;  %v7103_v49 = vpop.f32.mrb[27].mxu0 }
0x1a0e   : > { %v4345_v49 = vld [vmem:[#allocation2 + $0x2b8] sm:$0xff] }
0x1a0f   : > { %4136 = vrot.lane.b32.xlu0 %v3480_v48, %s7737_s9  ;;  %v4344_v48 = vld [vmem:[#allocation2 + $0x2b0] sm:$0xff] }
0x1a10   : > { %v7436_v50 = vpack.c.bf16 %v4345_v49, %v4344_v48 }
0x1a24   : > { %v3802_v5 = vpop.f32.mrb[28].mxu0 }
0x1a25   : > { %v3807_v6 = vmul.f32 %v7637_v2, %v3802_v5  ;;  %v7123_v7 = vpop.f32.mrb[29].mxu0 }
0x1a27   : > { %4140 = vrot.lane.b32.xlu1 %v3807_v6, %s7738_s10 }
0x1a30   : > { %v4129_v3 = vpop.f32.mrb[30].mxu0 }
0x1a31   : > { %v4134_v8 = vmul.f32 %v7639_v46, %v4129_v3  ;;  %v7143_v10 = vpop.f32.mrb[31].mxu0 }
0x1a33   : > { %4144 = vrot.lane.b32.xlu1 %v4134_v8, %s7739_s11 }
0x1a81   : > { %v4137_v15 = vpop.permute.xlu0 %4136 }
0x1a82   : > { %v4147_v19 = vsel %vm494_vm4, %v3153_v18, %v4137_v15  ;;  %v6575_v15 = vld [vmem:[#allocation2 + $0x2f0] ss:$0 sm:$0xff] }
0x1a99   : > { %v4141_v16 = vpop.permute.xlu1 %4140 }
0x1a9a   : > { %v4148_v21 = vsel %vm1164_vm6, %v4147_v19, %v4141_v16 }
0x1aa5   : > { %v4145_v22 = vpop.permute.xlu1 %4144 }
0x1aa6   : > { %v4149_v20 = vsel %vm1166_vm7, %v4148_v21, %v4145_v22  ;;  %v4469_v22 = vld [vmem:[#allocation2 + $0x318] sm:$0xff] }
0x1aa7   : > { %7153 = vmatmul.mubr.msk.f32.vlgmr.msra.gmra.mrb[46].mxu1 %vm378_vm3, %v4149_v20  ;;  %v4470_v20 = vld [vmem:[#allocation2 + $0x320] sm:$0xff] }
0x1aa8   : > { %7182 = vmatprep.mubr.msk.f32.mxu1 %vm7723_vm0, %v7724_v9  ;;  %7437 = vmatpush3.bf16.msra.mxu1 %v7436_v50  ;;  %v7448_v33 = vpack.c.bf16 %v4470_v20, %v4469_v22 }
0x1aa9   : > { %7438 = vmatprep.subr.bf16.mxu1 %v7722_v1 }
0x1aac   : > { %7440 = vmatpush3.bf16.msra.mxu1 %v7439_v53  ;;  %v4438_v53 = vmul.f32 %v6576_v51, %v8098_v58 }
0x1aad   : > { %7441 = vmatprep.subr.bf16.mxu1 %v7722_v1 }
0x1aae   : > { %v4443_v55 = vadd.f32 %v6577_v54, %v4438_v53 }
0x1ab0   : > { %7443 = vmatpush3.bf16.msra.mxu1 %v7442_v57 }
0x1ab1   : > { %7444 = vmatprep.subr.bf16.mxu1 %v7722_v1 }
0x1ab4   : > { %7446 = vmatpush3.bf16.msra.mxu1 %v7445_v62 }
0x1ab5   : > { %7207 = vmatprep.subr.mxu1 %v7724_v9 }
0x1b7a   : > { %v4223_v24 = vpop.f32.mrb[46].mxu1 }
0x1b7b   : > { %v8269_v25 = vadd.f32 %v4223_v24, %v8069_v56  ;;  %v7154_v26 = vpop.f32.mrb[47].mxu1  ;;  %v4256_v56 = vld [vmem:[#allocation2 + $0x2a0] sm:$0xff]  ;;  %v7558_v24 = vpack.i.bf16 %v4470_v20, %v4469_v22 }
0x1b7c   : > { %v7433_v37 = vpack.c.bf16 %v4256_v56, %v4255_v36 }
0x1b7d   : > { %v4230_v27 = vsel %vm2635_vm8, %v8269_v25, 0.0 }
0x1b7e   : > { %4231 = vadd.xlane.f32.xlu0 %v4230_v27  ;;  %7434 = vmatpush3.bf16.msra.mxu0 %v7433_v37 }
0x1b7f   : > { %7447 = vmatprep.subr.bf16.mxu0 %v7722_v1 }
0x1c0b   : > { %v4232_v28 = vpop.xlane.xlu0 %4231 }
0x1c0c   : > { %v4233_v29 = vmul.f32 0.03125, %v4232_v28 }
0x1c0e   : > { %v4234_v23 = vsub.f32 %v8269_v25, %v4233_v29 }
0x1c10   : > { %v4235_v31 = vmul.f32 %v4234_v23, %v4234_v23 }
0x1c12   : > { %v4236_v32 = vsel %vm2635_vm8, %v4235_v31, 0.0  ;;  %v4472_v31 = vld [vmem:[#allocation2 + $0x330] sm:$0xff] }
0x1c13   : > { %4237 = vadd.xlane.f32.xlu1 %v4236_v32 }
0x1c24   : > { %7559 = vrot.lane.b32.xlu1 %v7558_v24, %s7726_s21 }
0x1ca0   : > { %v4238_v38 = vpop.xlane.xlu1 %4237 }
0x1ca1   : > { %v4239_v39 = vmul.f32 0.03125, %v4238_v38 }
0x1ca3   : > { %v4240_v40 = vadd.f32 1e-05, %v4239_v39 }
0x1ca4   : > { %v7560_v37 = vpop.permute.xlu1 %7559 }
0x1ca5   : > { %7642 = vrsqrt.f32 %v4240_v40  ;;  %v7562_v39 = vunpack.i.h.bf16 %v7560_v37  ;;  %v7561_v40 = vunpack.i.l.bf16 %v7560_v37 }
0x1caf   : > { %v7643_v41 = vpop.eup %7642 }
0x1cb0   : > { %v4242_v43 = vmul.f32 %v7643_v41, %v4234_v23  ;;  %v6578_v41 = vld [vmem:[#allocation2 + $0x308] ss:$0 sm:$0xff] }
0x1cb2   : > { %v4247_v45 = vmul.f32 %v6570_v42, %v4242_v43 }
0x1cb4   : > { %v4252_v47 = vadd.f32 %v6571_v44, %v4247_v45  ;;  %v6579_v44 = vld [vmem:[#allocation2 + $0x310] ss:$0 sm:$0xff] }
0x1cb6   : > { %7164 = vmatmul.mubr.msk.f32.vlgmr.msra.gmra.mrb[32].mxu0 %vm378_vm3, %v4252_v47  ;;  %v7454_v47 = vpack.c.bf16 %v7562_v39, %v7561_v40 }
0x1cb7   : > { %7193 = vmatprep.mubr.msk.f32.mxu0 %vm7723_vm0, %v7724_v9  ;;  %7449 = vmatpush3.bf16.msra.mxu0 %v7448_v33 }
0x1cb8   : > { %7450 = vmatprep.subr.bf16.mxu0 %v7722_v1 }
0x1d89   : > { %v4331_v4 = vpop.f32.mrb[32].mxu0 }
0x1d8a   : > { %v4332_v2 = vadd.f32 %v6572_v0, %v4331_v4  ;;  %v7165_v5 = vpop.f32.mrb[33].mxu0 }
0x1d8c   : > { %v4335_v6 = vmul.f32 %v4332_v2, %v4332_v2 }
0x1d8e   : > { %v4336_v7 = vmul.f32 %v4335_v6, %v4332_v2 }
0x1d90   : > { %v4337_v46 = vmul.f32 0.044715, %v4336_v7 }
0x1d92   : > { %v4338_v3 = vadd.f32 %v4337_v46, %v4332_v2 }
0x1d94   : > { %v4339_v8 = vmul.f32 0.7978846, %v4338_v3 }
0x1d96   : > { %7644 = vtanh.f32 %v4339_v8 }
0x1da0   : > { %v7645_v10 = vpop.eup %7644 }
0x1da1   : > { %v4341_v12 = vadd.f32 1.0, %v7645_v10 }
0x1da3   : > { %v4342_v13 = vmul.f32 0.5, %v4341_v12 }
0x1da5   : > { %v4343_v11 = vmul.f32 %v4342_v13, %v4332_v2 }
0x1da7   : > { %7183 = vmatmul.mubr.msk.f32.vlgmr.msra.gmra.mrb[48].mxu1 %vm295_vm1, %v4343_v11 }
0x1da8   : > { %7209 = vmatprep.mubr.msk.f32.mxu1 %vm7723_vm0, %v7724_v9 }
0x1e7a   : > { %v4421_v14 = vpop.f32.mrb[48].mxu1 }
0x1e7b   : > { %v4425_v16 = vadd.f32 %v4421_v14, %v8269_v25  ;;  %v7184_v18 = vpop.f32.mrb[49].mxu1  ;;  %v4471_v25 = vld [vmem:[#allocation2 + $0x328] sm:$0xff] }
0x1e7c   : > { %v7563_v32 = vpack.i.bf16 %v4472_v31, %v4471_v25  ;;  %v7451_v34 = vpack.c.bf16 %v4472_v31, %v4471_v25 }
0x1e7d   : > { %v8288_v19 = vadd.f32 %v6575_v15, %v4425_v16 }
0x1e7e   : > { %7452 = vmatpush3.bf16.msra.mxu0 %v7451_v34 }
0x1e7f   : > { %v4446_v21 = vsel %vm2635_vm8, %v8288_v19, 0.0  ;;  %7453 = vmatprep.subr.bf16.mxu0 %v7722_v1 }
0x1e80   : > { %4447 = vadd.xlane.f32.xlu0 %v4446_v21 }
0x1f0d   : > { %v4448_v26 = vpop.xlane.xlu0 %4447 }
0x1f0e   : > { %v4449_v27 = vmul.f32 0.03125, %v4448_v26 }
0x1f10   : > { %v4450_v28 = vsub.f32 %v8288_v19, %v4449_v27 }
0x1f12   : > { %v4451_v29 = vmul.f32 %v4450_v28, %v4450_v28 }
0x1f14   : > { %v4452_v23 = vsel %vm2635_vm8, %v4451_v29, 0.0 }
0x1f15   : > { %4453 = vadd.xlane.f32.xlu0 %v4452_v23 }
0x1f2b   : > { %7564 = vrot.lane.b32.xlu0 %v7563_v32, %s7726_s21 }
0x1fa2   : > { %v4454_v35 = vpop.xlane.xlu0 %4453 }
0x1fa3   : > { %v4455_v36 = vmul.f32 0.03125, %v4454_v35 }
0x1fa5   : > { %v4456_v56 = vadd.f32 1e-05, %v4455_v36 }
0x1fa6   : > { %v7565_v43 = vpop.permute.xlu0 %7564 }
0x1fa7   : > { %7646 = vrsqrt.f32 %v4456_v56  ;;  %v7567_v48 = vunpack.i.h.bf16 %v7565_v43  ;;  %v7566_v49 = vunpack.i.l.bf16 %v7565_v43 }
0x1fa9   : > { %v7457_v52 = vpack.c.bf16 %v7567_v48, %v7566_v49 }
0x1fb1   : > { %v7647_v38 = vpop.eup %7646 }
0x1fb2   : > { %v4458_v42 = vmul.f32 %v7647_v38, %v4450_v28 }
0x1fb4   : > { %v4463_v45 = vmul.f32 %v6578_v41, %v4458_v42 }
0x1fb6   : > { %v4468_v50 = vadd.f32 %v6579_v44, %v4463_v45 }
0x1fb8   : > { %7194 = vmatmul.mubr.msk.f32.vlgmr.msra.gmra.mrb[34].mxu0 %vm378_vm3, %v4468_v50 }
0x1fb9   : > { %7455 = vmatpush3.bf16.msra.mxu0 %v7454_v47  ;;  %7204 = vmatprep.mubr.msk.f32.mxu0 %vm7723_vm0, %v7724_v9 }
0x1fba   : > { %7456 = vmatprep.subr.bf16.mxu0 %v7722_v1 }
0x1fbd   : > { %7458 = vmatpush3.bf16.msra.mxu0 %v7457_v52 }
0x1fbe   : > { %7217 = vmatprep.subr.mxu0 %v7724_v9 }
0x1fc0   : > { %7205 = vmatmul.mubr.msk.f32.vlgmr.msra.gmra.mrb[36].mxu0 %vm378_vm3, %v4443_v55 }
0x1fc1   : > { %7219 = vmatprep.mubr.msk.f32.mxu0 %vm7723_vm0, %v7724_v9 }
0x208b   : > { %v8307_v57 = vpop.f32.mrb[34].mxu0 }
0x208c   : > { %4960 = vrot.lane.b32.xlu0 %v8307_v57, %s7728_s23  ;;  %4711 = vrot.lane.b32.xlu1 %v8307_v57, %s7726_s21  ;;  %v7195_v60 = vpop.f32.mrb[35].mxu0 }
0x2093   : > { %v8313_v58 = vpop.f32.mrb[36].mxu0 }
0x2094   : > { %5289 = vrot.lane.b32.xlu0 %v8313_v58, %s7731_s26  ;;  %4962 = vrot.lane.b32.xlu1 %v8313_v58, %s7728_s23  ;;  %v7206_v61 = vpop.f32.mrb[37].mxu0 }
0x2095   : > { %7208 = vmatpush3.xpose.msk.msra.mxu1 %vm494_vm4, %v8313_v58 }
0x2096   : > { %7212 = vmatprep.subr.mxu1 %v7724_v9 }
0x2098   : > { %7210 = vmatmul.mubr.msk.f32.vlgmr.msra.gmra.mrb[50].mxu1 %vm494_vm4, %v8307_v57  ;;  %5365 = vrot.lane.b32.xlu0 %v8307_v57, %s7730_s25 }
0x2099   : > { %5038 = vrot.lane.b32.xlu1 %v8307_v57, %s7725_s20  ;;  %7214 = vmatprep.mubr.msk.f32.mxu1 %vm7723_vm0, %v7724_v9 }
0x209c   : > { %5614 = vrot.lane.b32.xlu0 %v8307_v57, %s7727_s22 }
0x209d   : > { %5287 = vrot.lane.b32.xlu1 %v8307_v57, %s7731_s26 }
0x20a1   : > { %5616 = vrot.lane.b32.xlu1 %v8313_v58, %s7727_s22  ;;  %s274_s22 = scalar_lea.vmem %s8542_s5, %s8551_s19 }
0x20a5   : > { %5692 = vrot.lane.b32.xlu1 %v8307_v57, %s7732_s27 }
0x20fe   : > { %v4712_v62 = vpop.permute.xlu1 %4711  ;;  %v4961_v4 = vpop.permute.xlu0 %4960 }
0x20ff   : > { %7213 = vmatpush3.xpose.msk.msra.mxu1 %vm494_vm4, %v4712_v62 }
0x2100   : > { %7227 = vmatprep.subr.mxu1 %v7724_v9 }
0x2102   : > { %7215 = vmatmul.mubr.msk.f32.vlgmr.msra.gmra.mrb[52].mxu1 %vm494_vm4, %v8307_v57 }
0x2103   : > { %7229 = vmatprep.mubr.msk.f32.mxu1 %vm7723_vm0, %v7724_v9 }
0x2106   : > { %v4963_v0 = vpop.permute.xlu1 %4962  ;;  %v5290_v5 = vpop.permute.xlu0 %5289 }
0x2107   : > { %7228 = vmatpush3.xpose.msk.msra.mxu1 %vm494_vm4, %v4963_v0 }
0x2108   : > { %7232 = vmatprep.subr.mxu1 %v7724_v9 }
0x210a   : > { %7230 = vmatmul.mubr.msk.f32.vlgmr.msra.gmra.mrb[54].mxu1 %vm494_vm4, %v4961_v4  ;;  %v5366_v7 = vpop.permute.xlu0 %5365 }
0x210b   : > { %v5039_v2 = vpop.permute.xlu1 %5038  ;;  %7234 = vmatprep.mubr.msk.f32.mxu1 %vm7723_vm0, %v7724_v9 }
0x210c   : > { %7233 = vmatpush3.xpose.msk.msra.mxu1 %vm494_vm4, %v5039_v2 }
0x210d   : > { %7247 = vmatprep.subr.mxu1 %v7724_v9 }
0x210e   : > { %v5615_v3 = vpop.permute.xlu0 %5614 }
0x210f   : > { %v5288_v6 = vpop.permute.xlu1 %5287  ;;  %7235 = vmatmul.mubr.msk.f32.vlgmr.msra.gmra.mrb[56].mxu1 %vm494_vm4, %v4961_v4 }
0x2110   : > { %7248 = vmatpush3.xpose.msk.msra.mxu1 %vm494_vm4, %v5290_v5  ;;  %7249 = vmatprep.mubr.msk.f32.mxu1 %vm7723_vm0, %v7724_v9 }
0x2111   : > { %7252 = vmatprep.subr.mxu1 %v7724_v9 }
0x2113   : > { %7250 = vmatmul.mubr.msk.f32.vlgmr.msra.gmra.mrb[58].mxu1 %vm494_vm4, %v5288_v6  ;;  %v5617_v46 = vpop.permute.xlu1 %5616 }
0x2114   : > { %7253 = vmatpush3.xpose.msk.msra.mxu1 %vm494_vm4, %v5366_v7  ;;  %7254 = vmatprep.mubr.msk.f32.mxu1 %vm7723_vm0, %v7724_v9 }
0x2115   : > { %7267 = vmatprep.subr.mxu1 %v7724_v9 }
0x2117   : > { %7255 = vmatmul.mubr.msk.f32.vlgmr.msra.gmra.mrb[60].mxu1 %vm494_vm4, %v5288_v6  ;;  %v5693_v8 = vpop.permute.xlu1 %5692 }
0x2118   : > { %7268 = vmatpush3.xpose.msk.msra.mxu1 %vm494_vm4, %v5617_v46  ;;  %7269 = vmatprep.mubr.msk.f32.mxu1 %vm7723_vm0, %v7724_v9 }
0x2119   : > { %7272 = vmatprep.subr.mxu1 %v7724_v9 }
0x211b   : > { %7270 = vmatmul.mubr.msk.f32.vlgmr.msra.gmra.mrb[62].mxu1 %vm494_vm4, %v5615_v3 }
0x211c   : > { %7273 = vmatpush3.xpose.msk.msra.mxu1 %vm494_vm4, %v5693_v8  ;;  %7274 = vmatprep.mubr.msk.f32.mxu1 %vm7723_vm0, %v7724_v9 }
0x211d   : > { %7459 = vmatprep.subr.bf16.mxu1 %v7722_v1 }
0x211f   : > { %7275 = vmatmul.mubr.msk.f32.vlgmr.msra.gmra.mrb[64].mxu1 %vm494_vm4, %v5615_v3 }
0x2120   : > { %7295 = vmatprep.mubr.msk.f32.mxu1 %vm7723_vm0, %v7724_v9 }
0x216b   : > { %v4707_v10 = vpop.f32.mrb[50].mxu1 }
0x216c   : > { %v4708_v12 = vadd.f32 %v4707_v10, %v7902_v63  ;;  %v7211_v13 = vpop.f32.mrb[51].mxu1 }
0x216e   : > { %v4785_v11 = vsel %vm2975_vm11, %v4708_v12, -inf }
0x216f   : > { %4786 = vmax.xlane.f32.xlu0 %v4785_v11 }
0x21d5   : > { %v4781_v14 = vpop.f32.mrb[52].mxu1 }
0x21d6   : > { %v7216_v15 = vpop.f32.mrb[53].mxu1  ;;  %v4788_v16 = vsel %vm2979_vm9, %v4781_v14, -inf }
0x21d7   : > { %4789 = vmax.xlane.f32.xlu1 %v4788_v16 }
0x21dd   : > { %v5034_v18 = vpop.f32.mrb[54].mxu1 }
0x21de   : > { %v5035_v21 = vadd.f32 %v5034_v18, %v7902_v63  ;;  %v7231_v22 = vpop.f32.mrb[55].mxu1 }
0x21e0   : > { %v5112_v20 = vsel %vm2975_vm11, %v5035_v21, -inf }
0x21e1   : > { %5113 = vmax.xlane.f32.xlu0 %v5112_v20 }
0x21e2   : > { %v5108_v24 = vpop.f32.mrb[56].mxu1 }
0x21e3   : > { %v7236_v26 = vpop.f32.mrb[57].mxu1  ;;  %v5115_v27 = vsel %vm2979_vm9, %v5108_v24, -inf }
0x21e5   : > { %5116 = vmax.xlane.f32.xlu0 %v5115_v27 }
0x21e6   : > { %v5361_v28 = vpop.f32.mrb[58].mxu1 }
0x21e7   : > { %v7251_v29 = vpop.f32.mrb[59].mxu1  ;;  %v5362_v36 = vadd.f32 %v5361_v28, %v7902_v63 }
0x21e8   : > { %4805 = vrot.lane.b32.xlu1 %v8307_v57, %s7729_s24 }
0x21e9   : > { %v5439_v56 = vsel %vm2975_vm11, %v5362_v36, -inf }
0x21ea   : > { %v8382_v23 = vpop.f32.mrb[60].mxu1 }
0x21eb   : > { %v7256_v25 = vpop.f32.mrb[61].mxu1  ;;  %v5442_v31 = vsel %vm2979_vm9, %v8382_v23, -inf }
0x21ec   : > { %5443 = vmax.xlane.f32.xlu0 %v5442_v31 }
0x21ee   : > { %v5688_v32 = vpop.f32.mrb[62].mxu1 }
0x21ef   : > { %v7271_v33 = vpop.f32.mrb[63].mxu1  ;;  %v8393_v37 = vadd.f32 %v5688_v32, %v7902_v63 }
0x21f1   : > { %v5766_v38 = vsel %vm2975_vm11, %v8393_v37, -inf }
0x21f2   : > { %v8386_v34 = vpop.f32.mrb[64].mxu1 }
0x21f3   : > { %v7276_v35 = vpop.f32.mrb[65].mxu1  ;;  %v5769_v39 = vsel %vm2979_vm9, %v8386_v34, -inf }
0x21fc   : > { %v4787_v63 = vpop.xlane.xlu0 %4786 }
0x2202   : > { %4882 = vrot.lane.b32.xlu0 %v8313_v58, %s7726_s21 }
0x220c   : > { %5440 = vmax.xlane.f32.xlu1 %v5439_v56 }
0x221d   : > { %5132 = vrot.lane.b32.xlu1 %v8307_v57, %s7736_s8 }
0x2221   : > { %5767 = vmax.xlane.f32.xlu0 %v5766_v38  ;;  %5209 = vrot.lane.b32.xlu1 %v8313_v58, %s7725_s20 }
0x2225   : > { %5770 = vmax.xlane.f32.xlu0 %v5769_v39  ;;  %5459 = vrot.lane.b32.xlu1 %v8307_v57, %s7734_s6 }
0x2229   : > { %5536 = vrot.lane.b32.xlu1 %v8313_v58, %s7730_s25 }
0x222d   : > { %5863 = vrot.lane.b32.xlu1 %v8313_v58, %s7732_s27 }
0x223b   : > { %5786 = vrot.lane.b32.xlu0 %v8307_v57, %s7735_s7 }
0x2264   : > { %v4790_v40 = vpop.xlane.xlu1 %4789 }
0x2265   : > { %v4791_v41 = vmax.f32 %v4787_v63, %v4790_v40 }
0x2267   : > { %v4795_v42 = vsub.f32 %v4781_v14, %v4791_v41  ;;  %v4792_v45 = vsub.f32 %v4708_v12, %v4791_v41 }
0x2268   : > { %v4806_v43 = vpop.permute.xlu1 %4805 }
0x2269   : > { %v4796_v44 = vmul.f32 1.442695, %v4795_v42  ;;  %7218 = vmatpush3.msk.msra.mxu0 %vm3003_vm10, %v4806_v43  ;;  %v4793_v48 = vmul.f32 1.442695, %v4792_v45  ;;  %v5956_v45 = vld [vmem:[#allocation2 + $0x338] sm:$0xff] }
0x226a   : > { %7222 = vmatprep.subr.mxu0 %v7724_v9 }
0x226b   : > { %7648 = vpow2.f32 %v4796_v44 }
0x226c   : > { %7650 = vpow2.f32 %v4793_v48  ;;  %v5958_v48 = vld [vmem:[#allocation2 + $0x348] sm:$0xff] }
0x226e   : > { %v5114_v47 = vpop.xlane.xlu0 %5113 }
0x2272   : > { %v5117_v49 = vpop.xlane.xlu0 %5116 }
0x2273   : > { %v5118_v50 = vmax.f32 %v5114_v47, %v5117_v49  ;;  %v5957_v47 = vld [vmem:[#allocation2 + $0x340] sm:$0xff] }
0x2274   : > { %v7460_v49 = vpack.c.bf16 %v5957_v47, %v5956_v45  ;;  %v6152_v45 = vld [vmem:[#allocation2 + $0x3a0] sm:$0xff]  ;;  %v6153_v47 = vld [vmem:[#allocation2 + $0x3a8] sm:$0xff] }
0x2275   : > { %v5119_v51 = vsub.f32 %v5035_v21, %v5118_v50  ;;  %v5122_v52 = vsub.f32 %v5108_v24, %v5118_v50  ;;  %v8413_v53 = vpop.eup %7648  ;;  %v5959_v50 = vld [vmem:[#allocation2 + $0x350] sm:$0xff] }
0x2276   : > { %7220 = vmatmul.mubr.msk.f32.vlgmr.msra.gmra.mrb[38].mxu0 %vm2999_vm12, %v8413_v53  ;;  %v8419_v58 = vpop.eup %7650  ;;  %7461 = vmatpush3.bf16.msra.mxu1 %v7460_v49  ;;  %v6154_v49 = vld [vmem:[#allocation2 + $0x3b0] sm:$0xff] }
0x2277   : > { %v5120_v54 = vmul.f32 1.442695, %v5119_v51  ;;  %v5123_v55 = vmul.f32 1.442695, %v5122_v52  ;;  %7224 = vmatprep.mubr.msk.f32.mxu0 %vm7723_vm0, %v7724_v9  ;;  %v4798_v33 = vsel %vm2975_vm11, %v8419_v58, 0.0  ;;  %v7463_v51 = vpack.c.bf16 %v5959_v50, %v5958_v48  ;;  %7462 = vmatprep.subr.bf16.mxu1 %v7722_v1  ;;  %v6155_v50 = vld [vmem:[#allocation2 + $0x3b8] sm:$0xff] }
0x2278   : > { %v7475_v48 = vpack.c.bf16 %v6153_v47, %v6152_v45 }
0x2279   : > { %7652 = vpow2.f32 %v5120_v54  ;;  %v5444_v57 = vpop.xlane.xlu0 %5443 }
0x227a   : > { %7654 = vpow2.f32 %v5123_v55  ;;  %7464 = vmatpush3.bf16.msra.mxu1 %v7463_v51  ;;  %v7478_v51 = vpack.c.bf16 %v6155_v50, %v6154_v49 }
0x227b   : > { %7471 = vmatprep.subr.bf16.mxu1 %v7722_v1 }
0x227d   : > { %v4883_v60 = vpop.permute.xlu0 %4882 }
0x227e   : > { %7223 = vmatpush3.msra.mxu0 %v4883_v60 }
0x227f   : > { %7225 = vmatmul.mubr.msk.f32.vlgmr.msra.gmra.mrb[38].mxu0 %vm494_vm4, %v8419_v58  ;;  %7237 = vmatprep.subr.mxu0 %v7724_v9 }
0x2280   : > { %7239 = vmatprep.mubr.msk.f32.mxu0 %vm7723_vm0, %v7724_v9 }
0x2283   : > { %v7653_v61 = vpop.eup %7652 }
0x2284   : > { %v7655_v62 = vpop.eup %7654  ;;  %v5125_v0 = vsel %vm2975_vm11, %v7653_v61, 0.0 }
0x2285   : > { %v5128_v4 = vsel %vm2979_vm9, %v7655_v62, 0.0  ;;  %5126 = vadd.xlane.f32.xlu0 %v5125_v0 }
0x2286   : > { %5129 = vadd.xlane.f32.xlu1 %v5128_v4 }
0x2299   : > { %v5441_v2 = vpop.xlane.xlu1 %5440 }
0x229a   : > { %v5445_v5 = vmax.f32 %v5441_v2, %v5444_v57 }
0x229c   : > { %v5446_v6 = vsub.f32 %v5362_v36, %v5445_v5  ;;  %v5449_v7 = vsub.f32 %v8382_v23, %v5445_v5 }
0x229d   : > { %v5133_v46 = vpop.permute.xlu1 %5132 }
0x229e   : > { %v5447_v3 = vmul.f32 1.442695, %v5446_v6  ;;  %v5450_v8 = vmul.f32 1.442695, %v5449_v7  ;;  %7238 = vmatpush3.msk.msra.mxu0 %vm3003_vm10, %v5133_v46 }
0x229f   : > { %7240 = vmatmul.mubr.msk.f32.vlgmr.msra.gmra.mrb[40].mxu0 %vm2999_vm12, %v7655_v62  ;;  %7242 = vmatprep.subr.mxu0 %v7724_v9 }
0x22a0   : > { %7656 = vpow2.f32 %v5447_v3  ;;  %7244 = vmatprep.mubr.msk.f32.mxu0 %vm7723_vm0, %v7724_v9 }
0x22a1   : > { %7658 = vpow2.f32 %v5450_v8  ;;  %v5210_v10 = vpop.permute.xlu1 %5209 }
0x22a2   : > { %7243 = vmatpush3.msra.mxu0 %v5210_v10 }
0x22a3   : > { %7257 = vmatprep.subr.mxu0 %v7724_v9 }
0x22a5   : > { %v5460_v12 = vpop.permute.xlu1 %5459 }
0x22a7   : > { %7245 = vmatmul.mubr.msk.f32.vlgmr.msra.gmra.mrb[40].mxu0 %vm494_vm4, %v7653_v61 }
0x22a8   : > { %7258 = vmatpush3.msk.msra.mxu0 %vm3003_vm10, %v5460_v12  ;;  %7259 = vmatprep.mubr.msk.f32.mxu0 %vm7723_vm0, %v7724_v9 }
0x22a9   : > { %7262 = vmatprep.subr.mxu0 %v7724_v9  ;;  %v5537_v11 = vpop.permute.xlu1 %5536 }
0x22aa   : > { %v7657_v13 = vpop.eup %7656 }
0x22ab   : > { %v7659_v14 = vpop.eup %7658  ;;  %v5452_v15 = vsel %vm2975_vm11, %v7657_v13, 0.0 }
0x22ac   : > { %7260 = vmatmul.mubr.msk.f32.vlgmr.msra.gmra.mrb[42].mxu0 %vm2999_vm12, %v7659_v14  ;;  %5453 = vadd.xlane.f32.xlu0 %v5452_v15  ;;  %v5455_v18 = vsel %vm2979_vm9, %v7659_v14, 0.0 }
0x22ad   : > { %7263 = vmatpush3.msra.mxu0 %v5537_v11  ;;  %7264 = vmatprep.mubr.msk.f32.mxu0 %vm7723_vm0, %v7724_v9  ;;  %v5864_v31 = vpop.permute.xlu1 %5863 }
0x22ae   : > { %v5768_v16 = vpop.xlane.xlu0 %5767  ;;  %7277 = vmatprep.subr.mxu0 %v7724_v9 }
0x22b0   : > { %5456 = vadd.xlane.f32.xlu0 %v5455_v18 }
0x22b2   : > { %v5771_v21 = vpop.xlane.xlu0 %5770 }
0x22b3   : > { %v5772_v22 = vmax.f32 %v5768_v16, %v5771_v21  ;;  %v2551_v21 = vrot.slane %v8079_v30, 1 }
0x22b4   : > { %7265 = vmatmul.mubr.msk.f32.vlgmr.msra.gmra.mrb[42].mxu0 %vm494_vm4, %v7657_v13 }
0x22b5   : > { %v5773_v20 = vsub.f32 %v8393_v37, %v5772_v22  ;;  %v5776_v24 = vsub.f32 %v8386_v34, %v5772_v22  ;;  %7279 = vmatprep.mubr.msk.f32.mxu0 %vm7723_vm0, %v7724_v9  ;;  %v4801_v34 = vsel %vm2979_vm9, %v8413_v53, 0.0  ;;  %v2559_v22 = vrot.slane %v8079_v30, 3 }
0x22b6   : > { %v5787_v26 = vpop.permute.xlu0 %5786 }
0x22b7   : > { %v5774_v27 = vmul.f32 1.442695, %v5773_v20  ;;  %v5777_v28 = vmul.f32 1.442695, %v5776_v24  ;;  %7278 = vmatpush3.msk.msra.mxu0 %vm3003_vm10, %v5787_v26  ;;  %v2565_v20 = vrot.slane %v8079_v30, 5 }
0x22b8   : > { %7282 = vmatprep.subr.mxu0 %v7724_v9 }
0x22b9   : > { %7660 = vpow2.f32 %v5774_v27 }
0x22ba   : > { %7662 = vpow2.f32 %v5777_v28 }
0x22c3   : > { %v7661_v29 = vpop.eup %7660 }
0x22c4   : > { %v7663_v23 = vpop.eup %7662  ;;  %v5779_v25 = vsel %vm2975_vm11, %v7661_v29, 0.0 }
0x22c5   : > { %7280 = vmatmul.mubr.msk.f32.vlgmr.msra.gmra.mrb[44].mxu0 %vm2999_vm12, %v7663_v23  ;;  %v5782_v32 = vsel %vm2979_vm9, %v7663_v23, 0.0  ;;  %5780 = vadd.xlane.f32.xlu1 %v5779_v25  ;;  %v6059_v23 = vld [vmem:[#allocation2 + $0x368] sm:$0xff]  ;;  %v6060_v25 = vld [vmem:[#allocation2 + $0x370] sm:$0xff] }
0x22c6   : > { %7283 = vmatpush3.msra.mxu0 %v5864_v31  ;;  %5783 = vadd.xlane.f32.xlu0 %v5782_v32  ;;  %v7466_v31 = vpack.c.bf16 %v6060_v25, %v6059_v23  ;;  %v6061_v32 = vld [vmem:[#allocation2 + $0x378] sm:$0xff]  ;;  %v7741_v25 = vmov 1966171168  }
0x22c7   : > { %7284 = vmatprep.mubr.msk.f32.mxu0 %vm7723_vm0, %v7724_v9  ;;  %7465 = vmatprep.subr.bf16.mxu0 %v7722_v1 }
0x22c9   : > { %4799 = vadd.xlane.f32.xlu1 %v4798_v33  ;;  %v6062_v33 = vld [vmem:[#allocation2 + $0x380] sm:$0xff] }
0x22ca   : > { %4802 = vadd.xlane.f32.xlu0 %v4801_v34  ;;  %v7469_v34 = vpack.c.bf16 %v6062_v33, %v6061_v32 }
0x22cd   : > { %7285 = vmatmul.mubr.msk.f32.vlgmr.msra.gmra.mrb[44].mxu0 %vm494_vm4, %v7661_v29 }
0x22ce   : > { %7306 = vmatprep.mubr.msk.f32.mxu0 %vm7723_vm0, %v7724_v9  ;;  %7467 = vmatpush3.bf16.msra.mxu0 %v7466_v31  ;;  %v2588_v31 = vunpack.c.l.s4 %v7741_v25 }
0x22cf   : > { %7468 = vmatprep.subr.bf16.mxu0 %v7722_v1 }
0x22d2   : > { %7470 = vmatpush3.bf16.msra.mxu0 %v7469_v34 }
0x22d3   : > { %7483 = vmatprep.subr.bf16.mxu0 %v7722_v1 }
0x2312   : > { %v5127_v37 = vpop.xlane.xlu0 %5126 }
0x2313   : > { %v5130_v56 = vpop.xlane.xlu1 %5129 }
0x2314   : > { %v5131_v38 = vadd.f32 %v5130_v56, %v5127_v37 }
0x2316   : > { %7664 = vrcp.f32 %v5131_v38  ;;  %v6611_v38 = vld [vmem:[#allocation2 + $0x358] ss:$0 sm:$0xff] }
0x2320   : > { %v7665_v41 = vpop.eup %7664 }
0x2339   : > { %v5454_v39 = vpop.xlane.xlu0 %5453 }
0x233d   : > { %v5457_v63 = vpop.xlane.xlu0 %5456 }
0x233e   : > { %v5458_v40 = vadd.f32 %v5457_v63, %v5454_v39  ;;  %v6612_v63 = vld [vmem:[#allocation2 + $0x360] ss:$0 sm:$0xff] }
0x2340   : > { %7666 = vrcp.f32 %v5458_v40 }
0x234a   : > { %v7667_v52 = vpop.eup %7666 }
0x2352   : > { %v4954_v35 = vpop.f32.mrb[38].mxu0  ;;  %v5781_v57 = vpop.xlane.xlu1 %5780 }
0x2353   : > { %v7226_v36 = vpop.f32.mrb[39].mxu0  ;;  %v5784_v60 = vpop.xlane.xlu0 %5783 }
0x2354   : > { %v5785_v58 = vadd.f32 %v5784_v60, %v5781_v57  ;;  %v6613_v60 = vld [vmem:[#allocation2 + $0x388] ss:$0 sm:$0xff] }
0x2356   : > { %7668 = vrcp.f32 %v5785_v58  ;;  %v4800_v2 = vpop.xlane.xlu1 %4799 }
0x2357   : > { %v4803_v5 = vpop.xlane.xlu0 %4802 }
0x2358   : > { %v4804_v6 = vadd.f32 %v4803_v5, %v4800_v2 }
0x235a   : > { %7670 = vrcp.f32 %v4804_v6 }
0x2360   : > { %v7669_v61 = vpop.eup %7668 }
0x2364   : > { %v7671_v7 = vpop.eup %7670 }
0x2365   : > { %v4959_v3 = vmul.f32 %v7671_v7, %v4954_v35 }
0x237a   : > { %v5281_v42 = vpop.f32.mrb[40].mxu0 }
0x237b   : > { %v5286_v43 = vmul.f32 %v7665_v41, %v5281_v42  ;;  %v7246_v44 = vpop.f32.mrb[41].mxu0  ;;  %v6150_v42 = vld [vmem:[#allocation2 + $0x390] sm:$0xff] }
0x237d   : > { %5942 = vrot.lane.b32.xlu1 %v5286_v43, %s7737_s9  ;;  %v6151_v43 = vld [vmem:[#allocation2 + $0x398] sm:$0xff] }
0x237e   : > { %v7472_v44 = vpack.c.bf16 %v6151_v43, %v6150_v42 }
0x2387   : > { %v5608_v53 = vpop.f32.mrb[42].mxu0 }
0x2388   : > { %v5613_v54 = vmul.f32 %v7667_v52, %v5608_v53  ;;  %v7266_v55 = vpop.f32.mrb[43].mxu0  ;;  %v6156_v52 = vld [vmem:[#allocation2 + $0x3c0] sm:$0xff] }
0x2389   : > { %v6239_v55 = vld [vmem:[#allocation2 + $0x3e0] sm:$0xff] }
0x238a   : > { %5946 = vrot.lane.b32.xlu0 %v5613_v54, %s7738_s10  ;;  %v6238_v54 = vld [vmem:[#allocation2 + $0x3d8] sm:$0xff] }
0x238b   : > { %v7484_v57 = vpack.c.bf16 %v6239_v55, %v6238_v54 }
0x23a0   : > { %v5935_v62 = vpop.f32.mrb[44].mxu0 }
0x23a1   : > { %v5940_v0 = vmul.f32 %v7669_v61, %v5935_v62  ;;  %v7286_v4 = vpop.f32.mrb[45].mxu0 }
0x23a3   : > { %5950 = vrot.lane.b32.xlu1 %v5940_v0, %s7739_s11 }
0x23ef   : > { %v5943_v46 = vpop.permute.xlu1 %5942 }
0x23f0   : > { %v5953_v10 = vsel %vm494_vm4, %v4959_v3, %v5943_v46 }
0x23fc   : > { %v5947_v8 = vpop.permute.xlu0 %5946 }
0x23fd   : > { %v5954_v12 = vsel %vm1164_vm6, %v5953_v10, %v5947_v8  ;;  %v6240_v10 = vld [vmem:[#allocation2 + $0x3e8] sm:$0xff] }
0x2415   : > { %v5951_v13 = vpop.permute.xlu1 %5950 }
0x2416   : > { %v5955_v11 = vsel %vm1166_vm7, %v5954_v12, %v5951_v13  ;;  %v6241_v12 = vld [vmem:[#allocation2 + $0x3f0] sm:$0xff] }
0x2417   : > { %7296 = vmatmul.mubr.msk.f32.vlgmr.msra.gmra.mrb[66].mxu1 %vm378_vm3, %v5955_v11  ;;  %v7487_v13 = vpack.c.bf16 %v6241_v12, %v6240_v10  ;;  %v6616_v11 = vld [vmem:[#allocation2 + $0x3d0] ss:$0 sm:$0xff] }
0x2418   : > { %7325 = vmatprep.mubr.msk.f32.mxu1 %vm7723_vm0, %v7724_v9  ;;  %7473 = vmatpush3.bf16.msra.mxu1 %v7472_v44 }
0x2419   : > { %7474 = vmatprep.subr.bf16.mxu1 %v7722_v1 }
0x241c   : > { %7476 = vmatpush3.bf16.msra.mxu1 %v7475_v48 }
0x241d   : > { %7477 = vmatprep.subr.bf16.mxu1 %v7722_v1 }
0x2420   : > { %7479 = vmatpush3.bf16.msra.mxu1 %v7478_v51 }
0x2421   : > { %7480 = vmatprep.subr.bf16.mxu1 %v7722_v1 }
0x24ea   : > { %v6029_v14 = vpop.f32.mrb[66].mxu1 }
0x24eb   : > { %v8478_v15 = vadd.f32 %v6029_v14, %v8288_v19  ;;  %v7297_v16 = vpop.f32.mrb[67].mxu1  ;;  %v2573_v19 = vrot.slane %v8079_v30, 7 }
0x24ed   : > { %v6036_v18 = vsel %vm2635_vm8, %v8478_v15, 0.0 }
0x24ee   : > { %6037 = vadd.xlane.f32.xlu1 %v6036_v18 }
0x24ff   : > { %2552 = vrot.lane.b32.xlu1 %v2551_v21, %s7740_s12  ;;  %v6617_v21 = vld [vmem:[#allocation2 + $0x3f8] ss:$0 sm:$0xff] }
0x2503   : > { %2560 = vrot.lane.b32.xlu1 %v2559_v22, %s7726_s21 }
0x2507   : > { %2566 = vrot.lane.b32.xlu1 %v2565_v20, %s7740_s12 }
0x250b   : > { %2574 = vrot.lane.b32.xlu1 %v2573_v19, %s7726_s21 }
0x257b   : > { %v6038_v24 = vpop.xlane.xlu1 %6037 }
0x257c   : > { %v6039_v26 = vmul.f32 0.03125, %v6038_v24 }
0x257e   : > { %v6040_v27 = vsub.f32 %v8478_v15, %v6039_v26  ;;  %v2555_v26 = vrot.slane %v8079_v30, 2 }
0x2580   : > { %v6041_v28 = vmul.f32 %v6040_v27, %v6040_v27 }
0x2582   : > { %v6042_v29 = vsel %vm2635_vm8, %v6041_v28, 0.0 }
0x2583   : > { %6043 = vadd.xlane.f32.xlu0 %v6042_v29 }
0x2610   : > { %v6044_v35 = vpop.xlane.xlu0 %6043 }
0x2611   : > { %v6045_v36 = vmul.f32 0.03125, %v6044_v35 }
0x2613   : > { %v6046_v56 = vadd.f32 1e-05, %v6045_v36  ;;  %v2589_v36 = vunpack.c.0.s8 %v2588_v31 }
0x2615   : > { %7672 = vrsqrt.f32 %v6046_v56  ;;  %v2592_v42 = vsub.s32 %v2589_v36, %v7899_v59 }
0x261f   : > { %v7673_v37 = vpop.eup %7672 }
0x2620   : > { %v6048_v39 = vmul.f32 %v7673_v37, %v6040_v27  ;;  %v2569_v27 = vrot.slane %v8079_v30, 6  ;;  %v2563_v37 = vrot.slane %v8079_v30, 4 }
0x2622   : > { %v6053_v40 = vmul.f32 %v6611_v38, %v6048_v39 }
0x2624   : > { %v6058_v41 = vadd.f32 %v6612_v63, %v6053_v40 }
0x2626   : > { %7307 = vmatmul.mubr.msk.f32.vlgmr.msra.gmra.mrb[46].mxu0 %vm378_vm3, %v6058_v41 }
0x2627   : > { %7336 = vmatprep.mubr.msk.f32.mxu0 %vm7723_vm0, %v7724_v9  ;;  %v6157_v9 = vld [vmem:[#allocation2 + $0x3c8] sm:$0xff]  ;;  %7485 = vmatpush3.bf16.msra.mxu0 %v7484_v57 }
0x2628   : > { %v7481_v53 = vpack.c.bf16 %v6157_v9, %v6156_v52  ;;  %7486 = vmatprep.subr.bf16.mxu0 %v7722_v1  ;;  %v6619_v52 = vld [vmem:[#allocation2 + $0x400] ss:$0 sm:$0xff] }
0x262a   : > { %7482 = vmatpush3.bf16.msra.mxu1 %v7481_v53  ;;  %v6620_v53 = vld [vmem:[#allocation2 + $0x408] ss:$0 sm:$0xff] }
0x262b   : > { %7488 = vmatpush3.bf16.msra.mxu0 %v7487_v13 }
0x26f9   : > { %v6137_v58 = vpop.f32.mrb[46].mxu0 }
0x26fa   : > { %v6138_v61 = vadd.f32 %v6613_v60, %v6137_v58  ;;  %v7308_v62 = vpop.f32.mrb[47].mxu0 }
0x26fc   : > { %v6141_v0 = vmul.f32 %v6138_v61, %v6138_v61 }
0x26fe   : > { %v6142_v4 = vmul.f32 %v6141_v0, %v6138_v61 }
0x2700   : > { %v6143_v2 = vmul.f32 0.044715, %v6142_v4 }
0x2702   : > { %v6144_v5 = vadd.f32 %v6143_v2, %v6138_v61 }
0x2704   : > { %v6145_v6 = vmul.f32 0.7978846, %v6144_v5 }
0x2706   : > { %7674 = vtanh.f32 %v6145_v6 }
0x2710   : > { %v7675_v7 = vpop.eup %7674 }
0x2711   : > { %v6147_v46 = vadd.f32 1.0, %v7675_v7 }
0x2713   : > { %v6148_v3 = vmul.f32 0.5, %v6147_v46 }
0x2715   : > { %v6149_v8 = vmul.f32 %v6148_v3, %v6138_v61 }
0x2717   : > { %7326 = vmatmul.mubr.msk.f32.vlgmr.msra.gmra.mrb[68].mxu1 %vm295_vm1, %v6149_v8 }
0x27ea   : > { %v6227_v1 = vpop.f32.mrb[68].mxu1 }
0x27eb   : > { %v6231_v14 = vadd.f32 %v6227_v1, %v8478_v15  ;;  %v7327_v16 = vpop.f32.mrb[69].mxu1  ;;  %v2553_v15 = vpop.permute.xlu1 %2552 }
0x27ec   : > { %v2577_v56 = vsel %vm378_vm3, %v8079_v30, %v2553_v15 }
0x27ed   : > { %v6237_v18 = vadd.f32 %v6616_v11, %v6231_v14 }
0x27ef   : > { %7337 = vmatmul.mubr.msk.f32.vlgmr.msra.gmra.mrb[48].mxu0 %vm378_vm3, %v6237_v18  ;;  %v2561_v28 = vpop.permute.xlu1 %2560 }
0x27f3   : > { %v2567_v32 = vpop.permute.xlu1 %2566 }
0x27f4   : > { %v2581_v63 = vsel %vm378_vm3, %v2563_v37, %v2567_v32 }
0x27f7   : > { %v2575_v41 = vpop.permute.xlu1 %2574 }
0x28c2   : > { %v6316_v22 = vpop.f32.mrb[48].mxu0 }
0x28c3   : > { %v6317_v20 = vadd.f32 %v6617_v21, %v6316_v22  ;;  %v7338_v19 = vpop.f32.mrb[49].mxu0 }
0x28c5   : > { %v6322_v24 = vsel %vm2635_vm8, %v6317_v20, 0.0 }
0x28c6   : > { %6323 = vadd.xlane.f32.xlu0 %v6322_v24 }
0x28dc   : > { %2556 = vrot.lane.b32.xlu0 %v2555_v26, %s7729_s24 }
0x28e0   : > { %2570 = vrot.lane.b32.xlu0 %v2569_v27, %s7729_s24 }
0x2953   : > { %v6324_v29 = vpop.xlane.xlu0 %6323 }
0x2954   : > { %v6325_v23 = vmul.f32 0.03125, %v6324_v29 }
0x2956   : > { %v6326_v33 = vsub.f32 %v6317_v20, %v6325_v23 }
0x2957   : > { %v2557_v34 = vpop.permute.xlu0 %2556 }
0x2958   : > { %v6327_v35 = vmul.f32 %v6326_v33, %v6326_v33  ;;  %v2578_v38 = vsel %vm295_vm1, %v2577_v56, %v2557_v34 }
0x2959   : > { %v2580_v44 = vsel %vm2579_vm13, %v2578_v38, %v2561_v28 }
0x295a   : > { %v6328_v39 = vsel %vm2635_vm8, %v6327_v35, 0.0 }
0x295b   : > { %6329 = vadd.xlane.f32.xlu0 %v6328_v39  ;;  %v2571_v40 = vpop.permute.xlu0 %2570 }
0x295c   : > { %v2582_v43 = vsel %vm295_vm1, %v2581_v63, %v2571_v40 }
0x295d   : > { %v2583_v45 = vsel %vm2579_vm13, %v2582_v43, %v2575_v41 }
0x295e   : > { %v2586_v30 = vcombine.low %v2580_v44, %v2583_v45 }
0x2960   : > { %v2593_v47 = vrot.slane %v2586_v30, %v2592_v42 }
0x2962   : > { %v2600_v48 = vrot.slane %v2593_v47, %v2592_v42 }
0x2964   : > { %2606 = vst.msk [vmem:[%s271_s16] sm:$0x3] %vm2604_vm14, %v2600_v48 }
0x29e8   : > { %v6330_v49 = vpop.xlane.xlu0 %6329 }
0x29e9   : > { %v6331_v50 = vmul.f32 0.03125, %v6330_v49 }
0x29eb   : > { %v6332_v59 = vadd.f32 1e-05, %v6331_v50 }
0x29ed   : > { %7676 = vrsqrt.f32 %v6332_v59 }
0x29f7   : > { %v7677_v51 = vpop.eup %7676 }
0x29f8   : > { %v6334_v9 = vmul.f32 %v7677_v51, %v6326_v33 }
0x29fa   : > { %v6339_v54 = vmul.f32 %v6619_v52, %v6334_v9 }
0x29fc   : > { %v6344_v55 = vadd.f32 %v6620_v53, %v6339_v54 }
0x29fe   : > { %v6346_v57 = vrot.slane %v6344_v55, 1  ;;  %v6350_v60 = vrot.slane %v6344_v55, 2  ;;  %v6354_v17 = vrot.slane %v6344_v55, 3 }
0x2a00   : > { %6347 = vrot.lane.b32.xlu1 %v6346_v57, %s7740_s12 }
0x2a04   : > { %6351 = vrot.lane.b32.xlu1 %v6350_v60, %s7729_s24 }
0x2a08   : > { %6355 = vrot.lane.b32.xlu1 %v6354_v17, %s7726_s21 }
0x2a72   : > { %v6348_v58 = vpop.permute.xlu1 %6347 }
0x2a73   : > { %v6358_v62 = vsel %vm378_vm3, %v6344_v55, %v6348_v58 }
0x2a76   : > { %v6352_v61 = vpop.permute.xlu1 %6351 }
0x2a77   : > { %v6359_v0 = vsel %vm295_vm1, %v6358_v62, %v6352_v61 }
0x2a7a   : > { %v6356_v4 = vpop.permute.xlu1 %6355 }
0x2a7b   : > { %v6360_v2 = vsel %vm2579_vm13, %v6359_v0, %v6356_v4 }
0x2a7c   : > { %6361 = vst [vmem:[%s274_s22] sm:$0x1] %v6360_v2 }
0x2a7d PF: > { %s17_s18 = sadd.s32 1, %s7716_s18  }
0x2a7e   : > { %p14_p3 = scmp.ge.s32.totalorder %s17_s18, 4  }
0x2a80   :  { %16 = sbr.rel (!%p14_p3) target bundleno = 1 (0x1), region = 89 }
0x2a87   :  { %6393 = vsyncpa [#allocation3], 1 }
0x2a88   :  { %6395 = vsyncpa [#allocation3 + $0x1], 1 }

</bundles_post_ra>
